<compile_context>
chip_gen: v7x
topology: tpu7x:2x2x1
jax: 0.10.0
libtpu: 0.0.40
codegen_flags: <defaults>
</compile_context>

<pallas_src>
import functools

import jax
import jax.numpy as jnp
from jax.experimental import pallas as pl
from jax.experimental.pallas import tpu as pltpu


# --------------------------------------------------------------------------- kernels


def _se_kernel_3d(x_ref, w1t_ref, w2t_ref, o_ref, *, inv_l, precision):
    """Path for L % 128 == 0: (b_tile, C, L) blocks are already lane-dense."""
    x = x_ref[...]                                            # keep input dtype

    # Squeeze: mean over L == f32 sum * compile-time 1/L (block spans full L).
    pooled = jnp.sum(x, axis=-1, dtype=jnp.float32) * inv_l   # (b_tile, C) f32

    # Excitation MLP (bias-free, matching nn.Linear(..., bias=False)); tiny FLOPs.
    h = jnp.maximum(
        jnp.dot(pooled, w1t_ref[...].astype(jnp.float32),
                preferred_element_type=jnp.float32, precision=precision), 0.0)
    gate = jax.nn.sigmoid(
        jnp.dot(h, w2t_ref[...].astype(jnp.float32),
                preferred_element_type=jnp.float32, precision=precision))

    # Scale: broadcast gate over L; multiply in the input dtype (halves vreg/VMEM
    # pressure for bf16 on v6e/v7x; v5e widens per-vreg regardless).
    o_ref[...] = x * gate.astype(x.dtype)[:, :, None]


def _se_kernel_flat(x_ref, s_ref, st_ref, w1t_ref, w2t_ref, o_ref, *, inv_l, precision):
    """Lane-dense path for L % 128 != 0: x presented flattened as (b_tile, C*L).

    s_ref  : (C*L, C) one-hot segment matrix, S[c*L + l, c] = 1   (pooling)
    st_ref : (C, C*L) its transpose                               (gate broadcast)
    Both matmuls run on the otherwise-idle MXU; with one-hot operands they are exact.
    """
    x = x_ref[...]                                            # (b_tile, C*L), input dtype

    # Squeeze: per-channel mean over L via segment matmul, f32 accumulation.
    pooled = jnp.dot(x, s_ref[...], preferred_element_type=jnp.float32,
                     precision=precision) * inv_l             # (b_tile, C) f32

    # Excitation MLP (bias-free), f32.
    h = jnp.maximum(
        jnp.dot(pooled, w1t_ref[...].astype(jnp.float32),
                preferred_element_type=jnp.float32, precision=precision), 0.0)
    gate = jax.nn.sigmoid(
        jnp.dot(h, w2t_ref[...].astype(jnp.float32),
                preferred_element_type=jnp.float32, precision=precision))  # (b_tile, C)

    # Broadcast gate across each channel's L lanes via S^T (each output element is one
    # gate value * 1.0 -> exact), staying in the input dtype for the elementwise scale.
    scale = jnp.dot(gate.astype(x.dtype), st_ref[...],
                    preferred_element_type=x.dtype, precision=precision)   # (b_tile, C*L)
    o_ref[...] = x * scale


# ---------------------------------------------------------------- wrapper / heuristics


def _choose_b_tile(B, row_bytes, budget_bytes, min_steps=4):
    """Pick the batch tile for a cdiv grid (partial last block is fine).

    Priorities: stay under `budget_bytes` per tile (~2-4 MiB roofline knee), prefer a
    sublane-friendly tile (multiple of 8 or the whole batch), prefer an even step count
    (balances v7x's two TensorCores), target >= min_steps steps for pipelining, and
    otherwise take the largest tile.
    """
    cap = min(B, max(1, budget_bytes // max(row_bytes, 1)))
    if B >= min_steps:
        # Ask for >= min_steps steps, but never shrink below a sublane-aligned tile of
        # 8 if the budget already allows one.
        cap = max(min(cap, max(1, B // min_steps)), min(8, cap))

    candidates = set(range(8, cap + 1, 8)) | set(range(1, min(cap, 8) + 1))
    if cap >= B:
        candidates.add(B)

    def score(bt):
        steps = pl.cdiv(B, bt)
        aligned = (bt % 8 == 0) or (bt == B)
        even = (steps % 2 == 0) or (steps == 1)
        return (aligned, even, bt)

    b_tile = max(candidates, key=score)
    return b_tile, pl.cdiv(B, b_tile)


def _vmem_limit_bytes(resident_bytes):
    """Explicit scoped-VMEM limit, clamped to this generation's physical VMEM."""
    try:
        capacity = int(pltpu.get_tpu_info().vmem_capacity_bytes)
    except Exception:
        capacity = 64 * 1024 * 1024          # conservative fallback: v7x per-TC VMEM
    headroom = 2 * 1024 * 1024
    want = max(int(resident_bytes * 1.25) + (1 << 20), 32 * 1024 * 1024)
    return min(want, capacity - headroom)


def se_layer(x, w1, w2, *, tile_budget_bytes=4 * 1024 * 1024):
    """Fused SE layer. x: (B, C, L); w1: (H, C) = fc[0].weight; w2: (C, H) = fc[2].weight."""
    B, C, L = x.shape
    H = w1.shape[0]
    assert w1.shape == (H, C) and w2.shape == (C, H)

    w1t = w1.T                                   # (C, H)
    w2t = w2.T                                   # (H, C)
    inv_l = 1.0 / L                              # valid only while a block spans the full L
    itemsize = x.dtype.itemsize
    row_bytes = C * L * itemsize

    b_tile, steps = _choose_b_tile(B, row_bytes, tile_budget_bytes)
    grid = (steps,)

    # One-hot segment matmuls are exact at any precision, but f32 activations need
    # HIGHEST so the MXU does not truncate them (or the gate) to bf16.
    precision = (jax.lax.Precision.HIGHEST if itemsize >= 4
                 else jax.lax.Precision.DEFAULT)

    w_bytes = (w1t.size + w2t.size) * itemsize
    tile_bytes = b_tile * row_bytes

    if L % 128 == 0:
        # (b_tile, C, L) blocks: stores already lane-dense.
        kernel = functools.partial(_se_kernel_3d, inv_l=inv_l, precision=precision)
        operands = (x, w1t, w2t)
        in_specs = [
            pl.BlockSpec((b_tile, C, L), lambda b: (b, 0, 0)),   # x: one batch slab/step
            pl.BlockSpec((C, H), lambda b: (0, 0)),              # W1^T: resident
            pl.BlockSpec((H, C), lambda b: (0, 0)),              # W2^T: resident
        ]
        out_specs = pl.BlockSpec((b_tile, C, L), lambda b: (b, 0, 0))
        out_shape = jax.ShapeDtypeStruct((B, C, L), x.dtype)
        resident = 2 * 2 * tile_bytes + 2 * w_bytes
        post = lambda y: y
    else:
        # Lane-dense flattened path: present x as (B, C*L) (free, row-major contiguous)
        # and do pooling / gate broadcast with one-hot segment matmuls on the MXU.
        CL = C * L
        x2d = x.reshape(B, CL)
        s = jnp.repeat(jnp.eye(C, dtype=x.dtype), L, axis=0)     # (C*L, C)
        st = s.T                                                 # (C, C*L)
        kernel = functools.partial(_se_kernel_flat, inv_l=inv_l, precision=precision)
        operands = (x2d, s, st, w1t, w2t)
        in_specs = [
            pl.BlockSpec((b_tile, CL), lambda b: (b, 0)),        # x slab
            pl.BlockSpec((CL, C), lambda b: (0, 0)),             # S: resident
            pl.BlockSpec((C, CL), lambda b: (0, 0)),             # S^T: resident
            pl.BlockSpec((C, H), lambda b: (0, 0)),              # W1^T: resident
            pl.BlockSpec((H, C), lambda b: (0, 0)),              # W2^T: resident
        ]
        out_specs = pl.BlockSpec((b_tile, CL), lambda b: (b, 0))
        out_shape = jax.ShapeDtypeStruct((B, CL), x.dtype)
        resident = 2 * 2 * tile_bytes + 2 * 2 * CL * C * itemsize + 2 * w_bytes
        post = lambda y: y.reshape(B, C, L)

    out = pl.pallas_call(
        kernel,
        out_shape=out_shape,
        grid_spec=pltpu.PrefetchScalarGridSpec(
            num_scalar_prefetch=0,
            grid=grid,
            in_specs=in_specs,
            out_specs=out_specs,
        ),
        compiler_params=pltpu.CompilerParams(
            dimension_semantics=("parallel",),   # shard the batch axis across TCs (v7x)
            vmem_limit_bytes=_vmem_limit_bytes(resident),
        ),
    )(*operands)
    return post(out)


def se_layer_ref(x, w1, w2):
    """Pure-JAX reference mirroring the PyTorch forward (full-precision f32 matmuls)."""
    pooled = jnp.mean(x, axis=-1)                                         # (B, C)
    h = jnp.maximum(jnp.dot(pooled, w1.T, precision="highest"), 0.0)      # (B, H)
    gate = jax.nn.sigmoid(jnp.dot(h, w2.T, precision="highest"))          # (B, C)
    return x * gate[:, :, None]


if __name__ == "__main__":
    # Shapes consistent with SELayer(channel=64, reduction=16) on a (B, C, L) input.
    B, C, L = 2, 64, 16
    reduction = 16
    H = C // reduction  # 4

    key = jax.random.PRNGKey(0)
    kx, k1, k2 = jax.random.split(key, 3)
    x = jax.random.normal(kx, (B, C, L), dtype=jnp.float32)
    # Deterministic synthetic weights (shapes match nn.Linear weight layout).
    w1 = jax.random.normal(k1, (H, C), dtype=jnp.float32) * (1.0 / jnp.sqrt(C))
    w2 = jax.random.normal(k2, (C, H), dtype=jnp.float32) * (1.0 / jnp.sqrt(H))

    out = jax.block_until_ready(se_layer(x, w1, w2))
    ref = se_layer_ref(x, w1, w2)
    assert out.shape == (B, C, L)
    assert jnp.allclose(out, ref, atol=2e-5, rtol=2e-5), (
        f"mismatch vs reference: max|err|={jnp.max(jnp.abs(out - ref))}")

    # Second config: batch tile that does not divide B (partial last block) + 2-step grid.
    B2 = 10
    x2 = jax.random.normal(jax.random.PRNGKey(1), (B2, C, L), dtype=jnp.float32)
    out2 = jax.block_until_ready(
        se_layer(x2, w1, w2, tile_budget_bytes=8 * C * L * 4))
    ref2 = se_layer_ref(x2, w1, w2)
    assert out2.shape == (B2, C, L)
    assert jnp.allclose(out2, ref2, atol=2e-5, rtol=2e-5), (
        f"mismatch vs reference (partial block): max|err|={jnp.max(jnp.abs(out2 - ref2))}")

    print("KERNEL_OK")
</pallas_src>

<mosaic_0001>
module attributes {stable_mosaic.version = 11 : i64} {
  func.func @_se_kernel_flat(%arg0: i32, %arg1: memref<2x1024xf32, #tpu.memory_space<vmem>>, %arg2: memref<1024x64xf32, #tpu.memory_space<vmem>>, %arg3: memref<64x1024xf32, #tpu.memory_space<vmem>>, %arg4: memref<64x4xf32, #tpu.memory_space<vmem>>, %arg5: memref<4x64xf32, #tpu.memory_space<vmem>>, %arg6: memref<2x1024xf32, #tpu.memory_space<vmem>>) attributes {dimension_semantics = [#tpu.dimension_semantics<parallel>], iteration_bounds = array<i64: 1>, scalar_prefetch = 0 : i64, scratch_operands = 0 : i64, tpu.core_type = #tpu.core_type<tc>, window_params = [{transform_indices = @transform_0, window_bounds = array<i64: 2, 1024>}, {pipeline_mode = #tpu.pipeline_mode<synchronous>, transform_indices = @transform_1, window_bounds = array<i64: 1024, 64>}, {pipeline_mode = #tpu.pipeline_mode<synchronous>, transform_indices = @transform_2, window_bounds = array<i64: 64, 1024>}, {pipeline_mode = #tpu.pipeline_mode<synchronous>, transform_indices = @transform_3, window_bounds = array<i64: 64, 4>}, {pipeline_mode = #tpu.pipeline_mode<synchronous>, transform_indices = @transform_4, window_bounds = array<i64: 4, 64>}, {transform_indices = @transform_5, window_bounds = array<i64: 2, 1024>}]} {
    %c0 = arith.constant 0 : index
    %c0_0 = arith.constant 0 : index
    %0 = vector.load %arg1[%c0, %c0_0] : memref<2x1024xf32, #tpu.memory_space<vmem>>, vector<2x1024xf32>
    %c0_1 = arith.constant 0 : index
    %c0_2 = arith.constant 0 : index
    %1 = vector.load %arg2[%c0_1, %c0_2] : memref<1024x64xf32, #tpu.memory_space<vmem>>, vector<1024x64xf32>
    %cst = arith.constant dense<0.000000e+00> : vector<2x64xf32>
    %2 = tpu.matmul %0, %1, %cst {dimension_numbers = #tpu.dot_dimension_numbers<[1], [0], [0], [1], [0, 0, 1, 1], [], []>, precision = #tpu.contract_precision<fp32>} : vector<2x1024xf32>, vector<1024x64xf32>, vector<2x64xf32> -> vector<2x64xf32>
    %cst_3 = arith.constant 6.250000e-02 : f32
    %3 = vector.broadcast %cst_3 : f32 to vector<2x64xf32>
    %4 = arith.mulf %2, %3 : vector<2x64xf32>
    %c0_4 = arith.constant 0 : index
    %c0_5 = arith.constant 0 : index
    %5 = vector.load %arg4[%c0_4, %c0_5] : memref<64x4xf32, #tpu.memory_space<vmem>>, vector<64x4xf32>
    %cst_6 = arith.constant dense<0.000000e+00> : vector<2x4xf32>
    %6 = tpu.matmul %4, %5, %cst_6 {dimension_numbers = #tpu.dot_dimension_numbers<[1], [0], [0], [1], [0, 0, 1, 1], [], []>, precision = #tpu.contract_precision<fp32>} : vector<2x64xf32>, vector<64x4xf32>, vector<2x4xf32> -> vector<2x4xf32>
    %cst_7 = arith.constant 0.000000e+00 : f32
    %7 = vector.broadcast %cst_7 : f32 to vector<2x4xf32>
    %8 = arith.maximumf %6, %7 : vector<2x4xf32>
    %c0_8 = arith.constant 0 : index
    %c0_9 = arith.constant 0 : index
    %9 = vector.load %arg5[%c0_8, %c0_9] : memref<4x64xf32, #tpu.memory_space<vmem>>, vector<4x64xf32>
    %cst_10 = arith.constant dense<0.000000e+00> : vector<2x64xf32>
    %10 = tpu.matmul %8, %9, %cst_10 {dimension_numbers = #tpu.dot_dimension_numbers<[1], [0], [0], [1], [0, 0, 1, 1], [], []>, precision = #tpu.contract_precision<fp32>} : vector<2x4xf32>, vector<4x64xf32>, vector<2x64xf32> -> vector<2x64xf32>
    %11 = arith.negf %10 : vector<2x64xf32>
    %12 = math.exp %11 : vector<2x64xf32>
    %cst_11 = arith.constant 1.000000e+00 : f32
    %13 = vector.broadcast %cst_11 : f32 to vector<2x64xf32>
    %14 = arith.addf %13, %12 : vector<2x64xf32>
    %15 = arith.divf %13, %14 : vector<2x64xf32>
    %c0_12 = arith.constant 0 : index
    %c0_13 = arith.constant 0 : index
    %16 = vector.load %arg3[%c0_12, %c0_13] : memref<64x1024xf32, #tpu.memory_space<vmem>>, vector<64x1024xf32>
    %cst_14 = arith.constant dense<0.000000e+00> : vector<2x1024xf32>
    %17 = tpu.matmul %15, %16, %cst_14 {dimension_numbers = #tpu.dot_dimension_numbers<[1], [0], [0], [1], [0, 0, 1, 1], [], []>, precision = #tpu.contract_precision<fp32>} : vector<2x64xf32>, vector<64x1024xf32>, vector<2x1024xf32> -> vector<2x1024xf32>
    %18 = arith.mulf %0, %17 : vector<2x1024xf32>
    %c0_15 = arith.constant 0 : index
    %c0_16 = arith.constant 0 : index
    %19 = vector.load %arg6[%c0_15, %c0_16] : memref<2x1024xf32, #tpu.memory_space<vmem>>, vector<2x1024xf32>
    tpu.vector_store %arg6[%c0_15, %c0_16], %18 {strides = array<i32>} : memref<2x1024xf32, #tpu.memory_space<vmem>>, vector<2x1024xf32>,
    return
  }
  func.func @transform_0(%arg0: i32) -> (i32, i32) {
    %c0_i32 = arith.constant 0 : i32
    %c0_i32_0 = arith.constant 0 : i32
    return %arg0, %c0_i32 : i32, i32
  }
  func.func @transform_1(%arg0: i32) -> (i32, i32) {
    %c0_i32 = arith.constant 0 : i32
    %c0_i32_0 = arith.constant 0 : i32
    %c0_i32_1 = arith.constant 0 : i32
    return %c0_i32, %c0_i32_0 : i32, i32
  }
  func.func @transform_2(%arg0: i32) -> (i32, i32) {
    %c0_i32 = arith.constant 0 : i32
    %c0_i32_0 = arith.constant 0 : i32
    %c0_i32_1 = arith.constant 0 : i32
    return %c0_i32, %c0_i32_0 : i32, i32
  }
  func.func @transform_3(%arg0: i32) -> (i32, i32) {
    %c0_i32 = arith.constant 0 : i32
    %c0_i32_0 = arith.constant 0 : i32
    %c0_i32_1 = arith.constant 0 : i32
    return %c0_i32, %c0_i32_0 : i32, i32
  }
  func.func @transform_4(%arg0: i32) -> (i32, i32) {
    %c0_i32 = arith.constant 0 : i32
    %c0_i32_0 = arith.constant 0 : i32
    %c0_i32_1 = arith.constant 0 : i32
    return %c0_i32, %c0_i32_0 : i32, i32
  }
  func.func @transform_5(%arg0: i32) -> (i32, i32) {
    %c0_i32 = arith.constant 0 : i32
    %c0_i32_0 = arith.constant 0 : i32
    return %arg0, %c0_i32 : i32, i32
  }
}

</mosaic_0001>

<bundles_post_ra>
// kernel: tpu_custom_call.1
= control target key start
LH: loop header
LB: loop body
LE: loop exit
PB: predicated region body
PF: predicated region fallthrough
CT: control target
= control target key end

     0   :  { %v157_v19 = vlaneseq  ;;  %v9744_v24 = vmov 1983009808   ;;  %s13815_s0 = inlined_call_operand.vmem [shape: f32[2,1024], index: 0, kind: input, shape index: {}]   ;;  %s13816_s1 = inlined_call_operand.vmem [shape: f32[1024,64], index: 1, kind: input, shape index: {}]   ;;  %s13817_s2 = inlined_call_operand.vmem [shape: f32[64,1024], index: 2, kind: input, shape index: {}]   ;;  %s13818_s3 = inlined_call_operand.vmem [shape: f32[64,4], index: 3, kind: input, shape index: {}]   ;;  %s13819_s4 = inlined_call_operand.vmem [shape: f32[4,64], index: 4, kind: input, shape index: {}]   ;;  %s13820_s5 = inlined_call_operand.hbm [shape: f32[2,1024], index: 5, kind: output, shape index: {}]  }
   0x1   :  { %v39_v0 = vld [vmem:[%s13816_s1 + $0x80] sm:$0xff]  ;;  %v40_v1 = vld [vmem:[%s13816_s1 + $0x88] sm:$0xff]  ;;  %v41_v7 = vld [vmem:[%s13816_s1 + $0x90] sm:$0xff]  ;;  %v9826_v25 = vunpack.c.l.s4 %v9744_v24 }
   0x2   :  { %v23_v2 = vld [vmem:[%s13816_s1] sm:$0xff]  ;;  %v244_v3 = vand.u32 4294901760, %v39_v0  ;;  %v247_v4 = vand.u32 4294901760, %v40_v1  ;;  %v24_v5 = vld [vmem:[%s13816_s1 + $0x8] sm:$0xff]  ;;  %v42_v8 = vld [vmem:[%s13816_s1 + $0x98] sm:$0xff]  ;;  %v250_v10 = vand.u32 4294901760, %v41_v7 }
   0x3   :  { %v196_v6 = vand.u32 4294901760, %v23_v2  ;;  %v199_v9 = vand.u32 4294901760, %v24_v5  ;;  %v253_v11 = vand.u32 4294901760, %v42_v8  ;;  %v25_v12 = vld [vmem:[%s13816_s1 + $0x10] sm:$0xff]  ;;  %v26_v13 = vld [vmem:[%s13816_s1 + $0x18] sm:$0xff]  ;;  %v43_v14 = vld [vmem:[%s13816_s1 + $0xa0] sm:$0xff] }
   0x4   :  { %v9806_v15 = vpack.c.bf16 %v247_v4, %v244_v3  ;;  %v44_v16 = vld [vmem:[%s13816_s1 + $0xa8] sm:$0xff]  ;;  %v27_v17 = vld [vmem:[%s13816_s1 + $0x20] sm:$0xff]  ;;  %v9817_v20 = vsub.f32 %v39_v0, %v244_v3  ;;  %v45_v23 = vld [vmem:[%s13816_s1 + $0xb0] sm:$0xff]  ;;  %v9829_v26 = vsub.f32 %v40_v1, %v247_v4  ;;  %v202_v27 = vand.u32 4294901760, %v25_v12 }
   0x5   :  { %v28_v18 = vld [vmem:[%s13816_s1 + $0x28] sm:$0xff]  ;;  %v9819_v21 = vpack.c.bf16 %v199_v9, %v196_v6  ;;  %v9821_v22 = vpack.c.bf16 %v253_v11, %v250_v10  ;;  %v205_v28 = vand.u32 4294901760, %v26_v13  ;;  %v256_v29 = vand.u32 4294901760, %v43_v14  ;;  %v46_v34 = vld [vmem:[%s13816_s1 + $0xb8] sm:$0xff]  ;;  %v29_v35 = vld [vmem:[%s13816_s1 + $0x30] sm:$0xff] }
   0x6   :  { %8424 = vmatprep.subr.bf16.mxu1 %v9806_v15  ;;  %v9832_v30 = vsub.f32 %v23_v2, %v196_v6  ;;  %v259_v31 = vand.u32 4294901760, %v44_v16  ;;  %v208_v32 = vand.u32 4294901760, %v27_v17  ;;  %v211_v33 = vand.u32 4294901760, %v28_v18  ;;  %v30_v40 = vld [vmem:[%s13816_s1 + $0x38] sm:$0xff]  ;;  %v47_v41 = vld [vmem:[%s13816_s1 + $0xc0] sm:$0xff]  ;;  %v48_v42 = vld [vmem:[%s13816_s1 + $0xc8] sm:$0xff] }
   0x7   :  { %8426 = vmatpush3.bf16.msra.mxu1 %v9819_v21  ;;  %v9840_v36 = vsub.f32 %v24_v5, %v199_v9  ;;  %v9843_v37 = vsub.f32 %v41_v7, %v250_v10  ;;  %v9845_v38 = vpack.c.bf16 %v205_v28, %v202_v27  ;;  %v262_v39 = vand.u32 4294901760, %v45_v23  ;;  %v31_v51 = vld [vmem:[%s13816_s1 + $0x40] sm:$0xff]  ;;  %v32_v52 = vld [vmem:[%s13816_s1 + $0x48] sm:$0xff]  ;;  %v49_v57 = vld [vmem:[%s13816_s1 + $0xd0] sm:$0xff] }
   0x8   :  { %8428 = vmatprep.subr.bf16.mxu1 %v9821_v22  ;;  %v9856_v43 = vsub.f32 %v42_v8, %v253_v11  ;;  %v9858_v44 = vsub.f32 %v25_v12, %v202_v27  ;;  %v9860_v45 = vsub.f32 %v26_v13, %v205_v28  ;;  %v9862_v46 = vpack.c.bf16 %v259_v31, %v256_v29  ;;  %v50_v58 = vld [vmem:[%s13816_s1 + $0xd8] sm:$0xff]  ;;  %v33_v63 = vld [vmem:[%s13816_s1 + $0x50] sm:$0xff]  ;;  %v51_v1 = vld [vmem:[%s13816_s1 + $0xe0] sm:$0xff] }
   0x9   :  { %v9864_v47 = vsub.f32 %v43_v14, %v256_v29  ;;  %v9866_v48 = vsub.f32 %v44_v16, %v259_v31  ;;  %v265_v49 = vand.u32 4294901760, %v46_v34  ;;  %v214_v50 = vand.u32 4294901760, %v29_v35  ;;  %v34_v0 = vld [vmem:[%s13816_s1 + $0x58] sm:$0xff]  ;;  %v52_v6 = vld [vmem:[%s13816_s1 + $0xe8] sm:$0xff]  ;;  %v35_v7 = vld [vmem:[%s13816_s1 + $0x60] sm:$0xff] }
   0xa   :  { %v9875_v53 = vpack.c.bf16 %v211_v33, %v208_v32  ;;  %v217_v54 = vand.u32 4294901760, %v30_v40  ;;  %v268_v55 = vand.u32 4294901760, %v47_v41  ;;  %v271_v56 = vand.u32 4294901760, %v48_v42  ;;  %v36_v8 = vld [vmem:[%s13816_s1 + $0x68] sm:$0xff] }
   0xb   :  { %8430 = vmatpush3.bf16.msra.mxu1 %v9845_v38  ;;  %v9884_v59 = vsub.f32 %v27_v17, %v208_v32  ;;  %v9886_v60 = vsub.f32 %v28_v18, %v211_v33  ;;  %v9888_v61 = vpack.c.bf16 %v265_v49, %v262_v39  ;;  %v9890_v62 = vsub.f32 %v45_v23, %v262_v39  ;;  %v53_v33 = vld [vmem:[%s13816_s1 + $0xf0] sm:$0xff] }
   0xc   :  { %14195 = vst [vmem:[#allocation5_spill] sm:$0xff] %v9875_v53  ;;  %8432 = vmatprep.subr.bf16.mxu1 %v9862_v46  ;;  %v9901_v2 = vsub.f32 %v46_v34, %v265_v49  ;;  %v9903_v3 = vsub.f32 %v29_v35, %v214_v50  ;;  %v220_v4 = vand.u32 4294901760, %v31_v51  ;;  %v223_v5 = vand.u32 4294901760, %v32_v52  ;;  %v54_v34 = vld [vmem:[%s13816_s1 + $0xf8] sm:$0xff] }
   0xd   :  { %14196 = vst [vmem:[#allocation6_spill] sm:$0xff] %v9888_v61  ;;  %v9914_v9 = vpack.c.bf16 %v217_v54, %v214_v50  ;;  %v9916_v10 = vsub.f32 %v30_v40, %v217_v54  ;;  %v9918_v11 = vpack.c.bf16 %v271_v56, %v268_v55  ;;  %v9920_v12 = vsub.f32 %v47_v41, %v268_v55  ;;  %v9963_v54 = vld [vmem:[%s13816_s1 + $0x78] sm:$0xff] }
   0xe   :  { %v274_v13 = vand.u32 4294901760, %v49_v57  ;;  %v277_v14 = vand.u32 4294901760, %v50_v58  ;;  %v226_v16 = vand.u32 4294901760, %v33_v63  ;;  %v229_v17 = vand.u32 4294901760, %v34_v0 }
   0xf   :  { %14197 = vst [vmem:[#allocation7_spill] sm:$0xff] %v9914_v9  ;;  %14198 = vst [vmem:[#allocation8_spill] sm:$0xff] %v9918_v11  ;;  %8434 = vmatpush3.bf16.msra.mxu1 %v9875_v53  ;;  %v280_v18 = vand.u32 4294901760, %v51_v1  ;;  %v283_v23 = vand.u32 4294901760, %v52_v6  ;;  %v232_v24 = vand.u32 4294901760, %v35_v7  ;;  %v235_v27 = vand.u32 4294901760, %v36_v8 }
  0x10   :  { %8436 = vmatprep.subr.bf16.mxu1 %v9888_v61  ;;  %v9924_v28 = vsub.f32 %v48_v42, %v271_v56  ;;  %v9926_v29 = vpack.c.bf16 %v223_v5, %v220_v4  ;;  %v9928_v31 = vsub.f32 %v31_v51, %v220_v4  ;;  %v9930_v32 = vsub.f32 %v32_v52, %v223_v5  ;;  %v9958_v52 = vld [vmem:[%s13816_s1 + $0x70] sm:$0xff] }
  0x11   :  { %v9938_v35 = vpack.c.bf16 %v277_v14, %v274_v13  ;;  %v9940_v39 = vsub.f32 %v49_v57, %v274_v13  ;;  %v9942_v40 = vsub.f32 %v50_v58, %v277_v14  ;;  %v9944_v41 = vpack.c.bf16 %v229_v17, %v226_v16 }
  0x12   :  { %14199 = vst [vmem:[#allocation9_spill] sm:$0xff] %v9926_v29  ;;  %v9947_v42 = vsub.f32 %v33_v63, %v226_v16  ;;  %v9949_v49 = vsub.f32 %v34_v0, %v229_v17  ;;  %v9951_v50 = vpack.c.bf16 %v283_v23, %v280_v18  ;;  %v9953_v51 = vsub.f32 %v51_v1, %v280_v18  ;;  %v9984_v16 = vld [vmem:[%s13815_s0] sm:$0xff] }
  0x13   :  { %14200 = vst [vmem:[#allocation10_spill] sm:$0xff] %v9938_v35  ;;  %14201 = vst [vmem:[#allocation11_spill] sm:$0xff] %v9944_v41  ;;  %8438 = vmatpush3.bf16.msra.mxu1 %v9914_v9  ;;  %v9966_v55 = vsub.f32 %v52_v6, %v283_v23  ;;  %v9968_v56 = vpack.c.bf16 %v235_v27, %v232_v24  ;;  %v286_v57 = vand.u32 4294901760, %v53_v33  ;;  %v289_v58 = vand.u32 4294901760, %v54_v34 }
  0x14   :  { %14202 = vst [vmem:[#allocation12_spill] sm:$0xff] %v9951_v50  ;;  %8440 = vmatprep.subr.bf16.mxu1 %v9918_v11  ;;  %v9970_v63 = vsub.f32 %v35_v7, %v232_v24  ;;  %v156_v0 = vunpack.c.0.s8 %v9826_v25  ;;  %v158_v1 = vshrl.u32 %v157_v19, 7  ;;  %v13821_v4 = vand.u32 4294901760, %v9817_v20 }
  0x15   :  { %14203 = vst [vmem:[#allocation13_spill] sm:$0xff] %v9968_v56  ;;  %v9975_v5 = vsub.f32 %v36_v8, %v235_v27  ;;  %v9977_v13 = vpack.c.bf16 %v289_v58, %v286_v57  ;;  %v9987_v25 = vsub.f32 %v53_v33, %v286_v57  ;;  %v9989_v19 = vsub.f32 %v54_v34, %v289_v58 }
  0x16   :  { %v9991_v7 = vsub.s32 %v156_v0, %v158_v1  ;;  %v423_v8 = vsub.f32 %v9817_v20, %v13821_v4  ;;  %v13822_v17 = vand.u32 4294901760, %v9829_v26  ;;  %v13823_v18 = vand.u32 4294901760, %v9832_v30 }
  0x17   :  { %14204 = vst [vmem:[#allocation14_spill] sm:$0xff] %v9977_v13  ;;  %8442 = vmatpush3.bf16.msra.mxu1 %v9926_v29  ;;  %v13826_v23 = vand.u32 4294901760, %v9840_v36  ;;  %v8487_v24 = vpack.c.bf16 %v9829_v26, %v9817_v20 }
  0x18   :  { %14205 = vst [vmem:[#allocation15_spill] sm:$0xff] %v9991_v7  ;;  %8444 = vmatprep.subr.bf16.mxu1 %v9938_v35 }
  0x19   :  { %10 = vsyncpa [#allocation3], 0  ;;  %v160_v27 = vrot.slane %v9984_v16, %v9991_v7  ;;  %v424_v33 = vand.u32 4294901760, %v423_v8  ;;  %v8489_v34 = vpack.c.bf16 %v9840_v36, %v9832_v30  ;;  %v13833_v57 = vand.u32 4294901760, %v9843_v37  ;;  %8488 = vmatprep.subr.bf16.mxu0 %v8487_v24  ;;  %s9748_s9 = smov [#allocation2]  }
  0x1a   :  { %v430_v58 = vsub.f32 %v9829_v26, %v13822_v17  ;;  %v311_v0 = vsub.f32 %v9832_v30, %v13823_v18  ;;  %v318_v1 = vsub.f32 %v9840_v36, %v13826_v23  ;;  %v13836_v8 = vand.u32 4294901760, %v9856_v43  ;;  %s7364_s10 = sshll.u32 %s9748_s9, 4  ;;  %s7365_s10 = int_to_ptr.vmem [resolvable:$true] %s7364_s10 }
  0x1b   :  { %8446 = vmatpush3.bf16.msra.mxu1 %v9944_v41  ;;  %v168_v4 = vcombine.high %v160_v27, %v160_v27  ;;  %v10018_v6 = vand.u32 4294901760, %v160_v27  ;;  %8490 = vmatpush3.bf16.msra.mxu0 %v8489_v34  ;;  %v437_v17 = vsub.f32 %v9843_v37, %v13833_v57  ;;  %v13842_v14 = vand.u32 4294901760, %v9858_v44  ;;  %s9720_s13 = scalar_lea.vmem %s7365_s10, 256  ;;  %p9725_p1 = scmp.lt.s32.totalorder %s7365_s10, %s7365_s10 }
  0x1c   :  { %8448 = vmatprep.subr.bf16.mxu1 %v9951_v50  ;;  %v431_v18 = vand.u32 4294901760, %v430_v58  ;;  %v312_v35 = vand.u32 4294901760, %v311_v0  ;;  %v319_v23 = vand.u32 4294901760, %v318_v1  ;;  %v444_v24 = vsub.f32 %v9856_v43, %v13836_v8  ;;  %p9721_p0 = scmp.ne.s32.totalorder %s7365_s10, %s9720_s13  ;;  %p9726_p2 = scmp.lt.s32.totalorder %s9720_s13, %s9720_s13 }
  0x1d   :  { %v14206_v41 = vand.u32 4294901760, %v9958_v52  ;;  %v14207_v29 = vand.u32 4294901760, %v9963_v54  ;;  %v10034_v11 = vand.u32 4294901760, %v168_v4  ;;  %v10037_v57 = vsub.f32 %v160_v27, %v10018_v6 }
  0x1e   :  { %v325_v58 = vsub.f32 %v9858_v44, %v13842_v14  ;;  %v8455_v0 = vpack.c.bf16 %v431_v18, %v424_v33  ;;  %v438_v1 = vand.u32 4294901760, %v437_v17  ;;  %v445_v50 = vand.u32 4294901760, %v444_v24  ;;  %p9727_p3 = por %p9726_p2, %p9725_p1 }
  0x1f   :  { %v10032_v34 = vpack.c.bf16 %v14207_v29, %v14206_v41  ;;  %v13841_v8 = vand.u32 4294901760, %v9860_v45  ;;  %8450 = vmatpush3.bf16.msra.mxu1 %v9968_v56  ;;  %v10045_v9 = vsub.f32 %v168_v4, %v10034_v11  ;;  %v13843_v29 = vand.u32 4294901760, %v10037_v57 }
  0x20   :  { %v8457_v41 = vpack.c.bf16 %v319_v23, %v312_v35  ;;  %v8491_v27 = vpack.c.bf16 %v9856_v43, %v9843_v37  ;;  %8452 = vmatprep.subr.bf16.mxu1 %v9977_v13  ;;  %v326_v61 = vand.u32 4294901760, %v325_v58  ;;  %v8493_v18 = vpack.c.bf16 %v9860_v45, %v9858_v44  ;;  %p9728_p4 = pnand %p9727_p3, %p9721_p0 }
  0x21   :  { %14208 = vst [vmem:[#allocation16_spill] sm:$0xff] %v10032_v34  ;;  %v332_v17 = vsub.f32 %v9860_v45, %v13841_v8  ;;  %v13844_v33 = vand.u32 4294901760, %v9864_v47  ;;  %v300_v35 = vsub.f32 %v10037_v57, %v13843_v29  ;;  %v13853_v23 = vand.u32 4294901760, %v9866_v48  ;;  %669 = vmatprep.mubr.f32.mxu0 %v10045_v9 }
  0x22   :  { %8492 = vmatprep.subr.bf16.mxu0 %v8491_v27  ;;  %v8459_v58 = vpack.c.bf16 %v445_v50, %v438_v1  ;;  %v8495_v4 = vpack.c.bf16 %v9866_v48, %v9864_v47  ;;  %v14209_v27 = vand.u32 4294901760, %v10045_v9  ;;  %v14210_v1 = vand.u32 4294901760, %v9884_v59 }
  0x23   :  { %8494 = vmatpush3.bf16.msra.mxu0 %v8493_v18  ;;  %v451_v8 = vsub.f32 %v9864_v47, %v13844_v33  ;;  %8454 = vmatpush3.bf16.msra.mxu1 %v10032_v34  ;;  %v333_v24 = vand.u32 4294901760, %v332_v17  ;;  %v458_v50 = vsub.f32 %v9866_v48, %v13853_v23  ;;  %v301_v33 = vand.u32 4294901760, %v300_v35 }
  0x24   :  { %v294_v29 = vsub.f32 %v10045_v9, %v14209_v27  ;;  %v339_v18 = vsub.f32 %v9884_v59, %v14210_v1  ;;  %8456 = vmatprep.subr.bf16.mxu1 %v8455_v0  ;;  %v14211_v13 = vand.u32 4294901760, %v9886_v60  ;;  %8496 = vmatprep.subr.bf16.mxu0 %v8495_v4  ;;  %v8497_v27 = vpack.c.bf16 %v9886_v60, %v9884_v59 }
  0x25   :  { %v452_v14 = vand.u32 4294901760, %v451_v8  ;;  %v459_v56 = vand.u32 4294901760, %v458_v50  ;;  %v13857_v23 = vand.u32 4294901760, %v9890_v62  ;;  %v13856_v1 = vand.u32 4294901760, %v9901_v2 }
  0x26   :  { %v346_v34 = vsub.f32 %v9886_v60, %v14211_v13  ;;  %v295_v17 = vand.u32 4294901760, %v294_v29  ;;  %v340_v7 = vand.u32 4294901760, %v339_v18  ;;  %v13858_v0 = vand.u32 4294901760, %v9903_v3 }
  0x27   :  { %8498 = vmatpush3.bf16.msra.mxu0 %v8497_v27  ;;  %v13859_v8 = vand.u32 4294901760, %v9916_v10  ;;  %v14212_v35 = vand.u32 4294901760, %v9958_v52  ;;  %v465_v29 = vsub.f32 %v9890_v62, %v13857_v23  ;;  %v8501_v4 = vpack.c.bf16 %v9916_v10, %v9903_v3 }
  0x28   :  { %v347_v53 = vand.u32 4294901760, %v346_v34  ;;  %296 = vmatprep.mubr.f32.mxu1 %v295_v17  ;;  %v8499_v34 = vpack.c.bf16 %v9901_v2, %v9890_v62  ;;  %v8461_v50 = vpack.c.bf16 %v333_v24, %v326_v61  ;;  %v472_v18 = vsub.f32 %v9901_v2, %v13856_v1 }
  0x29   :  { %v10092_v13 = vsub.f32 %v9958_v52, %v14212_v35  ;;  %302 = vmatmul.mubr.f32.vlgmr.msra.gmra.mrb[0].mxu1 %v301_v33  ;;  %v353_v52 = vsub.f32 %v9903_v3, %v13858_v0  ;;  %v360_v27 = vsub.f32 %v9916_v10, %v13859_v8  ;;  %v466_v17 = vand.u32 4294901760, %v465_v29 }
  0x2a   :  { %8458 = vmatpush3.bf16.msra.mxu1 %v8457_v41  ;;  %8500 = vmatprep.subr.bf16.mxu0 %v8499_v34  ;;  %v13862_v35 = vand.u32 4294901760, %v9920_v12  ;;  %v13861_v33 = vand.u32 4294901760, %v9924_v28  ;;  %v13860_v61 = vand.u32 4294901760, %v9928_v31  ;;  %v8463_v24 = vpack.c.bf16 %v459_v56, %v452_v14 }
  0x2b   :  { %14213 = vst [vmem:[#allocation17_spill] sm:$0xff] %v10092_v13  ;;  %8460 = vmatprep.subr.bf16.mxu1 %v8459_v58  ;;  %v8465_v1 = vpack.c.bf16 %v347_v53, %v340_v7  ;;  %v473_v23 = vand.u32 4294901760, %v472_v18  ;;  %8502 = vmatpush3.bf16.msra.mxu0 %v8501_v4  ;;  %v13863_v0 = vand.u32 4294901760, %v9930_v32  ;;  %v8503_v56 = vpack.c.bf16 %v9924_v28, %v9920_v12 }
  0x2c   :  { %v479_v8 = vsub.f32 %v9920_v12, %v13862_v35  ;;  %v486_v41 = vsub.f32 %v9924_v28, %v13861_v33  ;;  %v367_v29 = vsub.f32 %v9928_v31, %v13860_v61  ;;  %532 = vmatprep.mubr.f32.mxu1 %v10034_v11  ;;  %v354_v53 = vand.u32 4294901760, %v353_v52 }
  0x2d   :  { %v361_v14 = vand.u32 4294901760, %v360_v27  ;;  %v374_v7 = vsub.f32 %v9930_v32, %v13863_v0  ;;  %v8505_v58 = vpack.c.bf16 %v9930_v32, %v9928_v31  ;;  %v8467_v34 = vpack.c.bf16 %v473_v23, %v466_v17  ;;  %8504 = vmatprep.subr.bf16.mxu0 %v8503_v56 }
  0x2e   :  { %8462 = vmatpush3.bf16.msra.mxu1 %v8461_v50  ;;  %v480_v4 = vand.u32 4294901760, %v479_v8  ;;  %v487_v18 = vand.u32 4294901760, %v486_v41  ;;  %v13866_v61 = vand.u32 4294901760, %v9940_v39  ;;  %v368_v33 = vand.u32 4294901760, %v367_v29 }
  0x2f   :  { %8464 = vmatprep.subr.bf16.mxu1 %v8463_v24  ;;  %8506 = vmatpush3.bf16.msra.mxu0 %v8505_v58  ;;  %v13864_v52 = vand.u32 4294901760, %v9942_v40  ;;  %v13865_v27 = vand.u32 4294901760, %v9947_v42  ;;  %v13867_v35 = vand.u32 4294901760, %v9949_v49  ;;  %v375_v0 = vand.u32 4294901760, %v374_v7 }
  0x30   :  { %v493_v50 = vsub.f32 %v9940_v39, %v13866_v61  ;;  %v8507_v23 = vpack.c.bf16 %v9942_v40, %v9940_v39  ;;  %v8509_v8 = vpack.c.bf16 %v9949_v49, %v9947_v42  ;;  %v8469_v17 = vpack.c.bf16 %v361_v14, %v354_v53 }
  0x31   :  { %v500_v24 = vsub.f32 %v9942_v40, %v13864_v52  ;;  %v381_v41 = vsub.f32 %v9947_v42, %v13865_v27  ;;  %v388_v29 = vsub.f32 %v9949_v49, %v13867_v35  ;;  %v13871_v7 = vand.u32 4294901760, %v9953_v51 }
  0x32   :  { %8466 = vmatpush3.bf16.msra.mxu1 %v8465_v1  ;;  %v494_v56 = vand.u32 4294901760, %v493_v50  ;;  %8508 = vmatprep.subr.bf16.mxu0 %v8507_v23  ;;  %v13868_v58 = vand.u32 4294901760, %v9966_v55  ;;  %v14214_v14 = vand.u32 4294901760, %v9963_v54  ;;  %v8471_v27 = vpack.c.bf16 %v487_v18, %v480_v4 }
  0x33   :  { %8468 = vmatprep.subr.bf16.mxu1 %v8467_v34  ;;  %v501_v61 = vand.u32 4294901760, %v500_v24  ;;  %8510 = vmatpush3.bf16.msra.mxu0 %v8509_v8  ;;  %v13870_v35 = vand.u32 4294901760, %v9975_v5  ;;  %v8473_v1 = vpack.c.bf16 %v375_v0, %v368_v33  ;;  %v507_v50 = vsub.f32 %v9953_v51, %v13871_v7 }
  0x34   :  { %v10157_v52 = vsub.f32 %v9963_v54, %v14214_v14  ;;  %v514_v23 = vsub.f32 %v9966_v55, %v13868_v58  ;;  %v8511_v53 = vpack.c.bf16 %v9966_v55, %v9953_v51  ;;  %v382_v54 = vand.u32 4294901760, %v381_v41 }
  0x35   :  { %v389_v14 = vand.u32 4294901760, %v388_v29  ;;  %v14215_v34 = vand.u32 4294901760, %v9970_v63  ;;  %v8513_v0 = vpack.c.bf16 %v9975_v5, %v9970_v63  ;;  %v8475_v33 = vpack.c.bf16 %v501_v61, %v494_v56 }
  0x36   :  { %8470 = vmatpush3.bf16.msra.mxu1 %v8469_v17  ;;  %v508_v18 = vand.u32 4294901760, %v507_v50  ;;  %v402_v8 = vsub.f32 %v9975_v5, %v13870_v35  ;;  %8512 = vmatprep.subr.bf16.mxu0 %v8511_v53  ;;  %v13869_v24 = vand.u32 4294901760, %v9987_v25  ;;  %v515_v41 = vand.u32 4294901760, %v514_v23 }
  0x37   :  { %v395_v4 = vsub.f32 %v9970_v63, %v14215_v34  ;;  %8472 = vmatprep.subr.bf16.mxu1 %v8471_v27  ;;  %8514 = vmatpush3.bf16.msra.mxu0 %v8513_v0  ;;  %v13872_v29 = vand.u32 4294901760, %v9989_v19  ;;  %v13873_v34 = vand.u32 4294901760, %v10092_v13  ;;  %v13875_v58 = vand.u32 4294901760, %v10157_v52 }
  0x38   :  { %v521_v61 = vsub.f32 %v9987_v25, %v13869_v24  ;;  %v8515_v17 = vpack.c.bf16 %v9989_v19, %v9987_v25  ;;  %v8517_v56 = vpack.c.bf16 %v10157_v52, %v10092_v13  ;;  %v8477_v53 = vpack.c.bf16 %v389_v14, %v382_v54 }
  0x39   :  { %v396_v27 = vand.u32 4294901760, %v395_v4  ;;  %v528_v50 = vsub.f32 %v9989_v19, %v13872_v29  ;;  %v403_v23 = vand.u32 4294901760, %v402_v8  ;;  %v409_v0 = vsub.f32 %v10092_v13, %v13873_v34 }
  0x3a   :  { %8474 = vmatpush3.bf16.msra.mxu1 %v8473_v1  ;;  %v416_v24 = vsub.f32 %v10157_v52, %v13875_v58  ;;  %8516 = vmatprep.subr.bf16.mxu0 %v8515_v17  ;;  %v14216_v35 = vand.u32 4294901760, %v9817_v20  ;;  %v14217_v54 = vand.u32 4294901760, %v9829_v26  ;;  %v8479_v4 = vpack.c.bf16 %v515_v41, %v508_v18 }
  0x3b   :  { %8476 = vmatprep.subr.bf16.mxu1 %v8475_v33  ;;  %v522_v7 = vand.u32 4294901760, %v521_v61  ;;  %v529_v29 = vand.u32 4294901760, %v528_v50  ;;  %8518 = vmatpush3.bf16.msra.mxu0 %v8517_v56  ;;  %v14218_v1 = vand.u32 4294901760, %v9832_v30  ;;  %v14219_v8 = vand.u32 4294901760, %v9840_v36  ;;  %v10268_v50 = vld [vmem:[%s13816_s1 + $0x188] sm:$0xff] }
  0x3c   :  { %v8551_v14 = vpack.c.bf16 %v14217_v54, %v14216_v35  ;;  %v14220_v13 = vand.u32 4294901760, %v9843_v37  ;;  %v14221_v17 = vand.u32 4294901760, %v9856_v43  ;;  %v8481_v20 = vpack.c.bf16 %v403_v23, %v396_v27 }
  0x3d   :  { %v8553_v34 = vpack.c.bf16 %v14219_v8, %v14218_v1  ;;  %v410_v26 = vand.u32 4294901760, %v409_v0  ;;  %v417_v35 = vand.u32 4294901760, %v416_v24  ;;  %v8483_v33 = vpack.c.bf16 %v529_v29, %v522_v7  ;;  %v14245_v0 = vld [vmem:[#allocation6_spill] sm:$0xff] }
  0x3e   :  { %8552 = vmatprep.subr.bf16.mxu0 %v8551_v14  ;;  %v8555_v58 = vpack.c.bf16 %v14221_v17, %v14220_v13  ;;  %8478 = vmatpush3.bf16.msra.mxu1 %v8477_v53  ;;  %v14222_v30 = vand.u32 4294901760, %v9858_v44  ;;  %v14223_v36 = vand.u32 4294901760, %v9860_v45  ;;  %v14224_v37 = vand.u32 4294901760, %v9864_v47 }
  0x3f   :  { %672 = vmatmul.mubr.f32.vlgmr.msra.gmra.mrb[0].mxu0 %v10037_v57  ;;  %8480 = vmatprep.subr.bf16.mxu1 %v8479_v4  ;;  %v14225_v43 = vand.u32 4294901760, %v9866_v48  ;;  %v8485_v24 = vpack.c.bf16 %v417_v35, %v410_v26  ;;  %v14226_v7 = vand.u32 4294901760, %v9884_v59  ;;  %v14227_v41 = vand.u32 4294901760, %v9886_v60  ;;  %v14250_v26 = vld [vmem:[#allocation7_spill] sm:$0xff]  ;;  %v14251_v35 = vld [vmem:[#allocation8_spill] sm:$0xff] }
  0x40   :  { %8554 = vmatpush3.bf16.msra.mxu0 %v8553_v34  ;;  %v8557_v18 = vpack.c.bf16 %v14223_v36, %v14222_v30  ;;  %946 = vmatprep.mubr.f32.mxu0 %v10034_v11  ;;  %v14228_v45 = vand.u32 4294901760, %v9890_v62  ;;  %v14230_v48 = vand.u32 4294901760, %v9903_v3  ;;  %v14231_v29 = vand.u32 4294901760, %v9916_v10 }
  0x41   :  { %8556 = vmatprep.subr.bf16.mxu0 %v8555_v58  ;;  %v8559_v13 = vpack.c.bf16 %v14225_v43, %v14224_v37  ;;  %v8561_v44 = vpack.c.bf16 %v14227_v41, %v14226_v7  ;;  %v14229_v58 = vand.u32 4294901760, %v9901_v2  ;;  %v14232_v59 = vand.u32 4294901760, %v9920_v12 }
  0x42   :  { %8482 = vmatpush3.bf16.msra.mxu1 %v8481_v20  ;;  %v8565_v34 = vpack.c.bf16 %v14231_v29, %v14230_v48  ;;  %v14233_v60 = vand.u32 4294901760, %v9924_v28  ;;  %v14234_v62 = vand.u32 4294901760, %v10045_v9  ;;  %v14235_v2 = vand.u32 4294901760, %v9928_v31  ;;  %v10288_v20 = vld [vmem:[%s13816_s1 + $0x100] sm:$0xff]  ;;  %v14256_v48 = vld [vmem:[#allocation9_spill] sm:$0xff]  ;;  %v14257_v29 = vld [vmem:[#allocation10_spill] sm:$0xff] }
  0x43   :  { %8484 = vmatprep.subr.bf16.mxu1 %v8483_v33  ;;  %v8563_v47 = vpack.c.bf16 %v14229_v58, %v14228_v45  ;;  %v14236_v3 = vand.u32 4294901760, %v9930_v32  ;;  %v14237_v12 = vand.u32 4294901760, %v9940_v39  ;;  %v14238_v28 = vand.u32 4294901760, %v9942_v40  ;;  %v14252_v33 = vld [vmem:[#allocation17_spill] sm:$0xff]  ;;  %v10338_v45 = vld [vmem:[%s13816_s1 + $0x1a0] sm:$0xff]  ;;  %v10343_v58 = vld [vmem:[%s13816_s1 + $0x1a8] sm:$0xff] }
  0x44   :  { %8558 = vmatpush3.bf16.msra.mxu0 %v8557_v18  ;;  %v8567_v61 = vpack.c.bf16 %v14233_v60, %v14232_v59  ;;  %v153_v53 = vcombine.high %v9984_v16, %v9984_v16  ;;  %v14239_v9 = vand.u32 4294901760, %v9947_v42  ;;  %v14240_v31 = vand.u32 4294901760, %v9949_v49  ;;  %v10263_v16 = vld [vmem:[%s13816_s1 + $0x180] sm:$0xff]  ;;  %v14243_v42 = vld [vmem:[#allocation5_spill] sm:$0xff] }
  0x45   :  { %8560 = vmatprep.subr.bf16.mxu0 %v8559_v13  ;;  %v8569_v10 = vpack.c.bf16 %v14236_v3, %v14235_v2  ;;  %v8571_v56 = vpack.c.bf16 %v14238_v28, %v14237_v12  ;;  %v14241_v27 = vand.u32 4294901760, %v9953_v51  ;;  %v14242_v39 = vand.u32 4294901760, %v9966_v55  ;;  %v14244_v49 = vld [vmem:[#allocation15_spill] sm:$0xff]  ;;  %v10376_v12 = vld [vmem:[%s13816_s1 + $0x128] sm:$0xff]  ;;  %v10381_v28 = vld [vmem:[%s13816_s1 + $0x1b0] sm:$0xff] }
  0x46   :  { %8486 = vmatpush3.bf16.msra.mxu1 %v8485_v24  ;;  %v8573_v32 = vpack.c.bf16 %v14240_v31, %v14239_v9  ;;  %v10272_v23 = vrot.slane %v153_v53, %v14244_v49  ;;  %v14246_v51 = vand.u32 4294901760, %v9970_v63  ;;  %v14247_v55 = vand.u32 4294901760, %v9975_v5  ;;  %v10293_v63 = vld [vmem:[%s13816_s1 + $0x108] sm:$0xff]  ;;  %v10298_v5 = vld [vmem:[%s13816_s1 + $0x190] sm:$0xff]  ;;  %v14260_v9 = vld [vmem:[#allocation11_spill] sm:$0xff] }
  0x47   :  { %8520 = vmatprep.subr.bf16.mxu1 %v9806_v15  ;;  %v8575_v40 = vpack.c.bf16 %v14242_v39, %v14241_v27  ;;  %v14248_v14 = vand.u32 4294901760, %v9987_v25  ;;  %v14249_v4 = vand.u32 4294901760, %v9989_v19  ;;  %v13894_v8 = vand.u32 4294901760, %v10263_v16  ;;  %v10303_v25 = vld [vmem:[%s13816_s1 + $0x198] sm:$0xff]  ;;  %v14261_v31 = vld [vmem:[#allocation12_spill] sm:$0xff] }
  0x48   :  { %8562 = vmatpush3.bf16.msra.mxu0 %v8561_v44  ;;  %v8577_v54 = vpack.c.bf16 %v14247_v55, %v14246_v51  ;;  %v13893_v17 = vand.u32 4294901760, %v10268_v50  ;;  %v169_v19 = vcombine.high %v10272_v23, %v10272_v23  ;;  %v14253_v30 = vand.u32 4294901760, %v14252_v33  ;;  %v10333_v44 = vld [vmem:[%s13816_s1 + $0x118] sm:$0xff]  ;;  %v14264_v33 = vld [vmem:[#allocation13_spill] sm:$0xff] }
  0x49   :  { %8564 = vmatprep.subr.bf16.mxu0 %v8563_v47  ;;  %534 = vmatmul.mubr.f32.vlgmr.msra.gmra.mrb[2].mxu1 %v10018_v6  ;;  %v8579_v1 = vpack.c.bf16 %v14249_v4, %v14248_v14  ;;  %v14254_v36 = vand.u32 4294901760, %v10157_v52  ;;  %v13890_v37 = vand.u32 4294901760, %v10288_v20  ;;  %v13887_v43 = vand.u32 4294901760, %v10293_v63  ;;  %v10328_v52 = vld [vmem:[%s13816_s1 + $0x110] sm:$0xff]  ;;  %v10420_v4 = vld [vmem:[%s13816_s1 + $0x138] sm:$0xff] }
  0x4a   :  { %8522 = vmatpush3.bf16.msra.mxu1 %v9819_v21  ;;  %776 = vmatprep.mubr.f32.mxu1 %v14234_v62  ;;  %v10315_v13 = vand.u32 4294901760, %v169_v19  ;;  %v10321_v24 = vpack.c.bf16 %v13893_v17, %v13894_v8  ;;  %v13886_v7 = vand.u32 4294901760, %v10298_v5  ;;  %v13885_v41 = vand.u32 4294901760, %v10303_v25  ;;  %v10415_v14 = vld [vmem:[%s13816_s1 + $0x130] sm:$0xff] }
  0x4b   :  { %8524 = vmatprep.subr.bf16.mxu1 %v9821_v22  ;;  %v8581_v18 = vpack.c.bf16 %v14254_v36, %v14253_v30  ;;  %v13884_v59 = vand.u32 4294901760, %v10328_v52  ;;  %v13883_v60 = vand.u32 4294901760, %v10333_v44  ;;  %v13880_v2 = vand.u32 4294901760, %v10338_v45  ;;  %v14265_v30 = vld [vmem:[#allocation14_spill] sm:$0xff]  ;;  %v10551_v8 = vld [vmem:[%s13816_s1 + $0x1f0] sm:$0xff] }
  0x4c   :  { %8566 = vmatpush3.bf16.msra.mxu0 %v8565_v34  ;;  %v10346_v47 = vsub.f32 %v169_v19, %v10315_v13  ;;  %v10354_v34 = vpack.c.bf16 %v13887_v43, %v13890_v37  ;;  %v10364_v62 = vpack.c.bf16 %v13885_v41, %v13886_v7  ;;  %v13877_v3 = vand.u32 4294901760, %v10343_v58  ;;  %v10430_v19 = vld [vmem:[%s13816_s1 + $0x1c8] sm:$0xff] }
  0x4d   :  { %8568 = vmatprep.subr.bf16.mxu0 %v8567_v61  ;;  %v13878_v39 = vand.u32 4294901760, %v10376_v12  ;;  %v13882_v55 = vand.u32 4294901760, %v10381_v28  ;;  %v14271_v37 = vand.u32 4294901760, %v10037_v57  ;;  %v10517_v17 = vand.u32 4294901760, %v10272_v23 }
  0x4e   :  { %8526 = vmatpush3.bf16.msra.mxu1 %v9845_v38  ;;  %14255 = vst [vmem:[#allocation5_spill] sm:$0xff] %v10346_v47  ;;  %14258 = vst [vmem:[#allocation6_spill] sm:$0xff] %v10354_v34  ;;  %v13876_v61 = vand.u32 4294901760, %v10346_v47  ;;  %v10408_v51 = vpack.c.bf16 %v13877_v3, %v13880_v2  ;;  %v13891_v3 = vand.u32 4294901760, %v10430_v19  ;;  %v10465_v2 = vld [vmem:[%s13816_s1 + $0x1d0] sm:$0xff]  ;;  %vm9746_vm0 = vmmov 0  }
  0x4f   :  { %8528 = vmatprep.subr.bf16.mxu1 %v9862_v46  ;;  %14259 = vst [vmem:[#allocation7_spill] sm:$0xff] %v10364_v62  ;;  %vm3652_vm1 = vcmask 523264   ;;  %vm4199_vm2 = vcmask 1043456   ;;  %vm4195_vm3 = vcmask 31744  }
  0x50   :  { %8570 = vmatpush3.bf16.msra.mxu0 %v8569_v10  ;;  %v10371_v10 = vld [vmem:[%s13816_s1 + $0x120] sm:$0xff]  ;;  %v1156_v53 = vsub.f32 %v10346_v47, %v13876_v61  ;;  %14263 = vst [vmem:[#allocation17_spill] sm:$0xff] %v10408_v51 }
  0x51   :  { %8572 = vmatprep.subr.bf16.mxu0 %v8571_v56  ;;  %v10386_v56 = vld [vmem:[%s13816_s1 + $0x1b8] sm:$0xff]  ;;  %v13879_v27 = vand.u32 4294901760, %v10371_v10 }
  0x52   :  { %8530 = vmatpush3.bf16.msra.mxu1 %v14243_v42 }
  0x53   :  { %8532 = vmatprep.subr.bf16.mxu1 %v14245_v0  ;;  %v10439_v36 = vpack.c.bf16 %v13878_v39, %v13879_v27  ;;  %v10455_v39 = vld [vmem:[%s13816_s1 + $0x140] sm:$0xff]  ;;  %v10460_v27 = vld [vmem:[%s13816_s1 + $0x148] sm:$0xff] }
  0x54   :  { %8574 = vmatpush3.bf16.msra.mxu0 %v8573_v32  ;;  %v10399_v32 = vpack.c.bf16 %v13883_v60, %v13884_v59  ;;  %v13896_v59 = vand.u32 4294901760, %v10455_v39  ;;  %v13895_v41 = vand.u32 4294901760, %v10460_v27 }
  0x55   :  { %8576 = vmatprep.subr.bf16.mxu0 %v8575_v40  ;;  %v1157_v40 = vand.u32 4294901760, %v1156_v53  ;;  %14266 = vst [vmem:[#allocation9_spill] sm:$0xff] %v10439_v36  ;;  %v13888_v53 = vand.u32 4294901760, %v10420_v4 }
  0x56   :  { %8534 = vmatpush3.bf16.msra.mxu1 %v14250_v26  ;;  %14262 = vst [vmem:[#allocation8_spill] sm:$0xff] %v10399_v32  ;;  %v10525_v57 = vpack.c.bf16 %v13895_v41, %v13896_v59  ;;  %v10541_v41 = vld [vmem:[%s13816_s1 + $0x160] sm:$0xff]  ;;  %v10546_v59 = vld [vmem:[%s13816_s1 + $0x168] sm:$0xff] }
  0x57   :  { %8536 = vmatprep.subr.bf16.mxu1 %v14251_v35 }
  0x58   :  { %8578 = vmatpush3.bf16.msra.mxu0 %v8577_v54  ;;  %v13881_v54 = vand.u32 4294901760, %v10386_v56  ;;  %14272 = vst [vmem:[#allocation13_spill] sm:$0xff] %v10525_v57 }
  0x59   :  { %8580 = vmatprep.subr.bf16.mxu0 %v8579_v1  ;;  %v10425_v1 = vld [vmem:[%s13816_s1 + $0x1c0] sm:$0xff] }
  0x5a   :  { %8538 = vmatpush3.bf16.msra.mxu1 %v14256_v48  ;;  %v13892_v61 = vand.u32 4294901760, %v10425_v1 }
  0x5b   :  { %8540 = vmatprep.subr.bf16.mxu1 %v14257_v29 }
  0x5c   :  { %8582 = vmatpush3.bf16.msra.mxu0 %v8581_v18  ;;  %v13889_v18 = vand.u32 4294901760, %v10415_v14  ;;  %v10488_v7 = vpack.c.bf16 %v13891_v3, %v13892_v61  ;;  %v10507_v3 = vld [vmem:[%s13816_s1 + $0x1e0] sm:$0xff]  ;;  %v10512_v61 = vld [vmem:[%s13816_s1 + $0x1e8] sm:$0xff] }
  0x5d   :  { %8616 = vmatprep.subr.bf16.mxu0 %v10321_v24 }
  0x5e   :  { %8542 = vmatpush3.bf16.msra.mxu1 %v14260_v9  ;;  %v10479_v60 = vpack.c.bf16 %v13888_v53, %v13889_v18  ;;  %14270 = vst [vmem:[#allocation12_spill] sm:$0xff] %v10488_v7  ;;  %v10495_v53 = vld [vmem:[%s13816_s1 + $0x150] sm:$0xff]  ;;  %v10500_v18 = vld [vmem:[%s13816_s1 + $0x158] sm:$0xff] }
  0x5f   :  { %948 = vmatmul.mubr.f32.vlgmr.msra.gmra.mrb[2].mxu0 %v10018_v6  ;;  %8544 = vmatprep.subr.bf16.mxu1 %v14261_v31 }
  0x60   :  { %8618 = vmatpush3.bf16.msra.mxu0 %v10354_v34  ;;  %1158 = vmatprep.mubr.f32.mxu0 %v1157_v40  ;;  %v10448_v40 = vpack.c.bf16 %v13881_v54, %v13882_v55  ;;  %v10470_v54 = vld [vmem:[%s13816_s1 + $0x1d8] sm:$0xff]  ;;  %v14268_v55 = vld [vmem:[#allocation16_spill] sm:$0xff]  ;;  %14269 = vst [vmem:[#allocation11_spill] sm:$0xff] %v10479_v60 }
  0x61   :  { %8620 = vmatprep.subr.bf16.mxu0 %v10364_v62  ;;  %v13897_v43 = vand.u32 4294901760, %v10470_v54  ;;  %v14286_v62 = vand.u32 4294901760, %v10333_v44 }
  0x62   :  { %8546 = vmatpush3.bf16.msra.mxu1 %v14264_v33  ;;  %14267 = vst [vmem:[#allocation10_spill] sm:$0xff] %v10448_v40 }
  0x63   :  { %8548 = vmatprep.subr.bf16.mxu1 %v14265_v30 }
  0x64   :  { %8622 = vmatpush3.bf16.msra.mxu0 %v10399_v32 }
  0x65   :  { %8624 = vmatprep.subr.bf16.mxu0 %v10408_v51  ;;  %v14285_v51 = vand.u32 4294901760, %v10328_v52 }
  0x66   :  { %8550 = vmatpush3.bf16.msra.mxu1 %v14268_v55 }
  0x67   :  { %8584 = vmatprep.subr.bf16.mxu1 %v9806_v15  ;;  %v13898_v15 = vand.u32 4294901760, %v10465_v2  ;;  %v10623_v32 = vsub.f32 %v10328_v52, %v14285_v51  ;;  %v14289_v51 = vand.u32 4294901760, %v10371_v10  ;;  %v14301_v52 = vand.u32 4294901760, %v10430_v19 }
  0x68   :  { %8626 = vmatpush3.bf16.msra.mxu0 %v10439_v36 }
  0x69   :  { %8628 = vmatprep.subr.bf16.mxu0 %v10448_v40  ;;  %780 = vmatmul.mubr.f32.vlgmr.msra.gmra.mrb[4].mxu1 %v14271_v37  ;;  %v1088_v37 = vand.u32 4294901760, %v10495_v53  ;;  %v14276_v40 = vand.u32 4294901760, %v10500_v18 }
  0x6a   :  { %8586 = vmatpush3.bf16.msra.mxu1 %v9819_v21  ;;  %1050 = vmatprep.mubr.f32.mxu1 %v10034_v11  ;;  %v10534_v21 = vpack.c.bf16 %v13897_v43, %v13898_v15  ;;  %v10556_v43 = vld [vmem:[%s13816_s1 + $0x1f8] sm:$0xff]  ;;  %v14274_v15 = vand.u32 4294901760, %v10263_v16 }
  0x6b   :  { %8588 = vmatprep.subr.bf16.mxu1 %v9821_v22  ;;  %v10566_v22 = vsub.f32 %v10272_v23, %v10517_v17  ;;  %v10577_v36 = vpack.c.bf16 %v14276_v40, %v1088_v37  ;;  %v14278_v23 = vand.u32 4294901760, %v10288_v20 }
  0x6c   :  { %8630 = vmatpush3.bf16.msra.mxu0 %v10479_v60  ;;  %14273 = vst [vmem:[#allocation14_spill] sm:$0xff] %v10534_v21  ;;  %v10561_v11 = vsub.f32 %v10263_v16, %v14274_v15  ;;  %v1094_v16 = vand.u32 4294901760, %v10541_v41 }
  0x6d   :  { %8632 = vmatprep.subr.bf16.mxu0 %v10488_v7  ;;  %v14275_v7 = vand.u32 4294901760, %v10268_v50  ;;  %14277 = vst [vmem:[#allocation16_spill] sm:$0xff] %v10577_v36  ;;  %v10584_v15 = vsub.f32 %v10288_v20, %v14278_v23  ;;  %v10603_v20 = vld [vmem:[%s13816_s1 + $0x178] sm:$0xff]  ;;  %v14282_v23 = vand.u32 4294901760, %v10293_v63 }
  0x6e   :  { %8590 = vmatpush3.bf16.msra.mxu1 %v9845_v38  ;;  %v10598_v38 = vld [vmem:[%s13816_s1 + $0x170] sm:$0xff] }
  0x6f   :  { %v10571_v60 = vsub.f32 %v10268_v50, %v14275_v7  ;;  %8592 = vmatprep.subr.bf16.mxu1 %v9862_v46  ;;  %v14279_v50 = vand.u32 4294901760, %v10507_v3  ;;  %v14280_v46 = vand.u32 4294901760, %v10512_v61 }
  0x70   :  { %8634 = vmatpush3.bf16.msra.mxu0 %v10525_v57  ;;  %v14284_v57 = vand.u32 4294901760, %v10303_v25 }
  0x71   :  { %8636 = vmatprep.subr.bf16.mxu0 %v10534_v21  ;;  %v10591_v7 = vpack.c.bf16 %v14280_v46, %v14279_v50  ;;  %v10608_v21 = vsub.f32 %v10293_v63, %v14282_v23  ;;  %v14283_v50 = vand.u32 4294901760, %v10298_v5  ;;  %v10628_v63 = vsub.f32 %v10333_v44, %v14286_v62 }
  0x72   :  { %v10618_v40 = vsub.f32 %v10303_v25, %v14284_v57  ;;  %8594 = vmatpush3.bf16.msra.mxu1 %v14243_v42  ;;  %v14288_v25 = vand.u32 4294901760, %v10343_v58  ;;  %v14290_v42 = vand.u32 4294901760, %v10546_v59  ;;  %v14292_v62 = vand.u32 4294901760, %v10376_v12 }
  0x73   :  { %14281 = vst [vmem:[#allocation18_spill] sm:$0xff] %v10591_v7  ;;  %v10613_v46 = vsub.f32 %v10298_v5, %v14283_v50  ;;  %v14287_v5 = vand.u32 4294901760, %v10338_v45  ;;  %v10645_v50 = vsub.f32 %v10371_v10, %v14289_v51  ;;  %8596 = vmatprep.subr.bf16.mxu1 %v14245_v0  ;;  %v14293_v10 = vand.u32 4294901760, %v10381_v28 }
  0x74   :  { %v10639_v57 = vsub.f32 %v10343_v58, %v14288_v25  ;;  %8638 = vmatpush3.bf16.msra.mxu0 %v10577_v36  ;;  %v10651_v44 = vpack.c.bf16 %v14290_v42, %v1094_v16  ;;  %v14294_v0 = vand.u32 4294901760, %v10386_v56  ;;  %v14295_v42 = vand.u32 4294901760, %v10551_v8 }
  0x75   :  { %v10634_v23 = vsub.f32 %v10338_v45, %v14287_v5  ;;  %v10658_v5 = vsub.f32 %v10376_v12, %v14292_v62  ;;  %v10663_v25 = vsub.f32 %v10381_v28, %v14293_v10  ;;  %8640 = vmatprep.subr.bf16.mxu0 %v10591_v7  ;;  %v14296_v58 = vand.u32 4294901760, %v10556_v43 }
  0x76   :  { %14291 = vst [vmem:[#allocation19_spill] sm:$0xff] %v10651_v44  ;;  %v10668_v51 = vsub.f32 %v10386_v56, %v14294_v0  ;;  %v14298_v12 = vand.u32 4294901760, %v10415_v14  ;;  %v14299_v28 = vand.u32 4294901760, %v10420_v4  ;;  %v14300_v56 = vand.u32 4294901760, %v10425_v1  ;;  %8598 = vmatpush3.bf16.msra.mxu1 %v14250_v26 }
  0x77   :  { %v10675_v45 = vpack.c.bf16 %v14296_v58, %v14295_v42  ;;  %v10695_v58 = vsub.f32 %v10430_v19, %v14301_v52  ;;  %8600 = vmatprep.subr.bf16.mxu1 %v14251_v35  ;;  %v14304_v19 = vand.u32 4294901760, %v10460_v27  ;;  %v14305_v26 = vand.u32 4294901760, %v10465_v2 }
  0x78   :  { %v10680_v62 = vsub.f32 %v10415_v14, %v14298_v12  ;;  %v10685_v10 = vsub.f32 %v10420_v4, %v14299_v28  ;;  %v10690_v0 = vsub.f32 %v10425_v1, %v14300_v56  ;;  %v14302_v14 = vand.u32 4294901760, %v10455_v39  ;;  %8642 = vmatpush3.bf16.msra.mxu0 %v10651_v44 }
  0x79   :  { %14297 = vst [vmem:[#allocation20_spill] sm:$0xff] %v10675_v45  ;;  %v13917_v4 = vand.u32 4294901760, %v10561_v11  ;;  %v14303_v28 = vand.u32 4294901760, %v10566_v22  ;;  %v10712_v52 = vsub.f32 %v10460_v27, %v14304_v19  ;;  %v14306_v56 = vand.u32 4294901760, %v10598_v38  ;;  %8644 = vmatprep.subr.bf16.mxu0 %v10675_v45 }
  0x7a   :  { %v10701_v42 = vsub.f32 %v10455_v39, %v14302_v14  ;;  %v10717_v39 = vsub.f32 %v10465_v2, %v14305_v26  ;;  %v14307_v14 = vand.u32 4294901760, %v10603_v20  ;;  %v10733_v19 = vsub.f32 %v10495_v53, %v1088_v37  ;;  %8602 = vmatpush3.bf16.msra.mxu1 %v14256_v48 }
  0x7b   :  { %v1162_v1 = vsub.f32 %v10566_v22, %v14303_v28  ;;  %v14309_v28 = vand.u32 4294901760, %v10470_v54  ;;  %v8679_v26 = vpack.c.bf16 %v10571_v60, %v10561_v11  ;;  %v14311_v35 = vand.u32 4294901760, %v10507_v3  ;;  %8604 = vmatprep.subr.bf16.mxu1 %v14257_v29 }
  0x7c   :  { %v10724_v12 = vpack.c.bf16 %v14307_v14, %v14306_v56  ;;  %v14310_v56 = vand.u32 4294901760, %v10500_v18  ;;  %v10765_v37 = vsub.f32 %v10541_v41, %v1094_v16  ;;  %v14314_v48 = vand.u32 4294901760, %v10584_v15 }
  0x7d   :  { %v10730_v27 = vsub.f32 %v10470_v54, %v14309_v28  ;;  %v10747_v54 = vsub.f32 %v10507_v3, %v14311_v35  ;;  %v14312_v28 = vand.u32 4294901760, %v10512_v61  ;;  %v1163_v35 = vand.u32 4294901760, %v1162_v1 }
  0x7e   :  { %14308 = vst [vmem:[#allocation21_spill] sm:$0xff] %v10724_v12  ;;  %v10742_v14 = vsub.f32 %v10500_v18, %v14310_v56  ;;  %v1285_v18 = vsub.f32 %v10561_v11, %v13917_v4  ;;  %v14313_v56 = vand.u32 4294901760, %v10571_v60  ;;  %8646 = vmatpush3.bf16.msra.mxu0 %v10724_v12  ;;  %v14315_v4 = vand.u32 4294901760, %v10608_v21  ;;  %8606 = vmatpush3.bf16.msra.mxu1 %v14260_v9 }
  0x7f   :  { %v10755_v2 = vsub.f32 %v10512_v61, %v14312_v28  ;;  %v1173_v61 = vsub.f32 %v10584_v15, %v14314_v48  ;;  %v8681_v28 = vpack.c.bf16 %v10608_v21, %v10584_v15  ;;  %8680 = vmatprep.subr.bf16.mxu0 %v8679_v26  ;;  %v8683_v41 = vpack.c.bf16 %v10618_v40, %v10613_v46 }
  0x80   :  { %v1292_v3 = vsub.f32 %v10571_v60, %v14313_v56  ;;  %v1180_v53 = vsub.f32 %v10608_v21, %v14315_v4  ;;  %v14316_v16 = vand.u32 4294901760, %v10613_v46  ;;  %v14317_v48 = vand.u32 4294901760, %v10618_v40  ;;  %8608 = vmatprep.subr.bf16.mxu1 %v14261_v31 }
  0x81   :  { %v14318_v26 = vand.u32 4294901760, %v10546_v59  ;;  %v1286_v1 = vand.u32 4294901760, %v1285_v18  ;;  %1164 = vmatmul.mubr.f32.vlgmr.msra.gmra.mrb[4].mxu0 %v1163_v35  ;;  %v1174_v4 = vand.u32 4294901760, %v1173_v61  ;;  %v8685_v9 = vpack.c.bf16 %v10628_v63, %v10623_v32 }
  0x82   :  { %v1299_v56 = vsub.f32 %v10613_v46, %v14316_v16  ;;  %v1306_v12 = vsub.f32 %v10618_v40, %v14317_v48  ;;  %v1293_v44 = vand.u32 4294901760, %v1292_v3  ;;  %v14319_v48 = vand.u32 4294901760, %v10551_v8  ;;  %8682 = vmatpush3.bf16.msra.mxu0 %v8681_v28  ;;  %1531 = vmatprep.mubr.f32.mxu0 %v10346_v47 }
  0x83   :  { %v10792_v29 = vsub.f32 %v10546_v59, %v14318_v26  ;;  %v1181_v26 = vand.u32 4294901760, %v1180_v53  ;;  %v14320_v18 = vand.u32 4294901760, %v10623_v32  ;;  %v14321_v35 = vand.u32 4294901760, %v10628_v63  ;;  %8684 = vmatprep.subr.bf16.mxu0 %v8683_v41  ;;  %8610 = vmatpush3.bf16.msra.mxu1 %v14264_v33 }
  0x84   :  { %v10799_v45 = vsub.f32 %v10551_v8, %v14319_v48  ;;  %v8687_v8 = vpack.c.bf16 %v10639_v57, %v10634_v23  ;;  %v1300_v61 = vand.u32 4294901760, %v1299_v56  ;;  %v1307_v28 = vand.u32 4294901760, %v1306_v12  ;;  %8612 = vmatprep.subr.bf16.mxu1 %v14265_v30 }
  0x85   :  { %v1187_v3 = vsub.f32 %v10623_v32, %v14320_v18  ;;  %v1194_v31 = vsub.f32 %v10628_v63, %v14321_v35  ;;  %v14322_v48 = vand.u32 4294901760, %v10634_v23  ;;  %v14323_v59 = vand.u32 4294901760, %v10639_v57 }
  0x86   :  { %v14324_v35 = vand.u32 4294901760, %v10556_v43  ;;  %v14325_v16 = vand.u32 4294901760, %v10598_v38  ;;  %v8647_v12 = vpack.c.bf16 %v1293_v44, %v1286_v1  ;;  %v14326_v7 = vand.u32 4294901760, %v10645_v50  ;;  %8686 = vmatpush3.bf16.msra.mxu0 %v8685_v9 }
  0x87   :  { %v1313_v53 = vsub.f32 %v10634_v23, %v14322_v48  ;;  %v1320_v18 = vsub.f32 %v10639_v57, %v14323_v59  ;;  %v14327_v33 = vand.u32 4294901760, %v10658_v5  ;;  %v1188_v44 = vand.u32 4294901760, %v1187_v3  ;;  %8688 = vmatprep.subr.bf16.mxu0 %v8687_v8  ;;  %8614 = vmatpush3.bf16.msra.mxu1 %v14268_v55 }
  0x88   :  { %v10823_v41 = vsub.f32 %v10556_v43, %v14324_v35  ;;  %v10828_v56 = vsub.f32 %v10598_v38, %v14325_v16  ;;  %v1201_v48 = vsub.f32 %v10645_v50, %v14326_v7  ;;  %v8689_v43 = vpack.c.bf16 %v10658_v5, %v10645_v50  ;;  %8648 = vmatprep.subr.bf16.mxu1 %v8647_v12 }
  0x89   :  { %v1208_v59 = vsub.f32 %v10658_v5, %v14327_v33  ;;  %v13939_v38 = vand.u32 4294901760, %v10668_v51  ;;  %v8649_v16 = vpack.c.bf16 %v1181_v26, %v1174_v4  ;;  %v1195_v1 = vand.u32 4294901760, %v1194_v31 }
  0x8a   :  { %v8691_v7 = vpack.c.bf16 %v10668_v51, %v10663_v25  ;;  %v8651_v30 = vpack.c.bf16 %v1307_v28, %v1300_v61  ;;  %v1314_v9 = vand.u32 4294901760, %v1313_v53  ;;  %v1321_v36 = vand.u32 4294901760, %v1320_v18  ;;  %8690 = vmatpush3.bf16.msra.mxu0 %v8689_v43  ;;  %1052 = vmatmul.mubr.f32.vlgmr.msra.gmra.mrb[6].mxu1 %v10018_v6 }
  0x8b   :  { %v13936_v47 = vand.u32 4294901760, %v10680_v62  ;;  %v1202_v33 = vand.u32 4294901760, %v1201_v48  ;;  %v13935_v34 = vand.u32 4294901760, %v10685_v10  ;;  %v13931_v35 = vand.u32 4294901760, %v10690_v0  ;;  %8650 = vmatpush3.bf16.msra.mxu1 %v8649_v16  ;;  %1394 = vmatprep.mubr.f32.mxu1 %v10315_v13 }
  0x8c   :  { %v13932_v4 = vand.u32 4294901760, %v10695_v58  ;;  %v1209_v26 = vand.u32 4294901760, %v1208_v59  ;;  %v14328_v3 = vand.u32 4294901760, %v10663_v25  ;;  %v1334_v8 = vsub.f32 %v10668_v51, %v13939_v38  ;;  %8692 = vmatprep.subr.bf16.mxu0 %v8691_v7  ;;  %8652 = vmatprep.subr.bf16.mxu1 %v8651_v30 }
  0x8d   :  { %v8693_v55 = vpack.c.bf16 %v10685_v10, %v10680_v62  ;;  %v8653_v61 = vpack.c.bf16 %v1195_v1, %v1188_v44  ;;  %v13934_v28 = vand.u32 4294901760, %v10701_v42  ;;  %v13933_v53 = vand.u32 4294901760, %v10712_v52 }
  0x8e   :  { %v1327_v31 = vsub.f32 %v10663_v25, %v14328_v3  ;;  %v8695_v18 = vpack.c.bf16 %v10695_v58, %v10690_v0  ;;  %v8655_v12 = vpack.c.bf16 %v1321_v36, %v1314_v9  ;;  %v1215_v48 = vsub.f32 %v10680_v62, %v13936_v47 }
  0x8f   :  { %v13937_v59 = vand.u32 4294901760, %v10717_v39  ;;  %v13938_v43 = vand.u32 4294901760, %v10730_v27  ;;  %v1222_v44 = vsub.f32 %v10685_v10, %v13935_v34  ;;  %v1341_v1 = vsub.f32 %v10690_v0, %v13931_v35  ;;  %8694 = vmatpush3.bf16.msra.mxu0 %v8693_v55  ;;  %8654 = vmatpush3.bf16.msra.mxu1 %v8653_v61 }
  0x90   :  { %v1348_v6 = vsub.f32 %v10695_v58, %v13932_v4  ;;  %v8657_v36 = vpack.c.bf16 %v1209_v26, %v1202_v33  ;;  %v1328_v7 = vand.u32 4294901760, %v1327_v31  ;;  %v1335_v9 = vand.u32 4294901760, %v1334_v8  ;;  %8696 = vmatprep.subr.bf16.mxu0 %v8695_v18  ;;  %8656 = vmatprep.subr.bf16.mxu1 %v8655_v12 }
  0x91   :  { %v8697_v16 = vpack.c.bf16 %v10712_v52, %v10701_v42  ;;  %v1229_v3 = vsub.f32 %v10701_v42, %v13934_v28  ;;  %v1236_v35 = vsub.f32 %v10712_v52, %v13933_v53  ;;  %v1242_v4 = vand.u32 4294901760, %v10733_v19 }
  0x92   :  { %v8699_v30 = vpack.c.bf16 %v10730_v27, %v10717_v39  ;;  %v1355_v33 = vsub.f32 %v10717_v39, %v13937_v59  ;;  %v1362_v26 = vsub.f32 %v10730_v27, %v13938_v43  ;;  %v1216_v55 = vand.u32 4294901760, %v1215_v48 }
  0x93   :  { %v1223_v18 = vand.u32 4294901760, %v1222_v44  ;;  %v1342_v53 = vand.u32 4294901760, %v1341_v1  ;;  %v1349_v28 = vand.u32 4294901760, %v1348_v6  ;;  %v14329_v34 = vand.u32 4294901760, %v10603_v20  ;;  %8698 = vmatpush3.bf16.msra.mxu0 %v8697_v16  ;;  %8658 = vmatpush3.bf16.msra.mxu1 %v8657_v36 }
  0x94   :  { %v8659_v59 = vpack.c.bf16 %v1335_v9, %v1328_v7  ;;  %v8701_v43 = vpack.c.bf16 %v10742_v14, %v10733_v19  ;;  %v1375_v38 = vand.u32 4294901760, %v10755_v2  ;;  %v1230_v31 = vand.u32 4294901760, %v1229_v3  ;;  %8700 = vmatprep.subr.bf16.mxu0 %v8699_v30 }
  0x95   :  { %v10898_v47 = vsub.f32 %v10603_v20, %v14329_v34  ;;  %v1237_v8 = vand.u32 4294901760, %v1236_v35  ;;  %v1243_v61 = vsub.f32 %v10733_v19, %v1242_v4  ;;  %v8703_v48 = vpack.c.bf16 %v10755_v2, %v10747_v54  ;;  %v11033_v19 = vld [vmem:[%s13816_s1 + $0x288] sm:$0xff] }
  0x96   :  { %v1356_v34 = vand.u32 4294901760, %v1355_v33  ;;  %v1363_v20 = vand.u32 4294901760, %v1362_v26  ;;  %v14330_v12 = vand.u32 4294901760, %v10742_v14  ;;  %v14331_v1 = vand.u32 4294901760, %v10747_v54  ;;  %8660 = vmatprep.subr.bf16.mxu1 %v8659_v59 }
  0x97   :  { %v8661_v35 = vpack.c.bf16 %v1223_v18, %v1216_v55  ;;  %v8663_v7 = vpack.c.bf16 %v1349_v28, %v1342_v53  ;;  %v1256_v9 = vand.u32 4294901760, %v10765_v37  ;;  %v13942_v16 = vand.u32 4294901760, %v10792_v29  ;;  %8702 = vmatpush3.bf16.msra.mxu0 %v8701_v43 }
  0x98   :  { %v1250_v44 = vsub.f32 %v10742_v14, %v14330_v12  ;;  %v1369_v6 = vsub.f32 %v10747_v54, %v14331_v1  ;;  %v1376_v3 = vsub.f32 %v10755_v2, %v1375_v38  ;;  %v8705_v30 = vpack.c.bf16 %v10792_v29, %v10765_v37  ;;  %8704 = vmatprep.subr.bf16.mxu0 %v8703_v48 }
  0x99   :  { %v13941_v33 = vand.u32 4294901760, %v10799_v45  ;;  %v13940_v26 = vand.u32 4294901760, %v10823_v41  ;;  %v8665_v36 = vpack.c.bf16 %v1237_v8, %v1230_v31  ;;  %v8707_v28 = vpack.c.bf16 %v10823_v41, %v10799_v45  ;;  %8662 = vmatpush3.bf16.msra.mxu1 %v8661_v35 }
  0x9a   :  { %v8667_v53 = vpack.c.bf16 %v1363_v20, %v1356_v34  ;;  %v1244_v55 = vand.u32 4294901760, %v1243_v61  ;;  %v1251_v59 = vand.u32 4294901760, %v1250_v44  ;;  %v1370_v43 = vand.u32 4294901760, %v1369_v6  ;;  %8664 = vmatprep.subr.bf16.mxu1 %v8663_v7 }
  0x9b   :  { %v1257_v18 = vsub.f32 %v10765_v37, %v1256_v9  ;;  %v1264_v12 = vsub.f32 %v10792_v29, %v13942_v16  ;;  %v1270_v1 = vand.u32 4294901760, %v10828_v56  ;;  %v1277_v31 = vand.u32 4294901760, %v10898_v47  ;;  %8706 = vmatpush3.bf16.msra.mxu0 %v8705_v30  ;;  %v11055_v37 = vld [vmem:[%s13816_s1 + $0x208] sm:$0xff] }
  0x9c   :  { %v1377_v8 = vand.u32 4294901760, %v1376_v3  ;;  %v1383_v61 = vsub.f32 %v10799_v45, %v13941_v33  ;;  %v1390_v48 = vsub.f32 %v10823_v41, %v13940_v26  ;;  %v8709_v34 = vpack.c.bf16 %v10898_v47, %v10828_v56  ;;  %8708 = vmatprep.subr.bf16.mxu0 %v8707_v28 }
  0x9d   :  { %v14332_v20 = vand.u32 4294901760, %v10561_v11  ;;  %v14333_v44 = vand.u32 4294901760, %v10571_v60  ;;  %v8669_v35 = vpack.c.bf16 %v1251_v59, %v1244_v55  ;;  %8666 = vmatpush3.bf16.msra.mxu1 %v8665_v36  ;;  %v1258_v7 = vand.u32 4294901760, %v1257_v18 }
  0x9e   :  { %v1265_v3 = vand.u32 4294901760, %v1264_v12  ;;  %v1271_v30 = vsub.f32 %v10828_v56, %v1270_v1  ;;  %v1278_v26 = vsub.f32 %v10898_v47, %v1277_v31  ;;  %8668 = vmatprep.subr.bf16.mxu1 %v8667_v53  ;;  %v8671_v33 = vpack.c.bf16 %v1377_v8, %v1370_v43  ;;  %v11087_v47 = vld [vmem:[%s13816_s1 + $0x210] sm:$0xff]  ;;  %v11092_v56 = vld [vmem:[%s13816_s1 + $0x218] sm:$0xff] }
  0x9f   :  { %v8743_v6 = vpack.c.bf16 %v14333_v44, %v14332_v20  ;;  %v1384_v28 = vand.u32 4294901760, %v1383_v61  ;;  %v1391_v16 = vand.u32 4294901760, %v1390_v48  ;;  %8710 = vmatpush3.bf16.msra.mxu0 %v8709_v34  ;;  %v14334_v60 = vand.u32 4294901760, %v10584_v15 }
  0xa0   :  { %v14335_v11 = vand.u32 4294901760, %v10608_v21  ;;  %v14336_v55 = vand.u32 4294901760, %v10613_v46  ;;  %v14337_v59 = vand.u32 4294901760, %v10618_v40  ;;  %v8673_v12 = vpack.c.bf16 %v1265_v3, %v1258_v7  ;;  %v14350_v7 = vld [vmem:[#allocation6_spill] sm:$0xff]  ;;  %v14351_v3 = vld [vmem:[#allocation5_spill] sm:$0xff] }
  0xa1   :  { %8744 = vmatprep.subr.bf16.mxu0 %v8743_v6  ;;  %8670 = vmatpush3.bf16.msra.mxu1 %v8669_v35  ;;  %v1272_v20 = vand.u32 4294901760, %v1271_v30  ;;  %v1279_v44 = vand.u32 4294901760, %v1278_v26  ;;  %v8675_v53 = vpack.c.bf16 %v1391_v16, %v1384_v28  ;;  %v14338_v15 = vand.u32 4294901760, %v10623_v32  ;;  %v10972_v26 = vld [vmem:[%s13815_s0 + $0x8] sm:$0xff] }
  0xa2   :  { %v8745_v36 = vpack.c.bf16 %v14335_v11, %v14334_v60  ;;  %v8747_v18 = vpack.c.bf16 %v14337_v59, %v14336_v55  ;;  %1534 = vmatmul.mubr.f32.vlgmr.msra.gmra.mrb[6].mxu0 %v10566_v22  ;;  %8672 = vmatprep.subr.bf16.mxu1 %v8671_v33  ;;  %v14339_v21 = vand.u32 4294901760, %v10628_v63  ;;  %v14340_v46 = vand.u32 4294901760, %v10634_v23  ;;  %v14358_v55 = vld [vmem:[#allocation8_spill] sm:$0xff]  ;;  %v14359_v59 = vld [vmem:[#allocation17_spill] sm:$0xff] }
  0xa3   :  { %v14341_v40 = vand.u32 4294901760, %v10639_v57  ;;  %1808 = vmatprep.mubr.f32.mxu0 %v10315_v13  ;;  %v8677_v16 = vpack.c.bf16 %v1279_v44, %v1272_v20  ;;  %v14342_v32 = vand.u32 4294901760, %v10645_v50  ;;  %v14343_v63 = vand.u32 4294901760, %v10658_v5 }
  0xa4   :  { %8746 = vmatpush3.bf16.msra.mxu0 %v8745_v36  ;;  %v8749_v43 = vpack.c.bf16 %v14339_v21, %v14338_v15  ;;  %v14344_v23 = vand.u32 4294901760, %v10663_v25  ;;  %v14345_v57 = vand.u32 4294901760, %v10668_v51  ;;  %v10984_v48 = vrot.slane %v10972_v26, %v14244_v49  ;;  %v11050_v21 = vld [vmem:[%s13816_s1 + $0x200] sm:$0xff] }
  0xa5   :  { %8748 = vmatprep.subr.bf16.mxu0 %v8747_v18  ;;  %v8751_v8 = vpack.c.bf16 %v14341_v40, %v14340_v46  ;;  %8674 = vmatpush3.bf16.msra.mxu1 %v8673_v12  ;;  %v8753_v33 = vpack.c.bf16 %v14343_v63, %v14342_v32  ;;  %v14346_v34 = vand.u32 4294901760, %v10680_v62  ;;  %v14347_v50 = vand.u32 4294901760, %v10685_v10  ;;  %v14353_v62 = vld [vmem:[#allocation7_spill] sm:$0xff] }
  0xa6   :  { %8676 = vmatprep.subr.bf16.mxu1 %v8675_v53  ;;  %v8755_v61 = vpack.c.bf16 %v14345_v57, %v14344_v23  ;;  %v14348_v6 = vand.u32 4294901760, %v10690_v0  ;;  %v14349_v25 = vand.u32 4294901760, %v10695_v58  ;;  %v185_v35 = vcombine.high %v10984_v48, %v10984_v48  ;;  %v11028_v12 = vld [vmem:[%s13816_s1 + $0x280] sm:$0xff]  ;;  %v14370_v23 = vld [vmem:[#allocation13_spill] sm:$0xff]  ;;  %v14371_v57 = vld [vmem:[#allocation14_spill] sm:$0xff] }
  0xa7   :  { %v8757_v5 = vpack.c.bf16 %v14347_v50, %v14346_v34  ;;  %v14352_v30 = vand.u32 4294901760, %v14351_v3  ;;  %v14354_v10 = vand.u32 4294901760, %v10701_v42  ;;  %v14355_v0 = vand.u32 4294901760, %v10712_v52 }
  0xa8   :  { %8750 = vmatpush3.bf16.msra.mxu0 %v8749_v43  ;;  %v8759_v51 = vpack.c.bf16 %v14349_v25, %v14348_v6  ;;  %v14356_v58 = vand.u32 4294901760, %v10717_v39  ;;  %v14357_v60 = vand.u32 4294901760, %v10730_v27  ;;  %v11010_v36 = vand.u32 4294901760, %v185_v35  ;;  %v14369_v43 = vld [vmem:[#allocation12_spill] sm:$0xff] }
  0xa9   :  { %8752 = vmatprep.subr.bf16.mxu0 %v8751_v8  ;;  %8678 = vmatpush3.bf16.msra.mxu1 %v8677_v16  ;;  %v8761_v28 = vpack.c.bf16 %v14355_v0, %v14354_v10  ;;  %v14360_v42 = vand.u32 4294901760, %v10742_v14  ;;  %v14361_v52 = vand.u32 4294901760, %v10747_v54  ;;  %v14363_v14 = vld [vmem:[#allocation9_spill] sm:$0xff]  ;;  %v14365_v2 = vand.u32 4294901760, %v10792_v29  ;;  %v11144_v10 = vld [vmem:[%s13816_s1 + $0x2b8] sm:$0xff]  ;;  %v14374_v0 = vld [vmem:[#allocation16_spill] sm:$0xff] }
  0xaa   :  { %8712 = vmatprep.subr.bf16.mxu1 %v10321_v24  ;;  %v8763_v11 = vpack.c.bf16 %v14357_v60, %v14356_v58  ;;  %v11023_v27 = vsub.f32 %v185_v35, %v11010_v36  ;;  %v14367_v20 = vand.u32 4294901760, %v10823_v41  ;;  %v13961_v53 = vand.u32 4294901760, %v11028_v12  ;;  %v11066_v41 = vld [vmem:[%s13816_s1 + $0x298] sm:$0xff]  ;;  %v11134_v35 = vld [vmem:[%s13816_s1 + $0x228] sm:$0xff] }
  0xab   :  { %v8765_v18 = vpack.c.bf16 %v14360_v42, %v1242_v4  ;;  %v8767_v39 = vpack.c.bf16 %v1375_v38, %v14361_v52  ;;  %v14364_v4 = vld [vmem:[#allocation10_spill] sm:$0xff]  ;;  %v8769_v54 = vpack.c.bf16 %v14365_v2, %v1256_v9  ;;  %v14366_v38 = vand.u32 4294901760, %v10799_v45  ;;  %v11061_v45 = vld [vmem:[%s13816_s1 + $0x290] sm:$0xff]  ;;  %v14368_v9 = vld [vmem:[#allocation11_spill] sm:$0xff] }
  0xac   :  { %8754 = vmatpush3.bf16.msra.mxu0 %v8753_v33  ;;  %1396 = vmatmul.mubr.f32.vlgmr.msra.gmra.mrb[8].mxu1 %v10517_v17  ;;  %14362 = vst [vmem:[#allocation6_spill] sm:$0xff] %v11023_v27  ;;  %v13958_v15 = vand.u32 4294901760, %v11033_v19  ;;  %v13943_v29 = vand.u32 4294901760, %v11023_v27  ;;  %v8773_v46 = vpack.c.bf16 %v1277_v31, %v1270_v1  ;;  %v13955_v40 = vand.u32 4294901760, %v11050_v21  ;;  %v11100_v31 = vld [vmem:[%s13816_s1 + $0x2a0] sm:$0xff]  ;;  %v11105_v33 = vld [vmem:[%s13816_s1 + $0x2a8] sm:$0xff] }
  0xad   :  { %8756 = vmatprep.subr.bf16.mxu0 %v8755_v61  ;;  %8714 = vmatpush3.bf16.msra.mxu1 %v14350_v7  ;;  %v8771_v44 = vpack.c.bf16 %v14367_v20, %v14366_v38  ;;  %v13954_v8 = vand.u32 4294901760, %v11055_v37  ;;  %v13953_v32 = vand.u32 4294901760, %v11061_v45  ;;  %v13952_v63 = vand.u32 4294901760, %v11066_v41  ;;  %v11175_v2 = vld [vmem:[%s13816_s1 + $0x238] sm:$0xff]  ;;  %v11185_v38 = vld [vmem:[%s13816_s1 + $0x2c8] sm:$0xff]  ;;  %v14378_v20 = vld [vmem:[#allocation19_spill] sm:$0xff] }
  0xae   :  { %1638 = vmatprep.mubr.f32.mxu1 %v14352_v30  ;;  %8716 = vmatprep.subr.bf16.mxu1 %v14353_v62  ;;  %v11080_v16 = vpack.c.bf16 %v13958_v15, %v13961_v53  ;;  %v2018_v1 = vsub.f32 %v11023_v27, %v13943_v29  ;;  %v13951_v34 = vand.u32 4294901760, %v11087_v47  ;;  %v13948_v50 = vand.u32 4294901760, %v11092_v56  ;;  %v11139_v30 = vld [vmem:[%s13816_s1 + $0x2b0] sm:$0xff] }
  0xaf   :  { %v11113_v61 = vpack.c.bf16 %v13954_v8, %v13955_v40  ;;  %v13945_v6 = vand.u32 4294901760, %v11100_v31  ;;  %v13944_v25 = vand.u32 4294901760, %v11105_v33  ;;  %v13949_v52 = vand.u32 4294901760, %v11144_v10  ;;  %v11306_v40 = vld [vmem:[%s13816_s1 + $0x2f0] sm:$0xff] }
  0xb0   :  { %8758 = vmatpush3.bf16.msra.mxu0 %v8757_v5  ;;  %v11122_v5 = vpack.c.bf16 %v13952_v63, %v13953_v32  ;;  %v2019_v3 = vand.u32 4294901760, %v2018_v1  ;;  %v11154_v58 = vpack.c.bf16 %v13948_v50, %v13951_v34  ;;  %v11220_v50 = vld [vmem:[%s13816_s1 + $0x2d0] sm:$0xff]  ;;  %v14385_v15 = vand.u32 4294901760, %v10566_v22 }
  0xb1   :  { %8760 = vmatprep.subr.bf16.mxu0 %v8759_v51  ;;  %8718 = vmatpush3.bf16.msra.mxu1 %v14358_v55  ;;  %14372 = vst [vmem:[#allocation5_spill] sm:$0xff] %v11113_v61  ;;  %v11129_v51 = vld [vmem:[%s13816_s1 + $0x220] sm:$0xff]  ;;  %v11163_v42 = vpack.c.bf16 %v13944_v25, %v13945_v6  ;;  %v13959_v6 = vand.u32 4294901760, %v11185_v38  ;;  %v11272_v53 = vand.u32 4294901760, %v10984_v48 }
  0xb2   :  { %8720 = vmatprep.subr.bf16.mxu1 %v14359_v59  ;;  %14373 = vst [vmem:[#allocation7_spill] sm:$0xff] %v11122_v5  ;;  %14376 = vst [vmem:[#allocation8_spill] sm:$0xff] %v11154_v58  ;;  %v13947_v60 = vand.u32 4294901760, %v11129_v51 }
  0xb3   :  { %14377 = vst [vmem:[#allocation17_spill] sm:$0xff] %v11163_v42  ;;  %14386 = vst [vmem:[#allocation13_spill] sm:$0xff] %v11272_v53 }
  0xb4   :  { %8762 = vmatpush3.bf16.msra.mxu0 %v8761_v28  ;;  %v14375_v28 = vld [vmem:[#allocation18_spill] sm:$0xff] }
  0xb5   :  { %8764 = vmatprep.subr.bf16.mxu0 %v8763_v11  ;;  %8722 = vmatpush3.bf16.msra.mxu1 %v14363_v14  ;;  %v13946_v11 = vand.u32 4294901760, %v11134_v35 }
  0xb6   :  { %8724 = vmatprep.subr.bf16.mxu1 %v14364_v4 }
  0xb8   :  { %8766 = vmatpush3.bf16.msra.mxu0 %v8765_v18  ;;  %v13950_v18 = vand.u32 4294901760, %v11139_v30 }
  0xb9   :  { %8768 = vmatprep.subr.bf16.mxu0 %v8767_v39  ;;  %8726 = vmatpush3.bf16.msra.mxu1 %v14368_v9  ;;  %v11170_v39 = vld [vmem:[%s13816_s1 + $0x230] sm:$0xff] }
  0xba   :  { %8728 = vmatprep.subr.bf16.mxu1 %v14369_v43  ;;  %v13957_v1 = vand.u32 4294901760, %v11170_v39  ;;  %v11203_v29 = vpack.c.bf16 %v13949_v52, %v13950_v18  ;;  %v11225_v52 = vld [vmem:[%s13816_s1 + $0x2d8] sm:$0xff]  ;;  %v14382_v18 = vld [vmem:[#allocation21_spill] sm:$0xff] }
  0xbc   :  { %8770 = vmatpush3.bf16.msra.mxu0 %v8769_v54  ;;  %v11180_v54 = vld [vmem:[%s13816_s1 + $0x2c0] sm:$0xff]  ;;  %14381 = vst [vmem:[#allocation10_spill] sm:$0xff] %v11203_v29 }
  0xbd   :  { %8772 = vmatprep.subr.bf16.mxu0 %v8771_v44  ;;  %8730 = vmatpush3.bf16.msra.mxu1 %v14370_v23  ;;  %v14379_v44 = vld [vmem:[#allocation20_spill] sm:$0xff]  ;;  %v13960_v25 = vand.u32 4294901760, %v11180_v54 }
  0xbe   :  { %8732 = vmatprep.subr.bf16.mxu1 %v14371_v57 }
  0xbf   :  { %v11243_v8 = vpack.c.bf16 %v13959_v6, %v13960_v25  ;;  %v11262_v6 = vld [vmem:[%s13816_s1 + $0x2e0] sm:$0xff]  ;;  %v11267_v25 = vld [vmem:[%s13816_s1 + $0x2e8] sm:$0xff] }
  0xc0   :  { %8774 = vmatpush3.bf16.msra.mxu0 %v8773_v46  ;;  %v11194_v46 = vpack.c.bf16 %v13946_v11, %v13947_v60  ;;  %v11210_v11 = vld [vmem:[%s13816_s1 + $0x240] sm:$0xff]  ;;  %v11215_v60 = vld [vmem:[%s13816_s1 + $0x248] sm:$0xff] }
  0xc1   :  { %8808 = vmatprep.subr.bf16.mxu0 %v11080_v16  ;;  %8734 = vmatpush3.bf16.msra.mxu1 %v14374_v0  ;;  %v13965_v63 = vand.u32 4294901760, %v11210_v11  ;;  %v13964_v32 = vand.u32 4294901760, %v11215_v60  ;;  %14384 = vst [vmem:[#allocation12_spill] sm:$0xff] %v11243_v8 }
  0xc2   :  { %8736 = vmatprep.subr.bf16.mxu1 %v14375_v28  ;;  %14380 = vst [vmem:[#allocation9_spill] sm:$0xff] %v11194_v46 }
  0xc3   :  { %1810 = vmatmul.mubr.f32.vlgmr.msra.gmra.mrb[8].mxu0 %v10517_v17  ;;  %v11280_v22 = vpack.c.bf16 %v13964_v32, %v13965_v63  ;;  %v11296_v32 = vld [vmem:[%s13816_s1 + $0x260] sm:$0xff]  ;;  %v11301_v63 = vld [vmem:[%s13816_s1 + $0x268] sm:$0xff] }
  0xc4   :  { %8810 = vmatpush3.bf16.msra.mxu0 %v11113_v61  ;;  %2020 = vmatprep.mubr.f32.mxu0 %v2019_v3  ;;  %v13956_v3 = vand.u32 4294901760, %v11175_v2  ;;  %v14402_v61 = vand.u32 4294901760, %v11092_v56 }
  0xc5   :  { %8812 = vmatprep.subr.bf16.mxu0 %v11122_v5  ;;  %8738 = vmatpush3.bf16.msra.mxu1 %v14378_v20  ;;  %14387 = vst [vmem:[#allocation14_spill] sm:$0xff] %v11280_v22 }
  0xc6   :  { %8740 = vmatprep.subr.bf16.mxu1 %v14379_v44  ;;  %v11234_v34 = vpack.c.bf16 %v13956_v3, %v13957_v1  ;;  %v11250_v3 = vld [vmem:[%s13816_s1 + $0x250] sm:$0xff]  ;;  %v11255_v1 = vld [vmem:[%s13816_s1 + $0x258] sm:$0xff] }
  0xc8   :  { %8814 = vmatpush3.bf16.msra.mxu0 %v11154_v58  ;;  %14383 = vst [vmem:[#allocation11_spill] sm:$0xff] %v11234_v34  ;;  %v14401_v58 = vand.u32 4294901760, %v11087_v47 }
  0xc9   :  { %8816 = vmatprep.subr.bf16.mxu0 %v11163_v42  ;;  %8742 = vmatpush3.bf16.msra.mxu1 %v14382_v18 }
  0xca   :  { %8776 = vmatprep.subr.bf16.mxu1 %v10321_v24  ;;  %v13966_v24 = vand.u32 4294901760, %v11220_v50  ;;  %v11378_v5 = vsub.f32 %v11087_v47, %v14401_v58  ;;  %v14405_v58 = vand.u32 4294901760, %v11129_v51  ;;  %v14417_v47 = vand.u32 4294901760, %v11185_v38 }
  0xcc   :  { %8818 = vmatpush3.bf16.msra.mxu0 %v11194_v46  ;;  %1642 = vmatmul.mubr.f32.vlgmr.msra.gmra.mrb[10].mxu1 %v14385_v15  ;;  %v1950_v15 = vand.u32 4294901760, %v11250_v3  ;;  %v14392_v46 = vand.u32 4294901760, %v11255_v1 }
  0xcd   :  { %8820 = vmatprep.subr.bf16.mxu0 %v11203_v29  ;;  %8778 = vmatpush3.bf16.msra.mxu1 %v14350_v7 }
  0xce   :  { %1912 = vmatprep.mubr.f32.mxu1 %v10315_v13  ;;  %8780 = vmatprep.subr.bf16.mxu1 %v14353_v62  ;;  %v14388_v13 = vand.u32 4294901760, %v11225_v52  ;;  %v11321_v62 = vsub.f32 %v10984_v48, %v11272_v53  ;;  %v11332_v42 = vpack.c.bf16 %v14392_v46, %v1950_v15  ;;  %v14394_v48 = vand.u32 4294901760, %v11050_v21 }
  0xd0   :  { %8822 = vmatpush3.bf16.msra.mxu0 %v11234_v34  ;;  %v11289_v7 = vpack.c.bf16 %v14388_v13, %v13966_v24  ;;  %v11311_v13 = vld [vmem:[%s13816_s1 + $0x2f8] sm:$0xff]  ;;  %v14390_v24 = vand.u32 4294901760, %v11028_v12  ;;  %14393 = vst [vmem:[#allocation18_spill] sm:$0xff] %v11332_v42 }
  0xd1   :  { %8824 = vmatprep.subr.bf16.mxu0 %v11243_v8  ;;  %8782 = vmatpush3.bf16.msra.mxu1 %v14358_v55  ;;  %v14391_v8 = vand.u32 4294901760, %v11033_v19  ;;  %v11353_v55 = vld [vmem:[%s13816_s1 + $0x270] sm:$0xff] }
  0xd2   :  { %14389 = vst [vmem:[#allocation16_spill] sm:$0xff] %v11289_v7  ;;  %v11316_v34 = vsub.f32 %v11028_v12, %v14390_v24  ;;  %8784 = vmatprep.subr.bf16.mxu1 %v14359_v59  ;;  %v1956_v12 = vand.u32 4294901760, %v11296_v32  ;;  %v11339_v24 = vsub.f32 %v11050_v21, %v14394_v48  ;;  %v14396_v59 = vand.u32 4294901760, %v11267_v25  ;;  %v11358_v21 = vld [vmem:[%s13816_s1 + $0x278] sm:$0xff] }
  0xd3   :  { %v11326_v29 = vsub.f32 %v11033_v19, %v14391_v8  ;;  %v14395_v19 = vand.u32 4294901760, %v11262_v6  ;;  %v14398_v48 = vand.u32 4294901760, %v11055_v37 }
  0xd4   :  { %8826 = vmatpush3.bf16.msra.mxu0 %v11280_v22  ;;  %v14400_v22 = vand.u32 4294901760, %v11066_v41 }
  0xd5   :  { %8828 = vmatprep.subr.bf16.mxu0 %v11289_v7  ;;  %v11346_v8 = vpack.c.bf16 %v14396_v59, %v14395_v19  ;;  %v11363_v7 = vsub.f32 %v11055_v37, %v14398_v48  ;;  %v14399_v19 = vand.u32 4294901760, %v11061_v45  ;;  %v11383_v37 = vsub.f32 %v11092_v56, %v14402_v61  ;;  %8786 = vmatpush3.bf16.msra.mxu1 %v14363_v14 }
  0xd6   :  { %v11373_v46 = vsub.f32 %v11066_v41, %v14400_v22  ;;  %v14404_v41 = vand.u32 4294901760, %v11105_v33  ;;  %8788 = vmatprep.subr.bf16.mxu1 %v14364_v4  ;;  %v14406_v14 = vand.u32 4294901760, %v11301_v63  ;;  %v14408_v61 = vand.u32 4294901760, %v11134_v35 }
  0xd7   :  { %14397 = vst [vmem:[#allocation19_spill] sm:$0xff] %v11346_v8  ;;  %v11368_v59 = vsub.f32 %v11061_v45, %v14399_v19  ;;  %v14403_v45 = vand.u32 4294901760, %v11100_v31  ;;  %v11400_v19 = vsub.f32 %v11129_v51, %v14405_v58  ;;  %v14409_v51 = vand.u32 4294901760, %v11139_v30 }
  0xd8   :  { %v11394_v22 = vsub.f32 %v11105_v33, %v14404_v41  ;;  %8830 = vmatpush3.bf16.msra.mxu0 %v11332_v42  ;;  %v11406_v56 = vpack.c.bf16 %v14406_v14, %v1956_v12  ;;  %v14410_v4 = vand.u32 4294901760, %v11144_v10  ;;  %v14411_v14 = vand.u32 4294901760, %v11306_v40 }
  0xd9   :  { %v11389_v48 = vsub.f32 %v11100_v31, %v14403_v45  ;;  %v11413_v45 = vsub.f32 %v11134_v35, %v14408_v61  ;;  %v11418_v41 = vsub.f32 %v11139_v30, %v14409_v51  ;;  %8832 = vmatprep.subr.bf16.mxu0 %v11346_v8  ;;  %v14412_v33 = vand.u32 4294901760, %v11311_v13  ;;  %8790 = vmatpush3.bf16.msra.mxu1 %v14368_v9 }
  0xda   :  { %14407 = vst [vmem:[#allocation20_spill] sm:$0xff] %v11406_v56  ;;  %v11423_v58 = vsub.f32 %v11144_v10, %v14410_v4  ;;  %v14414_v35 = vand.u32 4294901760, %v11170_v39  ;;  %v14415_v30 = vand.u32 4294901760, %v11175_v2  ;;  %v14416_v10 = vand.u32 4294901760, %v11180_v54  ;;  %8792 = vmatprep.subr.bf16.mxu1 %v14369_v43 }
  0xdb   :  { %v11430_v31 = vpack.c.bf16 %v14412_v33, %v14411_v14  ;;  %v11450_v33 = vsub.f32 %v11185_v38, %v14417_v47  ;;  %v14420_v38 = vand.u32 4294901760, %v11215_v60  ;;  %v14421_v9 = vand.u32 4294901760, %v11220_v50 }
  0xdc   :  { %v11435_v61 = vsub.f32 %v11170_v39, %v14414_v35  ;;  %v11440_v51 = vsub.f32 %v11175_v2, %v14415_v30  ;;  %v11445_v4 = vsub.f32 %v11180_v54, %v14416_v10  ;;  %v14418_v39 = vand.u32 4294901760, %v11210_v11  ;;  %8834 = vmatpush3.bf16.msra.mxu0 %v11406_v56 }
  0xdd   :  { %14413 = vst [vmem:[#allocation21_spill] sm:$0xff] %v11430_v31  ;;  %v13985_v2 = vand.u32 4294901760, %v11316_v34  ;;  %v14419_v30 = vand.u32 4294901760, %v11321_v62  ;;  %v11467_v47 = vsub.f32 %v11215_v60, %v14420_v38  ;;  %v14422_v10 = vand.u32 4294901760, %v11353_v55  ;;  %8836 = vmatprep.subr.bf16.mxu0 %v11430_v31  ;;  %8794 = vmatpush3.bf16.msra.mxu1 %v14370_v23 }
  0xde   :  { %v11456_v14 = vsub.f32 %v11210_v11, %v14418_v39  ;;  %v11472_v11 = vsub.f32 %v11220_v50, %v14421_v9  ;;  %v14423_v39 = vand.u32 4294901760, %v11358_v21  ;;  %v11488_v38 = vsub.f32 %v11250_v3, %v1950_v15  ;;  %8796 = vmatprep.subr.bf16.mxu1 %v14371_v57 }
  0xdf   :  { %v2024_v54 = vsub.f32 %v11321_v62, %v14419_v30  ;;  %v14425_v30 = vand.u32 4294901760, %v11225_v52  ;;  %v8871_v9 = vpack.c.bf16 %v11326_v29, %v11316_v34  ;;  %v14427_v43 = vand.u32 4294901760, %v11262_v6 }
  0xe0   :  { %v11479_v35 = vpack.c.bf16 %v14423_v39, %v14422_v10  ;;  %v14426_v10 = vand.u32 4294901760, %v11255_v1  ;;  %v11520_v15 = vsub.f32 %v11296_v32, %v1956_v12  ;;  %v14430_v23 = vand.u32 4294901760, %v11339_v24 }
  0xe1   :  { %v11485_v60 = vsub.f32 %v11225_v52, %v14425_v30  ;;  %v11502_v52 = vsub.f32 %v11262_v6, %v14427_v43  ;;  %v14428_v30 = vand.u32 4294901760, %v11267_v25  ;;  %v2025_v43 = vand.u32 4294901760, %v2024_v54  ;;  %8798 = vmatpush3.bf16.msra.mxu1 %v14374_v0 }
  0xe2   :  { %14424 = vst [vmem:[#allocation22_spill] sm:$0xff] %v11479_v35  ;;  %v11497_v39 = vsub.f32 %v11255_v1, %v14426_v10  ;;  %v2147_v1 = vsub.f32 %v11316_v34, %v13985_v2  ;;  %v14429_v10 = vand.u32 4294901760, %v11326_v29  ;;  %8838 = vmatpush3.bf16.msra.mxu0 %v11479_v35  ;;  %v14431_v2 = vand.u32 4294901760, %v11363_v7  ;;  %8800 = vmatprep.subr.bf16.mxu1 %v14375_v28 }
  0xe3   :  { %v11510_v50 = vsub.f32 %v11267_v25, %v14428_v30  ;;  %v2035_v25 = vsub.f32 %v11339_v24, %v14430_v23  ;;  %v8873_v30 = vpack.c.bf16 %v11363_v7, %v11339_v24  ;;  %8872 = vmatprep.subr.bf16.mxu0 %v8871_v9  ;;  %v8875_v32 = vpack.c.bf16 %v11373_v46, %v11368_v59 }
  0xe4   :  { %v2154_v6 = vsub.f32 %v11326_v29, %v14429_v10  ;;  %v2042_v3 = vsub.f32 %v11363_v7, %v14431_v2  ;;  %v14432_v12 = vand.u32 4294901760, %v11368_v59  ;;  %v14433_v23 = vand.u32 4294901760, %v11373_v46 }
  0xe5   :  { %v14434_v9 = vand.u32 4294901760, %v11301_v63  ;;  %v2148_v54 = vand.u32 4294901760, %v2147_v1  ;;  %2026 = vmatmul.mubr.f32.vlgmr.msra.gmra.mrb[10].mxu0 %v2025_v43  ;;  %v2036_v2 = vand.u32 4294901760, %v2035_v25  ;;  %v8877_v0 = vpack.c.bf16 %v11383_v37, %v11378_v5  ;;  %8802 = vmatpush3.bf16.msra.mxu1 %v14378_v20 }
  0xe6   :  { %v2161_v10 = vsub.f32 %v11368_v59, %v14432_v12  ;;  %v2168_v35 = vsub.f32 %v11373_v46, %v14433_v23  ;;  %v2155_v56 = vand.u32 4294901760, %v2154_v6  ;;  %v14435_v23 = vand.u32 4294901760, %v11306_v40  ;;  %8874 = vmatpush3.bf16.msra.mxu0 %v8873_v30  ;;  %2393 = vmatprep.mubr.f32.mxu0 %v11023_v27 }
  0xe7   :  { %v11547_v57 = vsub.f32 %v11301_v63, %v14434_v9  ;;  %v2043_v9 = vand.u32 4294901760, %v2042_v3  ;;  %v14436_v1 = vand.u32 4294901760, %v11378_v5  ;;  %v14437_v43 = vand.u32 4294901760, %v11383_v37  ;;  %8876 = vmatprep.subr.bf16.mxu0 %v8875_v32  ;;  %8804 = vmatprep.subr.bf16.mxu1 %v14379_v44 }
  0xe8   :  { %v11554_v31 = vsub.f32 %v11306_v40, %v14435_v23  ;;  %v8879_v40 = vpack.c.bf16 %v11394_v22, %v11389_v48  ;;  %v2162_v25 = vand.u32 4294901760, %v2161_v10  ;;  %v2169_v30 = vand.u32 4294901760, %v2168_v35 }
  0xe9   :  { %v2049_v6 = vsub.f32 %v11378_v5, %v14436_v1  ;;  %v2056_v28 = vsub.f32 %v11383_v37, %v14437_v43  ;;  %v14438_v23 = vand.u32 4294901760, %v11389_v48  ;;  %v14439_v63 = vand.u32 4294901760, %v11394_v22  ;;  %8806 = vmatpush3.bf16.msra.mxu1 %v14382_v18 }
  0xea   :  { %v14440_v43 = vand.u32 4294901760, %v11311_v13  ;;  %v14441_v12 = vand.u32 4294901760, %v11353_v55  ;;  %v8839_v35 = vpack.c.bf16 %v2155_v56, %v2148_v54  ;;  %v14442_v8 = vand.u32 4294901760, %v11400_v19  ;;  %8878 = vmatpush3.bf16.msra.mxu0 %v8877_v0 }
  0xeb   :  { %v2175_v3 = vsub.f32 %v11389_v48, %v14438_v23  ;;  %v2182_v1 = vsub.f32 %v11394_v22, %v14439_v63  ;;  %v14443_v20 = vand.u32 4294901760, %v11413_v45  ;;  %v2050_v56 = vand.u32 4294901760, %v2049_v6  ;;  %8880 = vmatprep.subr.bf16.mxu0 %v8879_v40 }
  0xec   :  { %v11578_v32 = vsub.f32 %v11311_v13, %v14440_v43  ;;  %v11583_v10 = vsub.f32 %v11353_v55, %v14441_v12  ;;  %v2063_v23 = vsub.f32 %v11400_v19, %v14442_v8  ;;  %v8881_v13 = vpack.c.bf16 %v11413_v45, %v11400_v19  ;;  %8840 = vmatprep.subr.bf16.mxu1 %v8839_v35 }
  0xed   :  { %v2070_v63 = vsub.f32 %v11413_v45, %v14443_v20  ;;  %v14007_v55 = vand.u32 4294901760, %v11423_v58  ;;  %v8841_v12 = vpack.c.bf16 %v2043_v9, %v2036_v2  ;;  %v2057_v54 = vand.u32 4294901760, %v2056_v28  ;;  %1914 = vmatmul.mubr.f32.vlgmr.msra.gmra.mrb[12].mxu1 %v10517_v17 }
  0xee   :  { %v8883_v8 = vpack.c.bf16 %v11423_v58, %v11418_v41  ;;  %v8843_v44 = vpack.c.bf16 %v2169_v30, %v2162_v25  ;;  %v2176_v0 = vand.u32 4294901760, %v2175_v3  ;;  %v2183_v42 = vand.u32 4294901760, %v2182_v1  ;;  %8882 = vmatpush3.bf16.msra.mxu0 %v8881_v13  ;;  %2256 = vmatprep.mubr.f32.mxu1 %v11010_v36 }
  0xef   :  { %v14004_v27 = vand.u32 4294901760, %v11435_v61  ;;  %v2064_v20 = vand.u32 4294901760, %v2063_v23  ;;  %v14003_v53 = vand.u32 4294901760, %v11440_v51  ;;  %v13999_v43 = vand.u32 4294901760, %v11445_v4  ;;  %8842 = vmatpush3.bf16.msra.mxu1 %v8841_v12 }
  0xf0   :  { %v14000_v2 = vand.u32 4294901760, %v11450_v33  ;;  %v2071_v9 = vand.u32 4294901760, %v2070_v63  ;;  %v14444_v6 = vand.u32 4294901760, %v11418_v41  ;;  %v2196_v40 = vsub.f32 %v11423_v58, %v14007_v55  ;;  %8884 = vmatprep.subr.bf16.mxu0 %v8883_v8  ;;  %8844 = vmatprep.subr.bf16.mxu1 %v8843_v44 }
  0xf1   :  { %v8885_v18 = vpack.c.bf16 %v11440_v51, %v11435_v61  ;;  %v8845_v25 = vpack.c.bf16 %v2057_v54, %v2050_v56  ;;  %v14002_v30 = vand.u32 4294901760, %v11456_v14  ;;  %v14001_v3 = vand.u32 4294901760, %v11467_v47 }
  0xf2   :  { %v2189_v28 = vsub.f32 %v11418_v41, %v14444_v6  ;;  %v8887_v1 = vpack.c.bf16 %v11450_v33, %v11445_v4  ;;  %v8847_v35 = vpack.c.bf16 %v2183_v42, %v2176_v0  ;;  %v2077_v23 = vsub.f32 %v11435_v61, %v14004_v27 }
  0xf3   :  { %v14005_v63 = vand.u32 4294901760, %v11472_v11  ;;  %v14006_v13 = vand.u32 4294901760, %v11485_v60  ;;  %v2084_v56 = vsub.f32 %v11440_v51, %v14003_v53  ;;  %v2203_v54 = vsub.f32 %v11445_v4, %v13999_v43  ;;  %8886 = vmatpush3.bf16.msra.mxu0 %v8885_v18  ;;  %8846 = vmatpush3.bf16.msra.mxu1 %v8845_v25 }
  0xf4   :  { %v2210_v17 = vsub.f32 %v11450_v33, %v14000_v2  ;;  %v8849_v42 = vpack.c.bf16 %v2071_v9, %v2064_v20  ;;  %v2190_v8 = vand.u32 4294901760, %v2189_v28  ;;  %v2197_v0 = vand.u32 4294901760, %v2196_v40  ;;  %8888 = vmatprep.subr.bf16.mxu0 %v8887_v1  ;;  %8848 = vmatprep.subr.bf16.mxu1 %v8847_v35 }
  0xf5   :  { %v8889_v12 = vpack.c.bf16 %v11467_v47, %v11456_v14  ;;  %v2091_v6 = vsub.f32 %v11456_v14, %v14002_v30  ;;  %v2098_v43 = vsub.f32 %v11467_v47, %v14001_v3  ;;  %v2104_v2 = vand.u32 4294901760, %v11488_v38 }
  0xf6   :  { %v8891_v44 = vpack.c.bf16 %v11485_v60, %v11472_v11  ;;  %v2078_v20 = vand.u32 4294901760, %v2077_v23  ;;  %v2217_v9 = vsub.f32 %v11472_v11, %v14005_v63  ;;  %v2224_v28 = vsub.f32 %v11485_v60, %v14006_v13 }
  0xf7   :  { %v2111_v40 = vand.u32 4294901760, %v11497_v39  ;;  %v2085_v18 = vand.u32 4294901760, %v2084_v56  ;;  %v2204_v3 = vand.u32 4294901760, %v2203_v54  ;;  %v2211_v1 = vand.u32 4294901760, %v2210_v17  ;;  %8890 = vmatpush3.bf16.msra.mxu0 %v8889_v12  ;;  %8850 = vmatpush3.bf16.msra.mxu1 %v8849_v42 }
  0xf8   :  { %v14009_v30 = vand.u32 4294901760, %v11502_v52  ;;  %v14445_v53 = vand.u32 4294901760, %v11358_v21  ;;  %v8851_v27 = vpack.c.bf16 %v2197_v0, %v2190_v8  ;;  %v8893_v63 = vpack.c.bf16 %v11497_v39, %v11488_v38  ;;  %8892 = vmatprep.subr.bf16.mxu0 %v8891_v44 }
  0xf9   :  { %v14008_v13 = vand.u32 4294901760, %v11510_v50  ;;  %v2092_v55 = vand.u32 4294901760, %v2091_v6  ;;  %v2099_v25 = vand.u32 4294901760, %v2098_v43  ;;  %v2105_v56 = vsub.f32 %v11488_v38, %v2104_v2  ;;  %v11786_v38 = vld [vmem:[%s13816_s1 + $0x388] sm:$0xff] }
  0xfa   :  { %v11653_v23 = vsub.f32 %v11358_v21, %v14445_v53  ;;  %v8895_v54 = vpack.c.bf16 %v11510_v50, %v11502_v52  ;;  %v2218_v53 = vand.u32 4294901760, %v2217_v9  ;;  %v2225_v21 = vand.u32 4294901760, %v2224_v28  ;;  %8852 = vmatprep.subr.bf16.mxu1 %v8851_v27 }
  0xfb   :  { %v2112_v35 = vsub.f32 %v11497_v39, %v2111_v40  ;;  %v2118_v17 = vand.u32 4294901760, %v11520_v15  ;;  %v8853_v8 = vpack.c.bf16 %v2085_v18, %v2078_v20  ;;  %v8855_v0 = vpack.c.bf16 %v2211_v1, %v2204_v3  ;;  %8894 = vmatpush3.bf16.msra.mxu0 %v8893_v63  ;;  %v14477_v39 = vld [vmem:[#allocation9_spill] sm:$0xff] }
  0xfc   :  { %v2231_v43 = vsub.f32 %v11502_v52, %v14009_v30  ;;  %v14012_v12 = vand.u32 4294901760, %v11547_v57  ;;  %v2238_v6 = vsub.f32 %v11510_v50, %v14008_v13  ;;  %v8897_v44 = vpack.c.bf16 %v11547_v57, %v11520_v15  ;;  %8896 = vmatprep.subr.bf16.mxu0 %v8895_v54 }
  0xfd   :  { %v14011_v9 = vand.u32 4294901760, %v11554_v31  ;;  %v14010_v42 = vand.u32 4294901760, %v11578_v32  ;;  %v8857_v3 = vpack.c.bf16 %v2099_v25, %v2092_v55  ;;  %v8899_v20 = vpack.c.bf16 %v11578_v32, %v11554_v31  ;;  %8854 = vmatpush3.bf16.msra.mxu1 %v8853_v8 }
  0xfe   :  { %v8859_v28 = vpack.c.bf16 %v2225_v21, %v2218_v53  ;;  %v2106_v18 = vand.u32 4294901760, %v2105_v56  ;;  %v2113_v27 = vand.u32 4294901760, %v2112_v35  ;;  %v2119_v63 = vsub.f32 %v11520_v15, %v2118_v17  ;;  %8856 = vmatprep.subr.bf16.mxu1 %v8855_v0  ;;  %v11808_v15 = vld [vmem:[%s13816_s1 + $0x308] sm:$0xff] }
  0xff   :  { %v2232_v1 = vand.u32 4294901760, %v2231_v43  ;;  %v2126_v13 = vsub.f32 %v11547_v57, %v14012_v12  ;;  %v2132_v30 = vand.u32 4294901760, %v11583_v10  ;;  %v2139_v55 = vand.u32 4294901760, %v11653_v23  ;;  %8898 = vmatpush3.bf16.msra.mxu0 %v8897_v44 }
 0x100   :  { %v2239_v25 = vand.u32 4294901760, %v2238_v6  ;;  %v2245_v56 = vsub.f32 %v11554_v31, %v14011_v9  ;;  %v2252_v54 = vsub.f32 %v11578_v32, %v14010_v42  ;;  %v8901_v53 = vpack.c.bf16 %v11653_v23, %v11583_v10  ;;  %8900 = vmatprep.subr.bf16.mxu0 %v8899_v20 }
 0x101   :  { %v14446_v21 = vand.u32 4294901760, %v11316_v34  ;;  %v14447_v35 = vand.u32 4294901760, %v11326_v29  ;;  %v8861_v0 = vpack.c.bf16 %v2113_v27, %v2106_v18  ;;  %8858 = vmatpush3.bf16.msra.mxu1 %v8857_v3  ;;  %v2120_v43 = vand.u32 4294901760, %v2119_v63  ;;  %v7405_v18 = vpop.f32.mrb[0].mxu1 }
 0x102   :  { %v2127_v6 = vand.u32 4294901760, %v2126_v13  ;;  %v2133_v44 = vsub.f32 %v11583_v10, %v2132_v30  ;;  %v2140_v42 = vsub.f32 %v11653_v23, %v2139_v55  ;;  %8860 = vmatprep.subr.bf16.mxu1 %v8859_v28  ;;  %v8863_v9 = vpack.c.bf16 %v2239_v25, %v2232_v1  ;;  %v11840_v10 = vld [vmem:[%s13816_s1 + $0x310] sm:$0xff] }
 0x103   :  { %v8935_v8 = vpack.c.bf16 %v14447_v35, %v14446_v21  ;;  %v2246_v20 = vand.u32 4294901760, %v2245_v56  ;;  %v2253_v12 = vand.u32 4294901760, %v2252_v54  ;;  %8902 = vmatpush3.bf16.msra.mxu0 %v8901_v53  ;;  %v14448_v29 = vand.u32 4294901760, %v11339_v24  ;;  %v7406_v21 = vpop.f32.mrb[1].mxu1 }
 0x104   :  { %v14449_v34 = vand.u32 4294901760, %v11363_v7  ;;  %v14450_v13 = vand.u32 4294901760, %v11368_v59  ;;  %v14451_v27 = vand.u32 4294901760, %v11373_v46  ;;  %v11714_v35 = vadd.f32 %v7406_v21, %v7405_v18  ;;  %v14474_v21 = vld [vmem:[#allocation17_spill] sm:$0xff] }
 0x105   :  { %8936 = vmatprep.subr.bf16.mxu0 %v8935_v8  ;;  %8862 = vmatpush3.bf16.msra.mxu1 %v8861_v0  ;;  %v8865_v28 = vpack.c.bf16 %v2127_v6, %v2120_v43  ;;  %v2134_v1 = vand.u32 4294901760, %v2133_v44  ;;  %v2141_v25 = vand.u32 4294901760, %v2140_v42  ;;  %v8867_v24 = vpack.c.bf16 %v2253_v12, %v2246_v20  ;;  %v14464_v44 = vld [vmem:[#allocation13_spill] sm:$0xff] }
 0x106   :  { %v8937_v3 = vpack.c.bf16 %v14449_v34, %v14448_v29  ;;  %v8939_v63 = vpack.c.bf16 %v14451_v27, %v14450_v13  ;;  %2396 = vmatmul.mubr.f32.vlgmr.msra.gmra.mrb[12].mxu0 %v11321_v62  ;;  %8864 = vmatprep.subr.bf16.mxu1 %v8863_v9  ;;  %v14452_v7 = vand.u32 4294901760, %v11378_v5  ;;  %v14453_v56 = vand.u32 4294901760, %v11383_v37  ;;  %v14465_v20 = vld [vmem:[#allocation5_spill] sm:$0xff]  ;;  %v14466_v29 = vld [vmem:[#allocation6_spill] sm:$0xff] }
 0x107   :  { %v14454_v46 = vand.u32 4294901760, %v11389_v48  ;;  %v14455_v54 = vand.u32 4294901760, %v11394_v22  ;;  %2670 = vmatprep.mubr.f32.mxu0 %v11010_v36  ;;  %v170_v42 = vcombine.high %v10972_v26, %v10972_v26  ;;  %v8869_v9 = vpack.c.bf16 %v2141_v25, %v2134_v1  ;;  %v11781_v25 = vld [vmem:[%s13816_s1 + $0x380] sm:$0xff] }
 0x108   :  { %8938 = vmatpush3.bf16.msra.mxu0 %v8937_v3  ;;  %v8941_v59 = vpack.c.bf16 %v14453_v56, %v14452_v7  ;;  %v14456_v5 = vand.u32 4294901760, %v11400_v19  ;;  %v14457_v37 = vand.u32 4294901760, %v11413_v45  ;;  %v14458_v48 = vand.u32 4294901760, %v11418_v41 }
 0x109   :  { %8940 = vmatprep.subr.bf16.mxu0 %v8939_v63  ;;  %v8943_v53 = vpack.c.bf16 %v14455_v54, %v14454_v46  ;;  %8866 = vmatpush3.bf16.msra.mxu1 %v8865_v28  ;;  %v14459_v22 = vand.u32 4294901760, %v11423_v58  ;;  %v11737_v0 = vrot.slane %v170_v42, %v14244_v49  ;;  %v14460_v26 = vand.u32 4294901760, %v11435_v61  ;;  %v14468_v61 = vld [vmem:[#allocation7_spill] sm:$0xff]  ;;  %v14473_v63 = vld [vmem:[#allocation8_spill] sm:$0xff] }
 0x10a   :  { %8868 = vmatprep.subr.bf16.mxu1 %v8867_v24  ;;  %v8945_v12 = vpack.c.bf16 %v14457_v37, %v14456_v5  ;;  %v14461_v19 = vand.u32 4294901760, %v11440_v51  ;;  %v14462_v45 = vand.u32 4294901760, %v11445_v4  ;;  %v14463_v41 = vand.u32 4294901760, %v11450_v33  ;;  %v14483_v42 = vld [vmem:[#allocation12_spill] sm:$0xff] }
 0x10b   :  { %v8947_v8 = vpack.c.bf16 %v14459_v22, %v14458_v48  ;;  %v186_v58 = vcombine.high %v11737_v0, %v11737_v0  ;;  %v14467_v34 = vand.u32 4294901760, %v14466_v29  ;;  %v14469_v51 = vand.u32 4294901760, %v11456_v14 }
 0x10c   :  { %8942 = vmatpush3.bf16.msra.mxu0 %v8941_v59  ;;  %v8949_v43 = vpack.c.bf16 %v14461_v19, %v14460_v26  ;;  %v8951_v6 = vpack.c.bf16 %v14463_v41, %v14462_v45  ;;  %v14470_v4 = vand.u32 4294901760, %v11467_v47  ;;  %v14471_v33 = vand.u32 4294901760, %v11472_v11  ;;  %v14485_v26 = vld [vmem:[#allocation14_spill] sm:$0xff]  ;;  %v14486_v19 = vld [vmem:[#allocation16_spill] sm:$0xff] }
 0x10d   :  { %8944 = vmatprep.subr.bf16.mxu0 %v8943_v53  ;;  %8870 = vmatpush3.bf16.msra.mxu1 %v8869_v9  ;;  %v14472_v18 = vand.u32 4294901760, %v11485_v60  ;;  %v11763_v27 = vand.u32 4294901760, %v186_v58  ;;  %v8957_v14 = vpack.c.bf16 %v2111_v40, %v2104_v2  ;;  %v14475_v47 = vand.u32 4294901760, %v11502_v52  ;;  %v14478_v2 = vld [vmem:[#allocation10_spill] sm:$0xff]  ;;  %v11803_v53 = vld [vmem:[%s13816_s1 + $0x300] sm:$0xff] }
 0x10e   :  { %8904 = vmatprep.subr.bf16.mxu1 %v11080_v16  ;;  %v8953_v3 = vpack.c.bf16 %v14470_v4, %v14469_v51  ;;  %v14476_v11 = vand.u32 4294901760, %v11510_v50  ;;  %v14479_v40 = vand.u32 4294901760, %v11547_v57  ;;  %v14480_v7 = vand.u32 4294901760, %v11554_v31  ;;  %v11814_v31 = vld [vmem:[%s13816_s1 + $0x390] sm:$0xff]  ;;  %v11882_v51 = vld [vmem:[%s13816_s1 + $0x320] sm:$0xff]  ;;  %v11887_v4 = vld [vmem:[%s13816_s1 + $0x328] sm:$0xff] }
 0x10f   :  { %v8955_v13 = vpack.c.bf16 %v14472_v18, %v14471_v33  ;;  %v11776_v60 = vsub.f32 %v186_v58, %v11763_v27  ;;  %v14481_v56 = vand.u32 4294901760, %v11578_v32  ;;  %v14031_v46 = vand.u32 4294901760, %v11781_v25  ;;  %v11819_v32 = vld [vmem:[%s13816_s1 + $0x398] sm:$0xff]  ;;  %v11892_v18 = vld [vmem:[%s13816_s1 + $0x3b0] sm:$0xff] }
 0x110   :  { %8946 = vmatpush3.bf16.msra.mxu0 %v8945_v12  ;;  %2258 = vmatmul.mubr.f32.vlgmr.msra.gmra.mrb[14].mxu1 %v14464_v44  ;;  %v8959_v28 = vpack.c.bf16 %v14476_v11, %v14475_v47  ;;  %v8961_v24 = vpack.c.bf16 %v14479_v40, %v2118_v17  ;;  %v14028_v54 = vand.u32 4294901760, %v11786_v38  ;;  %v14482_v17 = vld [vmem:[#allocation11_spill] sm:$0xff]  ;;  %v8965_v9 = vpack.c.bf16 %v2139_v55, %v2132_v30  ;;  %v11845_v30 = vld [vmem:[%s13816_s1 + $0x318] sm:$0xff] }
 0x111   :  { %8948 = vmatprep.subr.bf16.mxu0 %v8947_v8  ;;  %8906 = vmatpush3.bf16.msra.mxu1 %v14465_v20  ;;  %v8963_v59 = vpack.c.bf16 %v14481_v56, %v14480_v7  ;;  %v14013_v57 = vand.u32 4294901760, %v11776_v60  ;;  %v14025_v5 = vand.u32 4294901760, %v11803_v53  ;;  %v14024_v37 = vand.u32 4294901760, %v11808_v15  ;;  %v11853_v55 = vld [vmem:[%s13816_s1 + $0x3a0] sm:$0xff]  ;;  %v11858_v8 = vld [vmem:[%s13816_s1 + $0x3a8] sm:$0xff]  ;;  %v14489_v47 = vld [vmem:[#allocation18_spill] sm:$0xff] }
 0x112   :  { %2500 = vmatprep.mubr.f32.mxu1 %v14467_v34  ;;  %8908 = vmatprep.subr.bf16.mxu1 %v14468_v61  ;;  %v7475_v1 = vpop.f32.mrb[0].mxu0  ;;  %v11833_v12 = vpack.c.bf16 %v14028_v54, %v14031_v46  ;;  %v14023_v48 = vand.u32 4294901760, %v11814_v31  ;;  %v14022_v22 = vand.u32 4294901760, %v11819_v32  ;;  %v14021_v45 = vand.u32 4294901760, %v11840_v10  ;;  %v14490_v11 = vld [vmem:[#allocation19_spill] sm:$0xff] }
 0x113   :  { %v7476_v52 = vpop.f32.mrb[1].mxu0  ;;  %v2880_v23 = vsub.f32 %v11776_v60, %v14013_v57  ;;  %v14018_v41 = vand.u32 4294901760, %v11845_v30  ;;  %v14015_v29 = vand.u32 4294901760, %v11853_v55  ;;  %v14014_v34 = vand.u32 4294901760, %v11858_v8 }
 0x114   :  { %8950 = vmatpush3.bf16.msra.mxu0 %v8949_v43  ;;  %v7477_v50 = vadd.f32 %v7476_v52, %v7475_v1  ;;  %14484 = vst [vmem:[#allocation13_spill] sm:$0xff] %v11833_v12  ;;  %v11866_v43 = vpack.c.bf16 %v14024_v37, %v14025_v5  ;;  %v11875_v58 = vpack.c.bf16 %v14022_v22, %v14023_v48  ;;  %v14017_v1 = vand.u32 4294901760, %v11882_v51 }
 0x115   :  { %8952 = vmatprep.subr.bf16.mxu0 %v8951_v6  ;;  %8910 = vmatpush3.bf16.msra.mxu1 %v14473_v63  ;;  %v14016_v52 = vand.u32 4294901760, %v11887_v4  ;;  %v14020_v7 = vand.u32 4294901760, %v11892_v18  ;;  %v14500_v54 = vand.u32 4294901760, %v11321_v62  ;;  %v12028_v46 = vand.u32 4294901760, %v11737_v0 }
 0x116   :  { %8912 = vmatprep.subr.bf16.mxu1 %v14474_v21  ;;  %14487 = vst [vmem:[#allocation5_spill] sm:$0xff] %v11866_v43  ;;  %14488 = vst [vmem:[#allocation6_spill] sm:$0xff] %v11875_v58  ;;  %v14505_v5 = vand.u32 4294901760, %v11781_v25  ;;  %v14507_v49 = vand.u32 4294901760, %v11803_v53 }
 0x117   :  { %14501 = vst [vmem:[#allocation12_spill] sm:$0xff] %v12028_v46 }
 0x118   :  { %8954 = vmatpush3.bf16.msra.mxu0 %v8953_v3  ;;  %v2881_v3 = vand.u32 4294901760, %v2880_v23  ;;  %v11939_v23 = vld [vmem:[%s13816_s1 + $0x3c8] sm:$0xff] }
 0x119   :  { %8956 = vmatprep.subr.bf16.mxu0 %v8955_v13  ;;  %8914 = vmatpush3.bf16.msra.mxu1 %v14477_v39  ;;  %v11897_v13 = vld [vmem:[%s13816_s1 + $0x3b8] sm:$0xff] }
 0x11a   :  { %8916 = vmatprep.subr.bf16.mxu1 %v14478_v2  ;;  %v14019_v56 = vand.u32 4294901760, %v11897_v13 }
 0x11c   :  { %8958 = vmatpush3.bf16.msra.mxu0 %v8957_v14  ;;  %v7440_v6 = vpop.f32.mrb[2].mxu1 }
 0x11d   :  { %8960 = vmatprep.subr.bf16.mxu0 %v8959_v28  ;;  %8918 = vmatpush3.bf16.msra.mxu1 %v14482_v17  ;;  %v7441_v33 = vpop.f32.mrb[3].mxu1  ;;  %v11907_v28 = vpack.c.bf16 %v14018_v41, %v14021_v45  ;;  %v11976_v41 = vld [vmem:[%s13816_s1 + $0x3d0] sm:$0xff] }
 0x11e   :  { %8920 = vmatprep.subr.bf16.mxu1 %v14483_v42  ;;  %v7442_v14 = vadd.f32 %v7441_v33, %v7440_v6  ;;  %v14493_v33 = vld [vmem:[#allocation20_spill] sm:$0xff] }
 0x11f   :  { %14491 = vst [vmem:[#allocation7_spill] sm:$0xff] %v11907_v28 }
 0x120   :  { %8962 = vmatpush3.bf16.msra.mxu0 %v8961_v24  ;;  %v536_v40 = vadd.f32 %v7442_v14, %v11714_v35  ;;  %v11917_v24 = vpack.c.bf16 %v14014_v34, %v14015_v29  ;;  %v11929_v35 = vld [vmem:[%s13816_s1 + $0x338] sm:$0xff]  ;;  %v14494_v14 = vld [vmem:[#allocation21_spill] sm:$0xff]  ;;  %v14029_v29 = vand.u32 4294901760, %v11939_v23 }
 0x121   :  { %8964 = vmatprep.subr.bf16.mxu0 %v8963_v59  ;;  %8922 = vmatpush3.bf16.msra.mxu1 %v14485_v26  ;;  %v11924_v59 = vld [vmem:[%s13816_s1 + $0x330] sm:$0xff]  ;;  %v14026_v34 = vand.u32 4294901760, %v11929_v35 }
 0x122   :  { %8924 = vmatprep.subr.bf16.mxu1 %v14486_v19  ;;  %14492 = vst [vmem:[#allocation8_spill] sm:$0xff] %v11917_v24  ;;  %v11941_v6 = vadd.f32 %v7477_v50, %v536_v40  ;;  %v14027_v57 = vand.u32 4294901760, %v11924_v59  ;;  %v11959_v50 = vpack.c.bf16 %v14019_v56, %v14020_v7  ;;  %v11981_v56 = vld [vmem:[%s13816_s1 + $0x3d8] sm:$0xff] }
 0x123   :  { %v14497_v7 = vld [vmem:[#allocation22_spill] sm:$0xff] }
 0x124   :  { %8966 = vmatpush3.bf16.msra.mxu0 %v8965_v9  ;;  %v11934_v9 = vld [vmem:[%s13816_s1 + $0x3c0] sm:$0xff]  ;;  %14496 = vst [vmem:[#allocation9_spill] sm:$0xff] %v11959_v50  ;;  %v11990_v45 = vpack.c.bf16 %v14026_v34, %v14027_v57  ;;  %v12006_v34 = vld [vmem:[%s13816_s1 + $0x350] sm:$0xff]  ;;  %v12011_v57 = vld [vmem:[%s13816_s1 + $0x358] sm:$0xff] }
 0x125   :  { %9000 = vmatprep.subr.bf16.mxu0 %v11833_v12  ;;  %8926 = vmatpush3.bf16.msra.mxu1 %v14489_v47  ;;  %v14030_v40 = vand.u32 4294901760, %v11934_v9 }
 0x126   :  { %8928 = vmatprep.subr.bf16.mxu1 %v14490_v11  ;;  %14498 = vst [vmem:[#allocation10_spill] sm:$0xff] %v11990_v45 }
 0x127   :  { %2672 = vmatmul.mubr.f32.vlgmr.msra.gmra.mrb[14].mxu0 %v14464_v44  ;;  %v11999_v37 = vpack.c.bf16 %v14029_v29, %v14030_v40  ;;  %v12018_v29 = vld [vmem:[%s13816_s1 + $0x3e0] sm:$0xff]  ;;  %v12023_v40 = vld [vmem:[%s13816_s1 + $0x3e8] sm:$0xff] }
 0x128   :  { %9002 = vmatpush3.bf16.msra.mxu0 %v11866_v43  ;;  %2882 = vmatprep.mubr.f32.mxu0 %v2881_v3  ;;  %v11950_v3 = vpack.c.bf16 %v14016_v52, %v14017_v1  ;;  %v11966_v52 = vld [vmem:[%s13816_s1 + $0x340] sm:$0xff]  ;;  %v11971_v1 = vld [vmem:[%s13816_s1 + $0x348] sm:$0xff] }
 0x129   :  { %9004 = vmatprep.subr.bf16.mxu0 %v11875_v58  ;;  %8930 = vmatpush3.bf16.msra.mxu1 %v14493_v33  ;;  %v14034_v22 = vand.u32 4294901760, %v11966_v52  ;;  %v14033_v48 = vand.u32 4294901760, %v11971_v1  ;;  %14499 = vst [vmem:[#allocation11_spill] sm:$0xff] %v11999_v37  ;;  %v14523_v58 = vand.u32 4294901760, %v11887_v4 }
 0x12a   :  { %8932 = vmatprep.subr.bf16.mxu1 %v14494_v14  ;;  %14495 = vst [vmem:[#allocation17_spill] sm:$0xff] %v11950_v3 }
 0x12b   :  { %v12036_v62 = vpack.c.bf16 %v14033_v48, %v14034_v22  ;;  %v12052_v48 = vld [vmem:[%s13816_s1 + $0x360] sm:$0xff]  ;;  %v12057_v22 = vld [vmem:[%s13816_s1 + $0x368] sm:$0xff]  ;;  %v12161_v43 = vsub.f32 %v11887_v4, %v14523_v58 }
 0x12c   :  { %9006 = vmatpush3.bf16.msra.mxu0 %v11907_v28 }
 0x12d   :  { %9008 = vmatprep.subr.bf16.mxu0 %v11917_v24  ;;  %8934 = vmatpush3.bf16.msra.mxu1 %v14497_v7  ;;  %14502 = vst [vmem:[#allocation14_spill] sm:$0xff] %v12036_v62  ;;  %v14522_v24 = vand.u32 4294901760, %v11882_v51 }
 0x12e   :  { %8968 = vmatprep.subr.bf16.mxu1 %v11080_v16  ;;  %v14035_v16 = vand.u32 4294901760, %v11976_v41 }
 0x12f   :  { %v12156_v28 = vsub.f32 %v11882_v51, %v14522_v24  ;;  %v14526_v51 = vand.u32 4294901760, %v11924_v59 }
 0x130   :  { %9010 = vmatpush3.bf16.msra.mxu0 %v11950_v3  ;;  %2504 = vmatmul.mubr.f32.vlgmr.msra.gmra.mrb[16].mxu1 %v14500_v54  ;;  %v12062_v54 = vsub.f32 %v11781_v25, %v14505_v5  ;;  %v12082_v25 = vld [vmem:[%s13816_s1 + $0x3f8] sm:$0xff]  ;;  %v14508_v5 = vand.u32 4294901760, %v11808_v15  ;;  %v14512_v3 = vand.u32 4294901760, %v11840_v10 }
 0x131   :  { %9012 = vmatprep.subr.bf16.mxu0 %v11959_v50  ;;  %8970 = vmatpush3.bf16.msra.mxu1 %v14465_v20  ;;  %v12102_v50 = vsub.f32 %v11737_v0, %v12028_v46  ;;  %v2821_v0 = vand.u32 4294901760, %v12057_v22  ;;  %v12177_v24 = vsub.f32 %v11924_v59, %v14526_v51  ;;  %v14529_v51 = vand.u32 4294901760, %v11934_v9 }
 0x132   :  { %2774 = vmatprep.mubr.f32.mxu1 %v11010_v36  ;;  %8972 = vmatprep.subr.bf16.mxu1 %v14468_v61  ;;  %v14503_v36 = vand.u32 4294901760, %v11981_v56  ;;  %v12072_v61 = vsub.f32 %v11803_v53, %v14507_v49  ;;  %v14509_v49 = vand.u32 4294901760, %v11814_v31  ;;  %v7545_v46 = vpop.f32.mrb[2].mxu0 }
 0x133   :  { %14511 = vst [vmem:[#allocation18_spill] sm:$0xff] %v12102_v50  ;;  %v7546_v58 = vpop.f32.mrb[3].mxu0  ;;  %v12196_v4 = vsub.f32 %v11934_v9, %v14529_v51  ;;  %v14534_v9 = vand.u32 4294901760, %v11976_v41 }
 0x134   :  { %9014 = vmatpush3.bf16.msra.mxu0 %v11990_v45  ;;  %v12045_v20 = vpack.c.bf16 %v14503_v36, %v14035_v16  ;;  %v14506_v36 = vand.u32 4294901760, %v11786_v38  ;;  %v12093_v53 = vsub.f32 %v11814_v31, %v14509_v49  ;;  %v14514_v31 = vand.u32 4294901760, %v12011_v57 }
 0x135   :  { %9016 = vmatprep.subr.bf16.mxu0 %v11999_v37  ;;  %v12077_v37 = vld [vmem:[%s13816_s1 + $0x3f0] sm:$0xff]  ;;  %8974 = vmatpush3.bf16.msra.mxu1 %v14473_v63  ;;  %v14513_v63 = vand.u32 4294901760, %v12006_v34  ;;  %v14516_v49 = vand.u32 4294901760, %v11845_v30  ;;  %v12219_v51 = vsub.f32 %v11976_v41, %v14534_v9  ;;  %v14537_v41 = vand.u32 4294901760, %v12006_v34 }
 0x136   :  { %14504 = vst [vmem:[#allocation16_spill] sm:$0xff] %v12045_v20  ;;  %v12067_v16 = vsub.f32 %v11786_v38, %v14506_v36  ;;  %v12087_v38 = vsub.f32 %v11808_v15, %v14508_v5  ;;  %v14510_v36 = vand.u32 4294901760, %v11819_v32  ;;  %v12107_v15 = vsub.f32 %v11840_v10, %v14512_v3  ;;  %8976 = vmatprep.subr.bf16.mxu1 %v14474_v21 }
 0x137   :  { %v12115_v5 = vpack.c.bf16 %v14514_v31, %v14513_v63  ;;  %v14517_v21 = vand.u32 4294901760, %v12018_v29  ;;  %v14518_v10 = vand.u32 4294901760, %v12023_v40  ;;  %v2872_v63 = vand.u32 4294901760, %v12077_v37 }
 0x138   :  { %v12098_v45 = vsub.f32 %v11819_v32, %v14510_v36  ;;  %9018 = vmatpush3.bf16.msra.mxu0 %v12036_v62  ;;  %v2818_v32 = vand.u32 4294901760, %v12052_v48  ;;  %v12122_v36 = vsub.f32 %v11845_v30, %v14516_v49  ;;  %v2875_v31 = vand.u32 4294901760, %v12082_v25  ;;  %v12136_v62 = vld [vmem:[%s13816_s1 + $0x370] sm:$0xff]  ;;  %v12141_v30 = vld [vmem:[%s13816_s1 + $0x378] sm:$0xff] }
 0x139   :  { %14515 = vst [vmem:[#allocation19_spill] sm:$0xff] %v12115_v5  ;;  %9020 = vmatprep.subr.bf16.mxu0 %v12045_v20  ;;  %v12129_v3 = vpack.c.bf16 %v14518_v10, %v14517_v21  ;;  %v14520_v49 = vand.u32 4294901760, %v11853_v55  ;;  %v14521_v21 = vand.u32 4294901760, %v11858_v8  ;;  %8978 = vmatpush3.bf16.msra.mxu1 %v14477_v39  ;;  %v12181_v39 = vadd.f32 %v7546_v58, %v7545_v46 }
 0x13a   :  { %8980 = vmatprep.subr.bf16.mxu1 %v14478_v2  ;;  %v14530_v2 = vand.u32 4294901760, %v11939_v23  ;;  %v12204_v58 = vpack.c.bf16 %v2875_v31, %v2872_v63  ;;  %v12237_v9 = vsub.f32 %v12006_v34, %v14537_v41  ;;  %v9063_v34 = vpack.c.bf16 %v12067_v16, %v12062_v54 }
 0x13b   :  { %14519 = vst [vmem:[#allocation20_spill] sm:$0xff] %v12129_v3  ;;  %v12146_v20 = vsub.f32 %v11853_v55, %v14520_v49  ;;  %v12151_v10 = vsub.f32 %v11858_v8, %v14521_v21  ;;  %v14524_v55 = vand.u32 4294901760, %v11892_v18  ;;  %v14525_v8 = vand.u32 4294901760, %v11897_v13 }
 0x13c   :  { %9022 = vmatpush3.bf16.msra.mxu0 %v12115_v5  ;;  %v12201_v46 = vsub.f32 %v11939_v23, %v14530_v2  ;;  %14531 = vst [vmem:[#allocation22_spill] sm:$0xff] %v12204_v58  ;;  %v14532_v5 = vand.u32 4294901760, %v11966_v52  ;;  %v14535_v23 = vand.u32 4294901760, %v11981_v56  ;;  %v14542_v41 = vand.u32 4294901760, %v12067_v16 }
 0x13d   :  { %v12167_v49 = vsub.f32 %v11892_v18, %v14524_v55  ;;  %v12172_v21 = vsub.f32 %v11897_v13, %v14525_v8  ;;  %v12184_v18 = vpack.c.bf16 %v2821_v0, %v2818_v32  ;;  %v2824_v55 = vand.u32 4294901760, %v12136_v62  ;;  %9024 = vmatprep.subr.bf16.mxu0 %v12129_v3  ;;  %8982 = vmatpush3.bf16.msra.mxu1 %v14482_v17 }
 0x13e   :  { %v2827_v13 = vand.u32 4294901760, %v12141_v30  ;;  %v14528_v8 = vand.u32 4294901760, %v11929_v35  ;;  %v12209_v12 = vsub.f32 %v11966_v52, %v14532_v5  ;;  %v12224_v2 = vsub.f32 %v11981_v56, %v14535_v23  ;;  %8984 = vmatprep.subr.bf16.mxu1 %v14483_v42 }
 0x13f   :  { %14527 = vst [vmem:[#allocation21_spill] sm:$0xff] %v12184_v18  ;;  %v14064_v52 = vand.u32 4294901760, %v12062_v54  ;;  %v14539_v3 = vand.u32 4294901760, %v12011_v57  ;;  %v14540_v42 = vand.u32 4294901760, %v12018_v29  ;;  %v14541_v56 = vand.u32 4294901760, %v12023_v40 }
 0x140   :  { %v12191_v59 = vsub.f32 %v11929_v35, %v14528_v8  ;;  %v14533_v35 = vand.u32 4294901760, %v11971_v1  ;;  %9026 = vmatpush3.bf16.msra.mxu0 %v12184_v18  ;;  %v12240_v17 = vpack.c.bf16 %v2827_v13, %v2824_v55  ;;  %v12303_v18 = vsub.f32 %v12136_v62, %v2824_v55 }
 0x141   :  { %v12247_v5 = vsub.f32 %v12011_v57, %v14539_v3  ;;  %9028 = vmatprep.subr.bf16.mxu0 %v12204_v58  ;;  %v12261_v23 = vsub.f32 %v12023_v40, %v14541_v56  ;;  %v12264_v57 = vsub.f32 %v12052_v48, %v2818_v32  ;;  %v12267_v3 = vsub.f32 %v12057_v22, %v2821_v0 }
 0x142   :  { %v12214_v8 = vsub.f32 %v11971_v1, %v14533_v35  ;;  %v14536_v1 = vand.u32 4294901760, %v12102_v50  ;;  %14538 = vst [vmem:[#allocation23_spill] sm:$0xff] %v12240_v17  ;;  %8986 = vmatpush3.bf16.msra.mxu1 %v14485_v26  ;;  %v3016_v40 = vsub.f32 %v12067_v16, %v14542_v41  ;;  %v14543_v56 = vand.u32 4294901760, %v12072_v61 }
 0x143   :  { %8988 = vmatprep.subr.bf16.mxu1 %v14486_v19  ;;  %v9065_v26 = vpack.c.bf16 %v12087_v38, %v12072_v61  ;;  %v14545_v0 = vand.u32 4294901760, %v12093_v53  ;;  %v14546_v19 = vand.u32 4294901760, %v12098_v45  ;;  %v14547_v55 = vand.u32 4294901760, %v12107_v15 }
 0x144   :  { %v2886_v35 = vsub.f32 %v12102_v50, %v14536_v1  ;;  %v12252_v1 = vsub.f32 %v12018_v29, %v14540_v42  ;;  %v12270_v29 = vsub.f32 %v12077_v37, %v2872_v63  ;;  %v3009_v42 = vsub.f32 %v12062_v54, %v14064_v52  ;;  %9030 = vmatpush3.bf16.msra.mxu0 %v12240_v17  ;;  %v7510_v52 = vpop.f32.mrb[4].mxu1 }
 0x145   :  { %v2897_v48 = vsub.f32 %v12072_v61, %v14543_v56  ;;  %v14544_v37 = vand.u32 4294901760, %v12087_v38  ;;  %v3023_v63 = vsub.f32 %v12093_v53, %v14545_v0  ;;  %9064 = vmatprep.subr.bf16.mxu0 %v9063_v34  ;;  %v3030_v56 = vsub.f32 %v12098_v45, %v14546_v19  ;;  %v7511_v58 = vpop.f32.mrb[5].mxu1 }
 0x146   :  { %v2887_v32 = vand.u32 4294901760, %v2886_v35  ;;  %v12294_v35 = vsub.f32 %v12082_v25, %v2875_v31  ;;  %v9067_v17 = vpack.c.bf16 %v12098_v45, %v12093_v53  ;;  %v12306_v0 = vsub.f32 %v12141_v30, %v2827_v13  ;;  %8990 = vmatpush3.bf16.msra.mxu1 %v14489_v47 }
 0x147   :  { %v2904_v22 = vsub.f32 %v12087_v38, %v14544_v37  ;;  %v3036_v25 = vand.u32 4294901760, %v12146_v20  ;;  %v14073_v31 = vand.u32 4294901760, %v12151_v10  ;;  %v7512_v34 = vadd.f32 %v7511_v58, %v7510_v52  ;;  %8992 = vmatprep.subr.bf16.mxu1 %v14490_v11 }
 0x148   :  { %v3010_v19 = vand.u32 4294901760, %v3009_v42  ;;  %v3017_v41 = vand.u32 4294901760, %v3016_v40  ;;  %v2898_v37 = vand.u32 4294901760, %v2897_v48  ;;  %2888 = vmatmul.mubr.f32.vlgmr.msra.gmra.mrb[16].mxu0 %v2887_v32  ;;  %v3024_v62 = vand.u32 4294901760, %v3023_v63 }
 0x149   :  { %v2905_v50 = vand.u32 4294901760, %v2904_v22  ;;  %9066 = vmatpush3.bf16.msra.mxu0 %v9065_v26  ;;  %v2911_v30 = vsub.f32 %v12107_v15, %v14547_v55  ;;  %v9069_v13 = vpack.c.bf16 %v12122_v36, %v12107_v15  ;;  %v782_v58 = vadd.f32 %v7512_v34, %v11941_v6  ;;  %3255 = vmatprep.mubr.f32.mxu0 %v11776_v60 }
 0x14a   :  { %v3031_v52 = vand.u32 4294901760, %v3030_v56  ;;  %v14548_v47 = vand.u32 4294901760, %v12122_v36  ;;  %9068 = vmatprep.subr.bf16.mxu0 %v9067_v17  ;;  %v9071_v11 = vpack.c.bf16 %v12151_v10, %v12146_v20  ;;  %v3037_v40 = vsub.f32 %v12146_v20, %v3036_v25  ;;  %8994 = vmatpush3.bf16.msra.mxu1 %v14493_v33 }
 0x14b   :  { %v3044_v48 = vsub.f32 %v12151_v10, %v14073_v31  ;;  %v14079_v6 = vand.u32 4294901760, %v12156_v28  ;;  %v14078_v32 = vand.u32 4294901760, %v12161_v43  ;;  %v12333_v22 = vadd.f32 %v12181_v39, %v782_v58  ;;  %8996 = vmatprep.subr.bf16.mxu1 %v14494_v14 }
 0x14c   :  { %v2918_v42 = vsub.f32 %v12122_v36, %v14548_v47  ;;  %v9031_v17 = vpack.c.bf16 %v3017_v41, %v3010_v19  ;;  %v14077_v26 = vand.u32 4294901760, %v12167_v49  ;;  %v14075_v63 = vand.u32 4294901760, %v12172_v21 }
 0x14d   :  { %v9033_v56 = vpack.c.bf16 %v2905_v50, %v2898_v37  ;;  %9070 = vmatpush3.bf16.msra.mxu0 %v9069_v13  ;;  %v9073_v34 = vpack.c.bf16 %v12161_v43, %v12156_v28  ;;  %v14074_v55 = vand.u32 4294901760, %v12177_v24  ;;  %v14076_v47 = vand.u32 4294901760, %v12191_v59 }
 0x14e   :  { %v9035_v39 = vpack.c.bf16 %v3031_v52, %v3024_v62  ;;  %v2912_v58 = vand.u32 4294901760, %v2911_v30  ;;  %v2919_v31 = vand.u32 4294901760, %v2918_v42  ;;  %9072 = vmatprep.subr.bf16.mxu0 %v9071_v11  ;;  %v9075_v33 = vpack.c.bf16 %v12172_v21, %v12167_v49  ;;  %8998 = vmatpush3.bf16.msra.mxu1 %v14497_v7 }
 0x14f   :  { %v3038_v41 = vand.u32 4294901760, %v3037_v40  ;;  %v3045_v19 = vand.u32 4294901760, %v3044_v48  ;;  %v2925_v14 = vsub.f32 %v12156_v28, %v14079_v6  ;;  %v2932_v50 = vsub.f32 %v12161_v43, %v14078_v32  ;;  %9032 = vmatprep.subr.bf16.mxu1 %v9031_v17 }
 0x150   :  { %v3051_v37 = vsub.f32 %v12167_v49, %v14077_v26  ;;  %v3058_v62 = vsub.f32 %v12172_v21, %v14075_v63  ;;  %v14085_v30 = vand.u32 4294901760, %v12196_v4  ;;  %v14084_v13 = vand.u32 4294901760, %v12201_v46 }
 0x151   :  { %9074 = vmatpush3.bf16.msra.mxu0 %v9073_v34  ;;  %v2939_v52 = vsub.f32 %v12177_v24, %v14074_v55  ;;  %v2946_v7 = vsub.f32 %v12191_v59, %v14076_v47  ;;  %v9077_v42 = vpack.c.bf16 %v12191_v59, %v12177_v24  ;;  %v14082_v11 = vand.u32 4294901760, %v12209_v12  ;;  %2776 = vmatmul.mubr.f32.vlgmr.msra.gmra.mrb[18].mxu1 %v14464_v44 }
 0x152   :  { %9076 = vmatprep.subr.bf16.mxu0 %v9075_v33  ;;  %v14080_v40 = vand.u32 4294901760, %v12214_v8  ;;  %v9079_v48 = vpack.c.bf16 %v12201_v46, %v12196_v4  ;;  %v14081_v17 = vand.u32 4294901760, %v12219_v51  ;;  %v9037_v34 = vpack.c.bf16 %v2919_v31, %v2912_v58  ;;  %9034 = vmatpush3.bf16.msra.mxu1 %v9033_v56 }
 0x153   :  { %v2926_v55 = vand.u32 4294901760, %v2925_v14  ;;  %v2933_v63 = vand.u32 4294901760, %v2932_v50  ;;  %v14083_v47 = vand.u32 4294901760, %v12224_v2  ;;  %v9039_v26 = vpack.c.bf16 %v3045_v19, %v3038_v41  ;;  %3118 = vmatprep.mubr.f32.mxu1 %v11763_v27  ;;  %9036 = vmatprep.subr.bf16.mxu1 %v9035_v39 }
 0x154   :  { %v3052_v32 = vand.u32 4294901760, %v3051_v37  ;;  %v3065_v33 = vsub.f32 %v12196_v4, %v14085_v30  ;;  %v3072_v6 = vsub.f32 %v12201_v46, %v14084_v13  ;;  %v3059_v44 = vand.u32 4294901760, %v3058_v62 }
 0x155   :  { %v2940_v31 = vand.u32 4294901760, %v2939_v52  ;;  %v2947_v58 = vand.u32 4294901760, %v2946_v7  ;;  %9078 = vmatpush3.bf16.msra.mxu0 %v9077_v42  ;;  %v9081_v56 = vpack.c.bf16 %v12214_v8, %v12209_v12  ;;  %v2953_v41 = vsub.f32 %v12209_v12, %v14082_v11 }
 0x156   :  { %v2960_v19 = vsub.f32 %v12214_v8, %v14080_v40  ;;  %9080 = vmatprep.subr.bf16.mxu0 %v9079_v48  ;;  %v3079_v39 = vsub.f32 %v12219_v51, %v14081_v17  ;;  %v9083_v14 = vpack.c.bf16 %v12224_v2, %v12219_v51  ;;  %v9041_v50 = vpack.c.bf16 %v2933_v63, %v2926_v55 }
 0x157   :  { %v3086_v37 = vsub.f32 %v12224_v2, %v14083_v47  ;;  %v2966_v62 = vand.u32 4294901760, %v12237_v9  ;;  %v2973_v52 = vand.u32 4294901760, %v12247_v5  ;;  %9038 = vmatpush3.bf16.msra.mxu1 %v9037_v34  ;;  %v3066_v7 = vand.u32 4294901760, %v3065_v33 }
 0x158   :  { %v3073_v42 = vand.u32 4294901760, %v3072_v6  ;;  %v14086_v48 = vand.u32 4294901760, %v12252_v1  ;;  %v14087_v40 = vand.u32 4294901760, %v12261_v23  ;;  %9040 = vmatprep.subr.bf16.mxu1 %v9039_v26  ;;  %v9043_v17 = vpack.c.bf16 %v3059_v44, %v3052_v32  ;;  %v7615_v6 = vpop.f32.mrb[4].mxu0 }
 0x159   :  { %v9045_v11 = vpack.c.bf16 %v2947_v58, %v2940_v31  ;;  %9082 = vmatpush3.bf16.msra.mxu0 %v9081_v56  ;;  %v9085_v63 = vpack.c.bf16 %v12247_v5, %v12237_v9  ;;  %v2954_v55 = vand.u32 4294901760, %v2953_v41  ;;  %v2961_v47 = vand.u32 4294901760, %v2960_v19  ;;  %v7616_v31 = vpop.f32.mrb[5].mxu0 }
 0x15a   :  { %v3080_v13 = vand.u32 4294901760, %v3079_v39  ;;  %9084 = vmatprep.subr.bf16.mxu0 %v9083_v14  ;;  %v9087_v34 = vpack.c.bf16 %v12261_v23, %v12252_v1  ;;  %v3087_v33 = vand.u32 4294901760, %v3086_v37  ;;  %v2967_v30 = vsub.f32 %v12237_v9, %v2966_v62 }
 0x15b   :  { %v2974_v32 = vsub.f32 %v12247_v5, %v2973_v52  ;;  %v2980_v26 = vand.u32 4294901760, %v12264_v57  ;;  %9042 = vmatpush3.bf16.msra.mxu1 %v9041_v50  ;;  %v9047_v44 = vpack.c.bf16 %v3073_v42, %v3066_v7  ;;  %v3093_v58 = vsub.f32 %v12252_v1, %v14086_v48 }
 0x15c   :  { %v3100_v56 = vsub.f32 %v12261_v23, %v14087_v40  ;;  %v14090_v41 = vand.u32 4294901760, %v12267_v3  ;;  %9044 = vmatprep.subr.bf16.mxu1 %v9043_v17  ;;  %v7617_v19 = vadd.f32 %v7616_v31, %v7615_v6  ;;  %v9089_v39 = vpack.c.bf16 %v12267_v3, %v12264_v57 }
 0x15d   :  { %9086 = vmatpush3.bf16.msra.mxu0 %v9085_v63  ;;  %v14089_v14 = vand.u32 4294901760, %v12270_v29  ;;  %v14088_v50 = vand.u32 4294901760, %v12294_v35  ;;  %v9049_v37 = vpack.c.bf16 %v2961_v47, %v2954_v55  ;;  %v9091_v7 = vpack.c.bf16 %v12294_v35, %v12270_v29 }
 0x15e   :  { %9088 = vmatprep.subr.bf16.mxu0 %v9087_v34  ;;  %v9051_v42 = vpack.c.bf16 %v3087_v33, %v3080_v13  ;;  %v2968_v48 = vand.u32 4294901760, %v2967_v30  ;;  %v2975_v40 = vand.u32 4294901760, %v2974_v32  ;;  %v2981_v17 = vsub.f32 %v12264_v57, %v2980_v26  ;;  %v14587_v57 = vld [vmem:[#allocation14_spill] sm:$0xff] }
 0x15f   :  { %9046 = vmatpush3.bf16.msra.mxu1 %v9045_v11  ;;  %v3094_v63 = vand.u32 4294901760, %v3093_v58  ;;  %v2988_v6 = vsub.f32 %v12267_v3, %v14090_v41  ;;  %v2994_v31 = vand.u32 4294901760, %v12303_v18  ;;  %v3001_v47 = vand.u32 4294901760, %v12306_v0 }
 0x160   :  { %9048 = vmatprep.subr.bf16.mxu1 %v9047_v44  ;;  %v3101_v55 = vand.u32 4294901760, %v3100_v56  ;;  %v3107_v30 = vsub.f32 %v12270_v29, %v14089_v14  ;;  %v3114_v13 = vsub.f32 %v12294_v35, %v14088_v50  ;;  %v9093_v11 = vpack.c.bf16 %v12306_v0, %v12303_v18 }
 0x161   :  { %9090 = vmatpush3.bf16.msra.mxu0 %v9089_v39  ;;  %v14549_v34 = vand.u32 4294901760, %v12062_v54  ;;  %v14550_v33 = vand.u32 4294901760, %v12067_v16  ;;  %v9053_v44 = vpack.c.bf16 %v2975_v40, %v2968_v48  ;;  %v2982_v58 = vand.u32 4294901760, %v2981_v17  ;;  %v7580_v48 = vpop.f32.mrb[6].mxu1 }
 0x162   :  { %9092 = vmatprep.subr.bf16.mxu0 %v9091_v7  ;;  %v2989_v56 = vand.u32 4294901760, %v2988_v6  ;;  %v2995_v39 = vsub.f32 %v12303_v18, %v2994_v31  ;;  %v3002_v50 = vsub.f32 %v12306_v0, %v3001_v47  ;;  %v9055_v14 = vpack.c.bf16 %v3101_v55, %v3094_v63  ;;  %v14592_v0 = vld [vmem:[#allocation22_spill] sm:$0xff] }
 0x163   :  { %v9127_v32 = vpack.c.bf16 %v14550_v33, %v14549_v34  ;;  %9050 = vmatpush3.bf16.msra.mxu1 %v9049_v37  ;;  %v3108_v7 = vand.u32 4294901760, %v3107_v30  ;;  %v3115_v41 = vand.u32 4294901760, %v3114_v13  ;;  %v14551_v16 = vand.u32 4294901760, %v12072_v61  ;;  %v7581_v34 = vpop.f32.mrb[7].mxu1  ;;  %v14555_v30 = vld [vmem:[#allocation18_spill] sm:$0xff] }
 0x164   :  { %9052 = vmatprep.subr.bf16.mxu1 %v9051_v42  ;;  %v14552_v54 = vand.u32 4294901760, %v12087_v38  ;;  %v14553_v37 = vand.u32 4294901760, %v12093_v53  ;;  %v14554_v17 = vand.u32 4294901760, %v12098_v45  ;;  %v7582_v33 = vadd.f32 %v7581_v34, %v7580_v48  ;;  %v14577_v48 = vld [vmem:[#allocation8_spill] sm:$0xff] }
 0x165   :  { %9094 = vmatpush3.bf16.msra.mxu0 %v9093_v11  ;;  %v9057_v42 = vpack.c.bf16 %v2989_v56, %v2982_v58  ;;  %v2996_v63 = vand.u32 4294901760, %v2995_v39  ;;  %v3003_v55 = vand.u32 4294901760, %v3002_v50  ;;  %v9059_v61 = vpack.c.bf16 %v3115_v41, %v3108_v7  ;;  %v14568_v39 = vld [vmem:[#allocation12_spill] sm:$0xff]  ;;  %v14571_v7 = vld [vmem:[#allocation6_spill] sm:$0xff] }
 0x166   :  { %v9129_v40 = vpack.c.bf16 %v14552_v54, %v14551_v16  ;;  %9128 = vmatprep.subr.bf16.mxu0 %v9127_v32  ;;  %v9131_v6 = vpack.c.bf16 %v14554_v17, %v14553_v37  ;;  %v14556_v38 = vand.u32 4294901760, %v12107_v15  ;;  %v14557_v13 = vand.u32 4294901760, %v12122_v36  ;;  %v14580_v17 = vld [vmem:[#allocation17_spill] sm:$0xff] }
 0x167   :  { %9054 = vmatpush3.bf16.msra.mxu1 %v9053_v44  ;;  %v1054_v53 = vadd.f32 %v7582_v33, %v12333_v22  ;;  %v14558_v45 = vand.u32 4294901760, %v12151_v10  ;;  %v14559_v15 = vand.u32 4294901760, %v12156_v28  ;;  %v14560_v36 = vand.u32 4294901760, %v12161_v43  ;;  %v14563_v10 = vld [vmem:[#allocation13_spill] sm:$0xff]  ;;  %v14586_v33 = vld [vmem:[#allocation11_spill] sm:$0xff] }
 0x168   :  { %3258 = vmatmul.mubr.f32.vlgmr.msra.gmra.mrb[18].mxu0 %v14555_v30  ;;  %9056 = vmatprep.subr.bf16.mxu1 %v9055_v14  ;;  %v9133_v11 = vpack.c.bf16 %v14557_v13, %v14556_v38  ;;  %v9061_v14 = vpack.c.bf16 %v3003_v55, %v2996_v63  ;;  %v14561_v22 = vand.u32 4294901760, %v12167_v49  ;;  %v14562_v20 = vand.u32 4294901760, %v12172_v21  ;;  %v14569_v49 = vld [vmem:[#allocation5_spill] sm:$0xff]  ;;  %v14589_v63 = vld [vmem:[#allocation19_spill] sm:$0xff]  ;;  %v14590_v55 = vld [vmem:[#allocation20_spill] sm:$0xff] }
 0x169   :  { %9130 = vmatpush3.bf16.msra.mxu0 %v9129_v40  ;;  %v9135_v32 = vpack.c.bf16 %v14558_v45, %v3036_v25  ;;  %3532 = vmatprep.mubr.f32.mxu0 %v11763_v27  ;;  %v1166_v50 = vadd.f32 %v7617_v19, %v1054_v53  ;;  %v9137_v41 = vpack.c.bf16 %v14560_v36, %v14559_v15  ;;  %v14564_v25 = vand.u32 4294901760, %v12177_v24  ;;  %v14576_v40 = vld [vmem:[#allocation7_spill] sm:$0xff]  ;;  %v14591_v38 = vld [vmem:[#allocation21_spill] sm:$0xff] }
 0x16a   :  { %9132 = vmatprep.subr.bf16.mxu0 %v9131_v6  ;;  %v9139_v44 = vpack.c.bf16 %v14562_v20, %v14561_v22  ;;  %v14565_v19 = vand.u32 4294901760, %v12191_v59  ;;  %v14566_v28 = vand.u32 4294901760, %v12196_v4  ;;  %v14567_v43 = vand.u32 4294901760, %v12201_v46  ;;  %v14581_v6 = vld [vmem:[#allocation9_spill] sm:$0xff] }
 0x16b   :  { %9058 = vmatpush3.bf16.msra.mxu1 %v9057_v42  ;;  %v14570_v21 = vand.u32 4294901760, %v11776_v60  ;;  %v14572_v24 = vand.u32 4294901760, %v12209_v12  ;;  %v14573_v59 = vand.u32 4294901760, %v12214_v8  ;;  %v14574_v4 = vand.u32 4294901760, %v12219_v51 }
 0x16c   :  { %9060 = vmatprep.subr.bf16.mxu1 %v9059_v61  ;;  %v9141_v58 = vpack.c.bf16 %v14565_v19, %v14564_v25  ;;  %v9143_v56 = vpack.c.bf16 %v14567_v43, %v14566_v28  ;;  %v14575_v46 = vand.u32 4294901760, %v12224_v2  ;;  %v9149_v60 = vpack.c.bf16 %v2973_v52, %v2966_v62  ;;  %v14585_v52 = vld [vmem:[#allocation10_spill] sm:$0xff] }
 0x16d   :  { %9134 = vmatpush3.bf16.msra.mxu0 %v9133_v11  ;;  %v9145_v16 = vpack.c.bf16 %v14573_v59, %v14572_v24  ;;  %v14578_v12 = vand.u32 4294901760, %v12252_v1  ;;  %v14579_v8 = vand.u32 4294901760, %v12261_v23  ;;  %v14582_v9 = vand.u32 4294901760, %v12267_v3  ;;  %v14588_v3 = vld [vmem:[#allocation16_spill] sm:$0xff] }
 0x16e   :  { %9136 = vmatprep.subr.bf16.mxu0 %v9135_v32  ;;  %v9147_v54 = vpack.c.bf16 %v14575_v46, %v14574_v4  ;;  %v14583_v62 = vand.u32 4294901760, %v12270_v29  ;;  %v14584_v1 = vand.u32 4294901760, %v12294_v35  ;;  %v9157_v42 = vpack.c.bf16 %v3001_v47, %v2994_v31  ;;  %v14593_v31 = vld [vmem:[#allocation23_spill] sm:$0xff] }
 0x16f   :  { %9062 = vmatpush3.bf16.msra.mxu1 %v9061_v14  ;;  %v9151_v37 = vpack.c.bf16 %v14579_v8, %v14578_v12  ;;  %v9153_v5 = vpack.c.bf16 %v14582_v9, %v2980_v26  ;;  %v14594_v47 = vand.u32 4294901760, %v14555_v30  ;;  %v9745_v12 = vmov 0.0|0.0   ;;  %v3646_v8 = vld [vmem:[%s13818_s3 + $0x10] sm:$0xff]  ;;  %v3648_v9 = vld [vmem:[%s13818_s3 + $0x20] sm:$0xff] }
 0x170   :  { %9096 = vmatprep.subr.bf16.mxu1 %v14563_v10  ;;  %v9155_v23 = vpack.c.bf16 %v14584_v1, %v14583_v62  ;;  %v3669_v62 = vand.u32 4294901760, %v3648_v9 }
 0x171   :  { %9138 = vmatpush3.bf16.msra.mxu0 %v9137_v41 }
 0x172   :  { %9140 = vmatprep.subr.bf16.mxu0 %v9139_v44  ;;  %3120 = vmatmul.mubr.f32.vlgmr.msra.gmra.mrb[20].mxu1 %v14568_v39 }
 0x173   :  { %9098 = vmatpush3.bf16.msra.mxu1 %v14569_v49  ;;  %3362 = vmatprep.mubr.f32.mxu1 %v14570_v21 }
 0x174   :  { %9100 = vmatprep.subr.bf16.mxu1 %v14571_v7 }
 0x175   :  { %9142 = vmatpush3.bf16.msra.mxu0 %v9141_v58  ;;  %v7685_v51 = vpop.f32.mrb[6].mxu0 }
 0x176   :  { %9144 = vmatprep.subr.bf16.mxu0 %v9143_v56  ;;  %v7686_v2 = vpop.f32.mrb[7].mxu0 }
 0x177   :  { %9102 = vmatpush3.bf16.msra.mxu1 %v14576_v40  ;;  %v7687_v34 = vadd.f32 %v7686_v2, %v7685_v51  ;;  %v3663_v51 = vand.u32 4294901760, %v3646_v8 }
 0x178   :  { %9104 = vmatprep.subr.bf16.mxu1 %v14577_v48 }
 0x179   :  { %9146 = vmatpush3.bf16.msra.mxu0 %v9145_v16  ;;  %v3645_v16 = vld [vmem:[%s13818_s3 + $0x8] sm:$0xff] }
 0x17a   :  { %9148 = vmatprep.subr.bf16.mxu0 %v9147_v54  ;;  %v3660_v46 = vand.u32 4294901760, %v3645_v16 }
 0x17b   :  { %9106 = vmatpush3.bf16.msra.mxu1 %v14580_v17 }
 0x17c   :  { %9108 = vmatprep.subr.bf16.mxu1 %v14581_v6 }
 0x17d   :  { %9150 = vmatpush3.bf16.msra.mxu0 %v9149_v60 }
 0x17e   :  { %9152 = vmatprep.subr.bf16.mxu0 %v9151_v37  ;;  %v3647_v37 = vld [vmem:[%s13818_s3 + $0x18] sm:$0xff] }
 0x17f   :  { %9110 = vmatpush3.bf16.msra.mxu1 %v14585_v52  ;;  %v7650_v29 = vpop.f32.mrb[8].mxu1 }
 0x180   :  { %9112 = vmatprep.subr.bf16.mxu1 %v14586_v33  ;;  %v7651_v26 = vpop.f32.mrb[9].mxu1 }
 0x181   :  { %9154 = vmatpush3.bf16.msra.mxu0 %v9153_v5  ;;  %v7652_v35 = vadd.f32 %v7651_v26, %v7650_v29  ;;  %v3649_v5 = vld [vmem:[%s13818_s3 + $0x28] sm:$0xff]  ;;  %v12601_v26 = vsub.f32 %v3648_v9, %v3669_v62 }
 0x182   :  { %9156 = vmatprep.subr.bf16.mxu0 %v9155_v23  ;;  %v3672_v1 = vand.u32 4294901760, %v3649_v5 }
 0x183   :  { %9114 = vmatpush3.bf16.msra.mxu1 %v14587_v57  ;;  %v1398_v61 = vadd.f32 %v7652_v35, %v1166_v50 }
 0x184   :  { %9116 = vmatprep.subr.bf16.mxu1 %v14588_v3  ;;  %v12603_v35 = vsub.f32 %v3649_v5, %v3672_v1 }
 0x185   :  { %9158 = vmatpush3.bf16.msra.mxu0 %v9157_v42  ;;  %v1536_v18 = vadd.f32 %v7687_v34, %v1398_v61  ;;  %v3650_v42 = vld [vmem:[%s13818_s3 + $0x30] sm:$0xff]  ;;  %v14091_v61 = vmov 0.0  }
 0x186   :  { %9191 = vmatprep.subr.bf16.mxu0 %v9745_v12 }
 0x187   :  { %9118 = vmatpush3.bf16.msra.mxu1 %v14589_v63 }
 0x188   :  { %3534 = vmatmul.mubr.f32.vlgmr.msra.gmra.mrb[20].mxu0 %v14568_v39  ;;  %9120 = vmatprep.subr.bf16.mxu1 %v14590_v55 }
 0x189   :  { %8295 = vmatprep.mubr.msk.f32.mxu0 %vm9746_vm0, %v14091_v61 }
 0x18b   :  { %9122 = vmatpush3.bf16.msra.mxu1 %v14591_v38 }
 0x18c   :  { %9124 = vmatprep.subr.bf16.mxu1 %v14592_v0 }
 0x18f   :  { %9126 = vmatpush3.bf16.msra.mxu1 %v14593_v31 }
 0x190   :  { %9160 = vmatprep.subr.bf16.mxu1 %v14563_v10 }
 0x192   :  { %3366 = vmatmul.mubr.f32.vlgmr.msra.gmra.mrb[22].mxu1 %v14594_v47 }
 0x193   :  { %9162 = vmatpush3.bf16.msra.mxu1 %v14569_v49  ;;  %3636 = vmatprep.mubr.f32.mxu1 %v11763_v27 }
 0x194   :  { %9164 = vmatprep.subr.bf16.mxu1 %v14571_v7 }
 0x196   :  { %v7755_v13 = vpop.f32.mrb[8].mxu0 }
 0x197   :  { %9166 = vmatpush3.bf16.msra.mxu1 %v14576_v40  ;;  %v7756_v11 = vpop.f32.mrb[9].mxu0 }
 0x198   :  { %9168 = vmatprep.subr.bf16.mxu1 %v14577_v48  ;;  %v7757_v53 = vadd.f32 %v7756_v11, %v7755_v13 }
 0x19b   :  { %9170 = vmatpush3.bf16.msra.mxu1 %v14580_v17  ;;  %v3666_v17 = vand.u32 4294901760, %v3647_v37 }
 0x19c   :  { %9172 = vmatprep.subr.bf16.mxu1 %v14581_v6 }
 0x19d   :  { %v12572_v6 = vpack.c.bf16 %v3666_v17, %v3663_v51  ;;  %v12598_v29 = vsub.f32 %v3647_v37, %v3666_v17 }
 0x19f   :  { %9174 = vmatpush3.bf16.msra.mxu1 %v14585_v52  ;;  %v7720_v27 = vpop.f32.mrb[10].mxu1  ;;  %v12586_v52 = vsub.f32 %v3645_v16, %v3660_v46 }
 0x1a0   :  { %9176 = vmatprep.subr.bf16.mxu1 %v14586_v33  ;;  %v7721_v30 = vpop.f32.mrb[11].mxu1  ;;  %v12588_v33 = vpack.c.bf16 %v3672_v1, %v3669_v62 }
 0x1a1   :  { %v7722_v45 = vadd.f32 %v7721_v30, %v7720_v27  ;;  %v3763_v27 = vand.u32 4294901760, %v12598_v29 }
 0x1a3   :  { %9178 = vmatpush3.bf16.msra.mxu1 %v14587_v57  ;;  %v1644_v32 = vadd.f32 %v7722_v45, %v1536_v18  ;;  %v3651_v57 = vld [vmem:[%s13818_s3 + $0x38] sm:$0xff] }
 0x1a4   :  { %9180 = vmatprep.subr.bf16.mxu1 %v14588_v3  ;;  %v12596_v3 = vsub.f32 %v3646_v8, %v3663_v51  ;;  %v9222_v51 = vpack.c.bf16 %v12603_v35, %v12601_v26 }
 0x1a5   :  { %v1812_v50 = vadd.f32 %v7757_v53, %v1644_v32 }
 0x1a6   :  { %v3756_v53 = vand.u32 4294901760, %v12596_v3  ;;  %v9219_v8 = vpack.c.bf16 %v12598_v29, %v12596_v3 }
 0x1a7   :  { %9182 = vmatpush3.bf16.msra.mxu1 %v14589_v63  ;;  %v3675_v63 = vand.u32 4294901760, %v3650_v42 }
 0x1a8   :  { %9184 = vmatprep.subr.bf16.mxu1 %v14590_v55  ;;  %v3678_v55 = vand.u32 4294901760, %v3651_v57  ;;  %v3757_v32 = vsub.f32 %v12596_v3, %v3756_v53 }
 0x1aa   :  { %v12615_v47 = vsub.f32 %v3651_v57, %v3678_v55 }
 0x1ab   :  { %9186 = vmatpush3.bf16.msra.mxu1 %v14591_v38  ;;  %v3749_v38 = vand.u32 4294901760, %v12586_v52 }
 0x1ac   :  { %9188 = vmatprep.subr.bf16.mxu1 %v14592_v0  ;;  %v12611_v0 = vpack.c.bf16 %v3678_v55, %v3675_v63 }
 0x1ad   :  { %v3750_v11 = vsub.f32 %v12586_v52, %v3749_v38 }
 0x1af   :  { %9190 = vmatpush3.bf16.msra.mxu1 %v14593_v31  ;;  %v12613_v31 = vsub.f32 %v3650_v42, %v3675_v63  ;;  %v3751_v45 = vand.u32 4294901760, %v3750_v11 }
 0x1b0   :  { %8393 = vmatprep.subr.mxu1 %v14091_v61 }
 0x1b1   :  { %v9225_v17 = vpack.c.bf16 %v12615_v47, %v12613_v31 }
 0x1b2   :  { %3638 = vmatmul.mubr.f32.vlgmr.msra.gmra.mrb[24].mxu1 %v14568_v39  ;;  %v3644_v39 = vld [vmem:[%s13818_s3] sm:$0xff] }
 0x1b3   :  { %v3657_v4 = vand.u32 4294901760, %v3644_v39  ;;  %8395 = vmatprep.mubr.msk.f32.mxu1 %vm9746_vm0, %v14091_v61 }
 0x1b5   :  { %v12561_v48 = vpack.c.bf16 %v3660_v46, %v3657_v4  ;;  %v12584_v23 = vsub.f32 %v3644_v39, %v3657_v4 }
 0x1b7   :  { %9193 = vmatpush3.bf16.msra.mxu0 %v12561_v48  ;;  %v3742_v18 = vand.u32 4294901760, %v12584_v23 }
 0x1b8   :  { %v7825_v14 = vpop.f32.mrb[10].mxu0  ;;  %9194 = vmatprep.subr.bf16.mxu0 %v9745_v12 }
 0x1b9   :  { %v7826_v15 = vpop.f32.mrb[11].mxu0  ;;  %v3743_v13 = vsub.f32 %v12584_v23, %v3742_v18  ;;  %v9240_v57 = vpack.c.bf16 %v3749_v38, %v3742_v18 }
 0x1ba   :  { %v7827_v36 = vadd.f32 %v7826_v15, %v7825_v14  ;;  %v3758_v15 = vand.u32 4294901760, %v3757_v32 }
 0x1bb   :  { %9196 = vmatpush3.bf16.msra.mxu0 %v12572_v6  ;;  %v3744_v30 = vand.u32 4294901760, %v3743_v13 }
 0x1bc   :  { %9197 = vmatprep.subr.bf16.mxu0 %v9745_v12 }
 0x1bd   :  { %v9204_v14 = vpack.c.bf16 %v3751_v45, %v3744_v30 }
 0x1bf   :  { %9199 = vmatpush3.bf16.msra.mxu0 %v12588_v33 }
 0x1c0   :  { %v7790_v41 = vpop.f32.mrb[12].mxu1  ;;  %9200 = vmatprep.subr.bf16.mxu0 %v9745_v12 }
 0x1c1   :  { %v7791_v22 = vpop.f32.mrb[13].mxu1 }
 0x1c2   :  { %v7792_v20 = vadd.f32 %v7791_v22, %v7790_v41  ;;  %v3770_v41 = vand.u32 4294901760, %v12601_v26  ;;  %v3777_v22 = vand.u32 4294901760, %v12603_v35 }
 0x1c3   :  { %9202 = vmatpush3.bf16.msra.mxu0 %v12611_v0 }
 0x1c4   :  { %v1916_v44 = vadd.f32 %v7792_v20, %v1812_v50  ;;  %9203 = vmatprep.subr.bf16.mxu0 %v9745_v12  ;;  %v3764_v50 = vsub.f32 %v12598_v29, %v3763_v27  ;;  %v9246_v63 = vpack.c.bf16 %v3777_v22, %v3770_v41 }
 0x1c6   :  { %v2028_v10 = vadd.f32 %v7827_v36, %v1916_v44  ;;  %v3765_v36 = vand.u32 4294901760, %v3764_v50 }
 0x1d9   :  { %v7895_v25 = vpop.f32.mrb[12].mxu0 }
 0x1da   :  { %v7896_v19 = vpop.f32.mrb[13].mxu0 }
 0x1db   :  { %v7897_v58 = vadd.f32 %v7896_v19, %v7895_v25  ;;  %v3771_v25 = vsub.f32 %v12601_v26, %v3770_v41  ;;  %v3778_v19 = vsub.f32 %v12603_v35, %v3777_v22 }
 0x1e3   :  { %v7860_v28 = vpop.f32.mrb[14].mxu1 }
 0x1e4   :  { %v7861_v43 = vpop.f32.mrb[15].mxu1 }
 0x1e5   :  { %v7862_v56 = vadd.f32 %v7861_v43, %v7860_v28  ;;  %v3772_v28 = vand.u32 4294901760, %v3771_v25  ;;  %v3779_v43 = vand.u32 4294901760, %v3778_v19 }
 0x1e7   :  { %v2260_v49 = vadd.f32 %v7862_v56, %v2028_v10  ;;  %v9207_v10 = vpack.c.bf16 %v3765_v36, %v3758_v15  ;;  %v3784_v56 = vand.u32 4294901760, %v12613_v31 }
 0x1e9   :  { %v2398_v21 = vadd.f32 %v7897_v58, %v2260_v49  ;;  %v3791_v49 = vand.u32 4294901760, %v12615_v47 }
 0x1eb   :  { %v9249_v55 = vpack.c.bf16 %v3791_v49, %v3784_v56 }
 0x1fa   :  { %v7965_v7 = vpop.f32.mrb[14].mxu0 }
 0x1fb   :  { %v7966_v24 = vpop.f32.mrb[15].mxu0 }
 0x1fc   :  { %v7967_v59 = vadd.f32 %v7966_v24, %v7965_v7  ;;  %v3785_v7 = vsub.f32 %v12613_v31, %v3784_v56  ;;  %v3792_v24 = vsub.f32 %v12615_v47, %v3791_v49  ;;  %v4656_v49 = vld [vmem:[%s13817_s2 + $0x8] sm:$0xff] }
 0x1fe   :  { %v3793_v39 = vand.u32 4294901760, %v3792_v24  ;;  %v4722_v24 = vand.u32 4294901760, %v4656_v49 }
 0x203   :  { %v7930_v54 = vpop.f32.mrb[16].mxu1 }
 0x204   :  { %v7931_v40 = vpop.f32.mrb[17].mxu1 }
 0x205   :  { %v7932_v60 = vadd.f32 %v7931_v40, %v7930_v54  ;;  %v9216_v40 = vpack.c.bf16 %v12586_v52, %v12584_v23  ;;  %v9243_v52 = vpack.c.bf16 %v3763_v27, %v3756_v53 }
 0x207   :  { %v2506_v2 = vadd.f32 %v7932_v60, %v2398_v21  ;;  %v9210_v21 = vpack.c.bf16 %v3779_v43, %v3772_v28 }
 0x209   :  { %v12574_v34 = vadd.f32 %v7967_v59, %v2506_v2  ;;  %v3786_v59 = vand.u32 4294901760, %v3785_v7  ;;  %v4658_v7 = vld [vmem:[%s13817_s2 + $0x18] sm:$0xff] }
 0x20b   :  { %v9213_v16 = vpack.c.bf16 %v3793_v39, %v3786_v59  ;;  %v4666_v39 = vld [vmem:[%s13817_s2 + $0x58] sm:$0xff] }
 0x21b   :  { %v8035_v20 = vpop.f32.mrb[16].mxu0 }
 0x21c   :  { %v8036_v44 = vpop.f32.mrb[17].mxu0 }
 0x21d   :  { %v8037_v58 = vadd.f32 %v8036_v44, %v8035_v20 }
 0x224   :  { %v8000_v4 = vpop.f32.mrb[18].mxu1 }
 0x225   :  { %v8001_v46 = vpop.f32.mrb[19].mxu1 }
 0x226   :  { %v8002_v54 = vadd.f32 %v8001_v46, %v8000_v4  ;;  %v4655_v4 = vld [vmem:[%s13817_s2] sm:$0xff] }
 0x227   :  { %v4663_v46 = vld [vmem:[%s13817_s2 + $0x40] sm:$0xff] }
 0x228   :  { %v2778_v60 = vadd.f32 %v8002_v54, %v12574_v34  ;;  %v5373_v54 = vand.u32 4294901760, %v4666_v39 }
 0x22a   :  { %v2890_v37 = vadd.f32 %v8037_v58, %v2778_v60  ;;  %v4728_v60 = vand.u32 4294901760, %v4663_v46 }
 0x23b   :  { %v8105_v2 = vpop.f32.mrb[18].mxu0 }
 0x23c   :  { %v8106_v9 = vpop.f32.mrb[19].mxu0 }
 0x23d   :  { %v8107_v5 = vadd.f32 %v8106_v9, %v8105_v2 }
 0x245   :  { %v8070_v62 = vpop.f32.mrb[20].mxu1 }
 0x246   :  { %v8071_v1 = vpop.f32.mrb[21].mxu1 }
 0x247   :  { %v8072_v42 = vadd.f32 %v8071_v1, %v8070_v62  ;;  %v4672_v62 = vld [vmem:[%s13817_s2 + $0x88] sm:$0xff] }
 0x248   :  { %v4680_v1 = vld [vmem:[%s13817_s2 + $0xc8] sm:$0xff] }
 0x249   :  { %v3122_v23 = vadd.f32 %v8072_v42, %v2890_v37  ;;  %v4665_v37 = vld [vmem:[%s13817_s2 + $0x50] sm:$0xff]  ;;  %v4674_v42 = vld [vmem:[%s13817_s2 + $0x98] sm:$0xff] }
 0x24a   :  { %v5375_v2 = vand.u32 4294901760, %v4665_v37 }
 0x24b   :  { %v3260_v34 = vadd.f32 %v8107_v5, %v3122_v23  ;;  %v4730_v23 = vand.u32 4294901760, %v4672_v62 }
 0x25b   :  { %v8175_v3 = vpop.f32.mrb[20].mxu0 }
 0x25c   :  { %v8176_v29 = vpop.f32.mrb[21].mxu0 }
 0x25d   :  { %v8177_v13 = vadd.f32 %v8176_v29, %v8175_v3  ;;  %v4679_v3 = vld [vmem:[%s13817_s2 + $0xc0] sm:$0xff] }
 0x265   :  { %v8140_v11 = vpop.f32.mrb[22].mxu1 }
 0x266   :  { %v8141_v26 = vpop.f32.mrb[23].mxu1 }
 0x267   :  { %v8142_v35 = vadd.f32 %v8141_v26, %v8140_v11  ;;  %v4736_v11 = vand.u32 4294901760, %v4679_v3  ;;  %v4673_v26 = vld [vmem:[%s13817_s2 + $0x90] sm:$0xff] }
 0x269   :  { %v3368_v30 = vadd.f32 %v8142_v35, %v3260_v34  ;;  %v4682_v34 = vld [vmem:[%s13817_s2 + $0xd8] sm:$0xff]  ;;  %v4681_v35 = vld [vmem:[%s13817_s2 + $0xd0] sm:$0xff] }
 0x26a   :  { %v5381_v29 = vand.u32 4294901760, %v4682_v34 }
 0x26b   :  { %v3536_v31 = vadd.f32 %v8177_v13, %v3368_v30 }
 0x285   :  { %v8210_v47 = vpop.f32.mrb[24].mxu1 }
 0x286   :  { %v8211_v45 = vpop.f32.mrb[25].mxu1 }
 0x287   :  { %v8212_v32 = vadd.f32 %v8211_v45, %v8210_v47  ;;  %v5383_v47 = vand.u32 4294901760, %v4681_v35 }
 0x289   :  { %v3640_v50 = vadd.f32 %v8212_v32, %v3536_v31  ;;  %v5379_v31 = vand.u32 4294901760, %v4673_v26 }
 0x28b   :  { %v3643_v15 = vmul.f32 0.0625, %v3640_v50  ;;  %v4688_v50 = vld [vmem:[%s13817_s2 + $0x108] sm:$0xff] }
 0x28d   :  { %v3654_v18 = vsel %vm3652_vm1, %v3643_v15, 0  ;;  %v4696_v15 = vld [vmem:[%s13817_s2 + $0x148] sm:$0xff] }
 0x28e   :  { %v3729_v38 = vand.u32 4294901760, %v3654_v18 }
 0x290   :  { %v3730_v53 = vsub.f32 %v3654_v18, %v3729_v38  ;;  %v4690_v18 = vld [vmem:[%s13817_s2 + $0x118] sm:$0xff] }
 0x292   :  { %v3731_v27 = vand.u32 4294901760, %v3730_v53 }
 0x294   :  { %v3732_v36 = vsub.f32 %v3730_v53, %v3731_v27 }
 0x296   :  { %v3733_v41 = vand.u32 4294901760, %v3732_v36  ;;  %v4698_v36 = vld [vmem:[%s13817_s2 + $0x158] sm:$0xff] }
 0x298   :  { %8296 = vmatmul.mubr.f32.vlgmr.msra.gmra.mrb[22].mxu0 %v3733_v41  ;;  %v5385_v41 = vand.u32 4294901760, %v4690_v18 }
 0x299   :  { %9205 = vmatpush3.bf16.msra.mxu0 %v9204_v14  ;;  %8314 = vmatprep.mubr.msk.f32.mxu0 %vm9746_vm0, %v14091_v61 }
 0x29a   :  { %9206 = vmatprep.subr.bf16.mxu0 %v9745_v12 }
 0x29d   :  { %9208 = vmatpush3.bf16.msra.mxu0 %v9207_v10 }
 0x29e   :  { %9209 = vmatprep.subr.bf16.mxu0 %v9745_v12 }
 0x2a1   :  { %9211 = vmatpush3.bf16.msra.mxu0 %v9210_v21  ;;  %v4664_v21 = vld [vmem:[%s13817_s2 + $0x48] sm:$0xff] }
 0x2a2   :  { %9212 = vmatprep.subr.bf16.mxu0 %v9745_v12  ;;  %v4726_v59 = vand.u32 4294901760, %v4664_v21 }
 0x2a5   :  { %9214 = vmatpush3.bf16.msra.mxu0 %v9213_v16  ;;  %v5369_v16 = vand.u32 4294901760, %v4658_v7 }
 0x2a6   :  { %9215 = vmatprep.subr.bf16.mxu0 %v9745_v12 }
 0x2a7   :  { %v12728_v9 = vpack.c.bf16 %v5373_v54, %v5369_v16 }
 0x2a8   :  { %8315 = vmatmul.mubr.f32.vlgmr.msra.gmra.mrb[22].mxu0 %v3729_v38 }
 0x2a9   :  { %9217 = vmatpush3.bf16.msra.mxu0 %v9216_v40  ;;  %8333 = vmatprep.mubr.msk.f32.mxu0 %vm9746_vm0, %v14091_v61  ;;  %v4724_v40 = vand.u32 4294901760, %v4655_v4  ;;  %14596 = vst [vmem:[#allocation13_spill] sm:$0xff] %v12728_v9 }
 0x2aa   :  { %9218 = vmatprep.subr.bf16.mxu0 %v9745_v12 }
 0x2ab   :  { %v12730_v5 = vpack.c.bf16 %v4728_v60, %v4724_v40 }
 0x2ad   :  { %9220 = vmatpush3.bf16.msra.mxu0 %v9219_v8  ;;  %v4657_v8 = vld [vmem:[%s13817_s2 + $0x10] sm:$0xff]  ;;  %14597 = vst [vmem:[#allocation12_spill] sm:$0xff] %v12730_v5 }
 0x2ae   :  { %9221 = vmatprep.subr.bf16.mxu0 %v9745_v12 }
 0x2b1   :  { %9223 = vmatpush3.bf16.msra.mxu0 %v9222_v51  ;;  %v12726_v51 = vpack.c.bf16 %v4726_v59, %v4722_v24 }
 0x2b2   :  { %9224 = vmatprep.subr.bf16.mxu0 %v9745_v12 }
 0x2b3   :  { %14595 = vst [vmem:[#allocation18_spill] sm:$0xff] %v12726_v51 }
 0x2b5   :  { %9226 = vmatpush3.bf16.msra.mxu0 %v9225_v17  ;;  %v5371_v17 = vand.u32 4294901760, %v4657_v8 }
 0x2b6   :  { %9227 = vmatprep.subr.bf16.mxu0 %v9745_v12 }
 0x2b8   :  { %8334 = vmatmul.mubr.f32.vlgmr.msra.gmra.mrb[22].mxu0 %v3730_v53  ;;  %v4738_v53 = vand.u32 4294901760, %v4688_v50 }
 0x2b9   :  { %9229 = vmatpush3.bf16.msra.mxu0 %v12561_v48  ;;  %8352 = vmatprep.mubr.msk.f32.mxu0 %vm9746_vm0, %v14091_v61 }
 0x2ba   :  { %9230 = vmatprep.subr.bf16.mxu0 %v9745_v12 }
 0x2bd   :  { %9232 = vmatpush3.bf16.msra.mxu0 %v12572_v6 }
 0x2be   :  { %9233 = vmatprep.subr.bf16.mxu0 %v9745_v12 }
 0x2c1   :  { %9235 = vmatpush3.bf16.msra.mxu0 %v12588_v33 }
 0x2c2   :  { %9236 = vmatprep.subr.bf16.mxu0 %v9745_v12 }
 0x2c5   :  { %9238 = vmatpush3.bf16.msra.mxu0 %v12611_v0 }
 0x2c6   :  { %9239 = vmatprep.subr.bf16.mxu0 %v9745_v12 }
 0x2c8   :  { %8353 = vmatmul.mubr.f32.vlgmr.msra.gmra.mrb[22].mxu0 %v3731_v27  ;;  %v4742_v27 = vand.u32 4294901760, %v4696_v15 }
 0x2c9   :  { %9241 = vmatpush3.bf16.msra.mxu0 %v9240_v57  ;;  %8371 = vmatprep.mubr.msk.f32.mxu0 %vm9746_vm0, %v14091_v61  ;;  %v12742_v57 = vpack.c.bf16 %v5375_v2, %v5371_v17 }
 0x2ca   :  { %9242 = vmatprep.subr.bf16.mxu0 %v9745_v12 }
 0x2cb   :  { %14598 = vst [vmem:[#allocation5_spill] sm:$0xff] %v12742_v57 }
 0x2cd   :  { %9244 = vmatpush3.bf16.msra.mxu0 %v9243_v52  ;;  %v4734_v52 = vand.u32 4294901760, %v4680_v1 }
 0x2ce   :  { %9245 = vmatprep.subr.bf16.mxu0 %v9745_v12 }
 0x2cf   :  { %v12762_v30 = vpack.c.bf16 %v4734_v52, %v4730_v23 }
 0x2d1   :  { %9247 = vmatpush3.bf16.msra.mxu0 %v9246_v63  ;;  %v5377_v63 = vand.u32 4294901760, %v4674_v42  ;;  %14599 = vst [vmem:[#allocation6_spill] sm:$0xff] %v12762_v30 }
 0x2d2   :  { %9248 = vmatprep.subr.bf16.mxu0 %v9745_v12 }
 0x2d3   :  { %v12764_v45 = vpack.c.bf16 %v5381_v29, %v5377_v63 }
 0x2d5   :  { %9250 = vmatpush3.bf16.msra.mxu0 %v9249_v55  ;;  %v4671_v55 = vld [vmem:[%s13817_s2 + $0x80] sm:$0xff]  ;;  %14600 = vst [vmem:[#allocation7_spill] sm:$0xff] %v12764_v45 }
 0x2d6   :  { %9251 = vmatprep.subr.bf16.mxu0 %v9745_v12  ;;  %v4732_v13 = vand.u32 4294901760, %v4671_v55 }
 0x2d8   :  { %8372 = vmatmul.mubr.f32.vlgmr.msra.gmra.mrb[22].mxu0 %v3729_v38  ;;  %v12766_v32 = vpack.c.bf16 %v4736_v11, %v4732_v13 }
 0x2d9   :  { %9253 = vmatpush3.bf16.msra.mxu0 %v12561_v48  ;;  %8390 = vmatprep.mubr.msk.f32.mxu0 %vm9746_vm0, %v14091_v61  ;;  %v4194_v48 = vld [vmem:[%s13819_s4] sm:$0xf] }
 0x2da   :  { %9254 = vmatprep.subr.bf16.mxu0 %v9745_v12  ;;  %v4201_v14 = vsel %vm4199_vm2, %v4194_v48, 0  ;;  %14601 = vst [vmem:[#allocation8_spill] sm:$0xff] %v12766_v32  ;;  %v4687_v48 = vld [vmem:[%s13817_s2 + $0x100] sm:$0xff] }
 0x2db   :  { %v4204_v22 = vand.u32 4294901760, %v4201_v14 }
 0x2dd   :  { %9256 = vmatpush3.bf16.msra.mxu0 %v12572_v6  ;;  %8394 = vmatpush3.msra.mxu1 %v4204_v22  ;;  %v4281_v6 = vsub.f32 %v4201_v14, %v4204_v22  ;;  %v4695_v14 = vld [vmem:[%s13817_s2 + $0x140] sm:$0xff] }
 0x2de   :  { %9257 = vmatprep.subr.bf16.mxu0 %v9745_v12  ;;  %8398 = vmatprep.subr.mxu1 %v14091_v61 }
 0x2e1   :  { %9259 = vmatpush3.bf16.msra.mxu0 %v12588_v33 }
 0x2e2   :  { %9260 = vmatprep.subr.bf16.mxu0 %v9745_v12 }
 0x2e5   :  { %9262 = vmatpush3.bf16.msra.mxu0 %v12611_v0  ;;  %v4282_v0 = vand.u32 4294901760, %v4281_v6 }
 0x2e6   :  { %9360 = vmatprep.subr.bf16.mxu0 %v12728_v9 }
 0x2e7   :  { %v4283_v19 = vsub.f32 %v4281_v6, %v4282_v0 }
 0x2e8   :  { %8391 = vmatmul.mubr.f32.vlgmr.msra.gmra.mrb[22].mxu0 %v3729_v38  ;;  %v12778_v38 = vpack.c.bf16 %v5383_v47, %v5379_v31 }
 0x2e9   :  { %5449 = vmatprep.mubr.f32.mxu0 %v14091_v61  ;;  %v4284_v43 = vand.u32 4294901760, %v4283_v19  ;;  %9362 = vmatpush1.bf16.msra.mxu0 %v12742_v57  ;;  %v12805_v19 = vsub.f32 %v4663_v46, %v4728_v60  ;;  %v12831_v46 = vsub.f32 %v4671_v55, %v4732_v13  ;;  %v12837_v60 = vsub.f32 %v4681_v35, %v5383_v47 }
 0x2ea   :  { %14602 = vst [vmem:[#allocation17_spill] sm:$0xff] %v12778_v38  ;;  %9364 = vmatprep.subr.bf16.mxu0 %v12764_v45 }
 0x2ed   :  { %9366 = vmatpush1.bf16.msra.mxu0 %v12778_v38 }
 0x3bb   :  { %v4189_v20 = vpop.f32.mrb[22].mxu0 }
 0x3bc   :  { %v4193_v33 = vmax.f32 %v4189_v20, 0.0  ;;  %v8392_v12 = vpop.f32.mrb[23].mxu0  ;;  %v4744_v20 = vand.u32 4294901760, %v4695_v14 }
 0x3bd   :  { %v12794_v12 = vsub.f32 %v4656_v49, %v4722_v24  ;;  %v12819_v24 = vsub.f32 %v4680_v1, %v4734_v52  ;;  %v12854_v1 = vsub.f32 %v4690_v18, %v5385_v41  ;;  %v4711_v52 = vld [vmem:[%s13817_s2 + $0x1c0] sm:$0xff]  ;;  %v4713_v18 = vld [vmem:[%s13817_s2 + $0x1d0] sm:$0xff] }
 0x3be   :  { %v4197_v44 = vsel %vm4195_vm3, %v4193_v33, 0  ;;  %v4689_v33 = vld [vmem:[%s13817_s2 + $0x110] sm:$0xff] }
 0x3bf   :  { %v4269_v10 = vand.u32 4294901760, %v4197_v44 }
 0x3c1   :  { %v4270_v25 = vsub.f32 %v4197_v44, %v4269_v10  ;;  %v12796_v44 = vsub.f32 %v4664_v21, %v4726_v59  ;;  %v5387_v21 = vand.u32 4294901760, %v4689_v33  ;;  %v12821_v59 = vsub.f32 %v4674_v42, %v5377_v63 }
 0x3c2   :  { %v12867_v63 = vsub.f32 %v4695_v14, %v4744_v20 }
 0x3c3   :  { %v4271_v58 = vand.u32 4294901760, %v4270_v25 }
 0x3c5   :  { %v4272_v28 = vsub.f32 %v4270_v25, %v4271_v58 }
 0x3c7   :  { %v4273_v56 = vand.u32 4294901760, %v4272_v28  ;;  %v12809_v28 = vsub.f32 %v4665_v37, %v5375_v2  ;;  %v4706_v37 = vld [vmem:[%s13817_s2 + $0x198] sm:$0xff]  ;;  %v12849_v2 = vsub.f32 %v4688_v50, %v4738_v53  ;;  %v4752_v50 = vand.u32 4294901760, %v4711_v52 }
 0x3c9   :  { %8396 = vmatmul.mubr.f32.vlgmr.msra.gmra.mrb[26].mxu1 %v4273_v56 }
 0x3ca   :  { %8399 = vmatpush3.msra.mxu1 %v4284_v43  ;;  %8400 = vmatprep.mubr.msk.f32.mxu1 %vm9746_vm0, %v14091_v61  ;;  %v12811_v43 = vpack.c.bf16 %v4742_v27, %v4738_v53 }
 0x3cb   :  { %8403 = vmatprep.subr.mxu1 %v14091_v61 }
 0x3cc   :  { %14603 = vst [vmem:[#allocation9_spill] sm:$0xff] %v12811_v43 }
 0x3d1   :  { %8401 = vmatmul.mubr.f32.vlgmr.msra.gmra.mrb[26].mxu1 %v4269_v10 }
 0x3d2   :  { %8404 = vmatpush3.msra.mxu1 %v4281_v6  ;;  %8405 = vmatprep.mubr.msk.f32.mxu1 %vm9746_vm0, %v14091_v61  ;;  %v4740_v6 = vand.u32 4294901760, %v4687_v48 }
 0x3d3   :  { %8408 = vmatprep.subr.mxu1 %v14091_v61 }
 0x3d4   :  { %v12815_v49 = vpack.c.bf16 %v4744_v20, %v4740_v6  ;;  %v12900_v20 = vsub.f32 %v4711_v52, %v4752_v50 }
 0x3d6   :  { %14605 = vst [vmem:[#allocation11_spill] sm:$0xff] %v12815_v49 }
 0x3d9   :  { %8406 = vmatmul.mubr.f32.vlgmr.msra.gmra.mrb[26].mxu1 %v4270_v25  ;;  %v12803_v25 = vsub.f32 %v4655_v4, %v4724_v40  ;;  %v4704_v4 = vld [vmem:[%s13817_s2 + $0x188] sm:$0xff]  ;;  %v12835_v40 = vsub.f32 %v4673_v26, %v5379_v31 }
 0x3da   :  { %8409 = vmatpush3.msra.mxu1 %v4204_v22  ;;  %8410 = vmatprep.mubr.msk.f32.mxu1 %vm9746_vm0, %v14091_v61 }
 0x3db   :  { %8413 = vmatprep.subr.mxu1 %v14091_v61 }
 0x3e1   :  { %8411 = vmatmul.mubr.f32.vlgmr.msra.gmra.mrb[26].mxu1 %v4271_v58  ;;  %v12807_v58 = vsub.f32 %v4657_v8, %v5371_v17  ;;  %v4712_v8 = vld [vmem:[%s13817_s2 + $0x1c8] sm:$0xff]  ;;  %v4714_v17 = vld [vmem:[%s13817_s2 + $0x1d8] sm:$0xff] }
 0x3e2   :  { %8414 = vmatpush3.msra.mxu1 %v4282_v0  ;;  %8415 = vmatprep.mubr.msk.f32.mxu1 %vm9746_vm0, %v14091_v61  ;;  %v12798_v0 = vsub.f32 %v4658_v7, %v5369_v16  ;;  %v12817_v7 = vsub.f32 %v4672_v62, %v4730_v23  ;;  %v4697_v16 = vld [vmem:[%s13817_s2 + $0x150] sm:$0xff]  ;;  %v12851_v62 = vsub.f32 %v4696_v15, %v4742_v27  ;;  %v4703_v23 = vld [vmem:[%s13817_s2 + $0x180] sm:$0xff]  ;;  %v4750_v13 = vand.u32 4294901760, %v4712_v8 }
 0x3e3   :  { %8418 = vmatprep.subr.mxu1 %v14091_v61  ;;  %v5391_v55 = vand.u32 4294901760, %v4697_v16  ;;  %v5397_v26 = vand.u32 4294901760, %v4714_v17  ;;  %v4748_v47 = vand.u32 4294901760, %v4703_v23  ;;  %v4705_v15 = vld [vmem:[%s13817_s2 + $0x190] sm:$0xff] }
 0x3e5   :  { %v12871_v35 = vpack.c.bf16 %v5391_v55, %v5387_v21  ;;  %v12873_v31 = vsub.f32 %v4697_v16, %v5391_v55  ;;  %v12892_v14 = vsub.f32 %v4714_v17, %v5397_v26  ;;  %v14097_v16 = vand.u32 4294901760, %v12794_v12 }
 0x3e6   :  { %v14096_v17 = vand.u32 4294901760, %v12803_v25 }
 0x3e7   :  { %14606 = vst [vmem:[#allocation14_spill] sm:$0xff] %v12871_v35  ;;  %v5547_v38 = vand.u32 4294901760, %v12892_v14 }
 0x3e9   :  { %8416 = vmatmul.mubr.f32.vlgmr.msra.gmra.mrb[26].mxu1 %v4269_v10  ;;  %v5548_v45 = vsub.f32 %v12892_v14, %v5547_v38 }
 0x3ea   :  { %8419 = vmatpush3.msra.mxu1 %v4204_v22  ;;  %8420 = vmatprep.mubr.msk.f32.mxu1 %vm9746_vm0, %v14091_v61  ;;  %v5389_v22 = vand.u32 4294901760, %v4698_v36 }
 0x3eb   :  { %9264 = vmatprep.subr.bf16.mxu1 %v12726_v51 }
 0x3ec   :  { %v12813_v56 = vpack.c.bf16 %v5389_v22, %v5385_v41  ;;  %v12856_v42 = vsub.f32 %v4698_v36, %v5389_v22  ;;  %v12885_v36 = vsub.f32 %v4712_v8, %v4750_v13  ;;  %v12894_v22 = vpack.c.bf16 %v4752_v50, %v4748_v47 }
 0x3ed   :  { %v14093_v8 = vand.u32 4294901760, %v12798_v0 }
 0x3ee   :  { %14604 = vst [vmem:[#allocation10_spill] sm:$0xff] %v12813_v56  ;;  %9368 = vmatprep.subr.bf16.mxu0 %v12813_v56  ;;  %14609 = vst [vmem:[#allocation20_spill] sm:$0xff] %v12894_v22 }
 0x3ef   :  { %9370 = vmatpush1.bf16.msra.mxu0 %v12871_v35 }
 0x3f1   :  { %8421 = vmatmul.mubr.f32.vlgmr.msra.gmra.mrb[26].mxu1 %v4269_v10  ;;  %v12800_v10 = vsub.f32 %v4666_v39, %v5373_v54  ;;  %v12823_v39 = vsub.f32 %v4682_v34, %v5381_v29  ;;  %v12833_v54 = vsub.f32 %v4679_v3, %v4736_v11  ;;  %v12865_v34 = vsub.f32 %v4687_v48, %v4740_v6 }
 0x3f2   :  { %4802 = vmatprep.mubr.f32.mxu1 %v14091_v61  ;;  %9266 = vmatpush1.bf16.msra.mxu1 %v12730_v5  ;;  %v12869_v3 = vsub.f32 %v4689_v33, %v5387_v21  ;;  %v4746_v29 = vand.u32 4294901760, %v4704_v4  ;;  %v5393_v11 = vand.u32 4294901760, %v4706_v37  ;;  %v12896_v6 = vsub.f32 %v4703_v23, %v4748_v47 }
 0x3f3   :  { %9268 = vmatprep.subr.bf16.mxu1 %v12762_v30  ;;  %v5395_v33 = vand.u32 4294901760, %v4705_v15  ;;  %v5399_v21 = vand.u32 4294901760, %v4713_v18  ;;  %v4823_v47 = vsub.f32 %v12803_v25, %v14096_v17 }
 0x3f4   :  { %v12881_v53 = vpack.c.bf16 %v4750_v13, %v4746_v29  ;;  %v12883_v27 = vsub.f32 %v4704_v4, %v4746_v29  ;;  %v12887_v41 = vpack.c.bf16 %v5397_v26, %v5393_v11  ;;  %v12890_v48 = vsub.f32 %v4706_v37, %v5393_v11 }
 0x3f5   :  { %v14094_v4 = vand.u32 4294901760, %v12796_v44  ;;  %v14095_v37 = vand.u32 4294901760, %v12800_v10  ;;  %v12908_v23 = vpack.c.bf16 %v5399_v21, %v5395_v33  ;;  %v12910_v55 = vsub.f32 %v4705_v15, %v5395_v33 }
 0x3f6   :  { %9270 = vmatpush1.bf16.msra.mxu1 %v12766_v32  ;;  %14607 = vst [vmem:[#allocation16_spill] sm:$0xff] %v12881_v53  ;;  %14608 = vst [vmem:[#allocation19_spill] sm:$0xff] %v12887_v41  ;;  %9372 = vmatprep.subr.bf16.mxu0 %v12887_v41  ;;  %v12912_v52 = vsub.f32 %v4713_v18, %v5399_v21  ;;  %v4817_v29 = vsub.f32 %v12794_v12, %v14097_v16  ;;  %v14104_v15 = vand.u32 4294901760, %v12805_v19 }
 0x3f7   :  { %9272 = vmatprep.subr.bf16.mxu1 %v12811_v43  ;;  %14610 = vst [vmem:[#allocation21_spill] sm:$0xff] %v12908_v23  ;;  %14611 = vst [vmem:[#allocation22_spill] sm:$0xff] %v12910_v55  ;;  %v4829_v13 = vsub.f32 %v12796_v44, %v14094_v4  ;;  %v5464_v11 = vsub.f32 %v12798_v0, %v14093_v8  ;;  %v5476_v26 = vsub.f32 %v12800_v10, %v14095_v37 }
 0x3f8   :  { %9374 = vmatpush1.bf16.msra.mxu0 %v12908_v23  ;;  %v4818_v50 = vand.u32 4294901760, %v4817_v29  ;;  %v14112_v18 = vand.u32 4294901760, %v12807_v58  ;;  %v14105_v33 = vand.u32 4294901760, %v12809_v28  ;;  %v4824_v4 = vand.u32 4294901760, %v4823_v47 }
 0x3f9   :  { %v4830_v21 = vand.u32 4294901760, %v4829_v13  ;;  %v5465_v61 = vand.u32 4294901760, %v5464_v11  ;;  %v5477_v8 = vand.u32 4294901760, %v5476_v26  ;;  %v4835_v37 = vsub.f32 %v12805_v19, %v14104_v15 }
 0x3fa   :  { %9274 = vmatpush1.bf16.msra.mxu1 %v12815_v49  ;;  %v5470_v17 = vsub.f32 %v12807_v58, %v14112_v18  ;;  %v5482_v29 = vsub.f32 %v12809_v28, %v14105_v33  ;;  %v14109_v16 = vand.u32 4294901760, %v12817_v7  ;;  %v14106_v13 = vand.u32 4294901760, %v12819_v24 }
 0x3fb   :  { %9276 = vmatprep.subr.bf16.mxu1 %v12881_v53  ;;  %v9279_v23 = vpack.c.bf16 %v4830_v21, %v4818_v50  ;;  %v14107_v11 = vand.u32 4294901760, %v12821_v59  ;;  %v4836_v26 = vand.u32 4294901760, %v4835_v37  ;;  %v14110_v37 = vand.u32 4294901760, %v12831_v46 }
 0x3fc   :  { %v5471_v47 = vand.u32 4294901760, %v5470_v17  ;;  %v5483_v41 = vand.u32 4294901760, %v5482_v29  ;;  %v4841_v15 = vsub.f32 %v12817_v7, %v14109_v16  ;;  %v4853_v33 = vsub.f32 %v12819_v24, %v14106_v13 }
 0x3fd   :  { %v12956_v17 = vpack.c.bf16 %v4836_v26, %v4824_v4  ;;  %v14119_v26 = vand.u32 4294901760, %v12849_v2  ;;  %v14128_v49 = vand.u32 4294901760, %v12867_v63  ;;  %v5541_v57 = vand.u32 4294901760, %v12910_v55 }
 0x3fe   :  { %9278 = vmatpush1.bf16.msra.mxu1 %v12894_v22  ;;  %v9375_v22 = vpack.c.bf16 %v5477_v8, %v5465_v61  ;;  %v5488_v61 = vsub.f32 %v12821_v59, %v14107_v11  ;;  %v14108_v8 = vand.u32 4294901760, %v12823_v39  ;;  %v12958_v50 = vpack.c.bf16 %v5483_v41, %v5471_v47 }
 0x3ff   :  { %9280 = vmatprep.subr.bf16.mxu1 %v9279_v23  ;;  %v4842_v21 = vand.u32 4294901760, %v4841_v15  ;;  %v14111_v23 = vand.u32 4294901760, %v12833_v54  ;;  %v4847_v11 = vsub.f32 %v12831_v46, %v14110_v37  ;;  %v14115_v41 = vand.u32 4294901760, %v12835_v40 }
 0x400   :  { %9376 = vmatprep.subr.bf16.mxu0 %v9375_v22  ;;  %v4854_v22 = vand.u32 4294901760, %v4853_v33  ;;  %v5489_v29 = vand.u32 4294901760, %v5488_v61  ;;  %v5500_v13 = vsub.f32 %v12823_v39, %v14108_v8  ;;  %v14118_v15 = vand.u32 4294901760, %v12837_v60 }
 0x401   :  { %v4859_v4 = vsub.f32 %v12833_v54, %v14111_v23  ;;  %v4848_v61 = vand.u32 4294901760, %v4847_v11  ;;  %v14120_v8 = vand.u32 4294901760, %v12851_v62  ;;  %v5494_v37 = vsub.f32 %v12835_v40, %v14115_v41 }
 0x402   :  { %v12973_v33 = vpack.c.bf16 %v4854_v22, %v4842_v21  ;;  %v5501_v47 = vand.u32 4294901760, %v5500_v13  ;;  %v5506_v23 = vsub.f32 %v12837_v60, %v14118_v15  ;;  %v4865_v18 = vsub.f32 %v12849_v2, %v14119_v26 }
 0x403   :  { %v4860_v16 = vand.u32 4294901760, %v4859_v4  ;;  %v4877_v13 = vsub.f32 %v12851_v62, %v14120_v8  ;;  %v14125_v11 = vand.u32 4294901760, %v12854_v1  ;;  %v14123_v21 = vand.u32 4294901760, %v12856_v42 }
 0x404   :  { %v12985_v53 = vpack.c.bf16 %v5501_v47, %v5489_v29  ;;  %v5495_v4 = vand.u32 4294901760, %v5494_v37  ;;  %v5507_v41 = vand.u32 4294901760, %v5506_v23  ;;  %v4866_v35 = vand.u32 4294901760, %v4865_v18 }
 0x405   :  { %v12992_v22 = vpack.c.bf16 %v4860_v16, %v4848_v61  ;;  %v4878_v15 = vand.u32 4294901760, %v4877_v13  ;;  %v5512_v26 = vsub.f32 %v12854_v1, %v14125_v11  ;;  %v5524_v29 = vsub.f32 %v12856_v42, %v14123_v21 }
 0x406   :  { %v14124_v47 = vand.u32 4294901760, %v12865_v34  ;;  %v13001_v8 = vpack.c.bf16 %v5507_v41, %v5495_v4  ;;  %v14129_v16 = vand.u32 4294901760, %v12869_v3  ;;  %v14132_v37 = vand.u32 4294901760, %v12873_v31 }
 0x407   :  { %v13006_v18 = vpack.c.bf16 %v4878_v15, %v4866_v35  ;;  %v5513_v23 = vand.u32 4294901760, %v5512_v26  ;;  %v5525_v61 = vand.u32 4294901760, %v5524_v29  ;;  %v4883_v21 = vsub.f32 %v12867_v63, %v14128_v49 }
 0x408   :  { %v4871_v13 = vsub.f32 %v12865_v34, %v14124_v47  ;;  %v5518_v41 = vsub.f32 %v12869_v3, %v14129_v16  ;;  %v5530_v4 = vsub.f32 %v12873_v31, %v14132_v37  ;;  %v14139_v35 = vand.u32 4294901760, %v12883_v27 }
 0x409   :  { %v13021_v15 = vpack.c.bf16 %v5525_v61, %v5513_v23  ;;  %v4900_v29 = vand.u32 4294901760, %v12885_v36  ;;  %v5535_v47 = vand.u32 4294901760, %v12890_v48  ;;  %v4884_v11 = vand.u32 4294901760, %v4883_v21 }
 0x40a   :  { %v4872_v26 = vand.u32 4294901760, %v4871_v13  ;;  %v5519_v56 = vand.u32 4294901760, %v5518_v41  ;;  %v5531_v49 = vand.u32 4294901760, %v5530_v4  ;;  %v4889_v16 = vsub.f32 %v12883_v27, %v14139_v35 }
 0x40b   :  { %v4901_v43 = vsub.f32 %v12885_v36, %v4900_v29  ;;  %v5536_v37 = vsub.f32 %v12890_v48, %v5535_v47  ;;  %v4894_v23 = vand.u32 4294901760, %v12896_v6  ;;  %v4906_v21 = vand.u32 4294901760, %v12900_v20 }
 0x40c   :  { %v13032_v61 = vpack.c.bf16 %v4884_v11, %v4872_v26  ;;  %v13034_v13 = vpack.c.bf16 %v5531_v49, %v5519_v56  ;;  %v4890_v32 = vand.u32 4294901760, %v4889_v16  ;;  %v5553_v5 = vand.u32 4294901760, %v12912_v52 }
 0x40d   :  { %v4902_v41 = vand.u32 4294901760, %v4901_v43  ;;  %v5537_v4 = vand.u32 4294901760, %v5536_v37  ;;  %v4895_v35 = vsub.f32 %v12896_v6, %v4894_v23  ;;  %v4907_v30 = vsub.f32 %v12900_v20, %v4906_v21 }
 0x40e   :  { %14612 = vst [vmem:[#allocation23_spill] sm:$0xff] %v13032_v61  ;;  %14613 = vst [vmem:[#allocation24_spill] sm:$0xff] %v13034_v13  ;;  %v5549_v49 = vand.u32 4294901760, %v5548_v45  ;;  %v5542_v26 = vsub.f32 %v12910_v55, %v5541_v57  ;;  %v5554_v9 = vsub.f32 %v12912_v52, %v5553_v5  ;;  %v14621_v11 = vand.u32 4294901760, %v12805_v19 }
 0x40f   :  { %v13044_v56 = vpack.c.bf16 %v4902_v41, %v4890_v32  ;;  %v4896_v16 = vand.u32 4294901760, %v4895_v35  ;;  %v4908_v37 = vand.u32 4294901760, %v4907_v30  ;;  %v14615_v32 = vand.u32 4294901760, %v12796_v44 }
 0x410   :  { %v9387_v13 = vpack.c.bf16 %v5549_v49, %v5537_v4  ;;  %v5543_v41 = vand.u32 4294901760, %v5542_v26  ;;  %v5555_v30 = vand.u32 4294901760, %v5554_v9  ;;  %v14614_v49 = vand.u32 4294901760, %v12794_v12 }
 0x411   :  { %v9293_v35 = vpack.c.bf16 %v4908_v37, %v4896_v16  ;;  %v14618_v16 = vand.u32 4294901760, %v12800_v10  ;;  %v14620_v37 = vand.u32 4294901760, %v12803_v25  ;;  %v14623_v4 = vand.u32 4294901760, %v12807_v58 }
 0x412   :  { %v9389_v61 = vpack.c.bf16 %v5555_v30, %v5543_v41  ;;  %v13082_v41 = vpack.c.bf16 %v14615_v32, %v14614_v49  ;;  %v14617_v30 = vand.u32 4294901760, %v12798_v0  ;;  %v14624_v43 = vand.u32 4294901760, %v12809_v28 }
 0x413   :  { %v13094_v26 = vpack.c.bf16 %v14621_v11, %v14620_v37  ;;  %v14626_v32 = vand.u32 4294901760, %v12817_v7  ;;  %v14627_v49 = vand.u32 4294901760, %v12819_v24  ;;  %v14632_v11 = vand.u32 4294901760, %v12831_v46 }
 0x414   :  { %14616 = vst [vmem:[#allocation25_spill] sm:$0xff] %v13082_v41  ;;  %v13088_v9 = vpack.c.bf16 %v14618_v16, %v14617_v30  ;;  %v13100_v45 = vpack.c.bf16 %v14624_v43, %v14623_v4  ;;  %v14629_v16 = vand.u32 4294901760, %v12821_v59  ;;  %v14630_v30 = vand.u32 4294901760, %v12823_v39 }
 0x415   :  { %14622 = vst [vmem:[#allocation27_spill] sm:$0xff] %v13094_v26  ;;  %v13106_v51 = vpack.c.bf16 %v14627_v49, %v14626_v32  ;;  %v14633_v37 = vand.u32 4294901760, %v12833_v54  ;;  %v14635_v43 = vand.u32 4294901760, %v12835_v40  ;;  %v14636_v4 = vand.u32 4294901760, %v12837_v60 }
 0x416   :  { %14619 = vst [vmem:[#allocation26_spill] sm:$0xff] %v13088_v9  ;;  %14625 = vst [vmem:[#allocation28_spill] sm:$0xff] %v13100_v45  ;;  %v13112_v9 = vpack.c.bf16 %v14630_v30, %v14629_v16  ;;  %v14638_v32 = vand.u32 4294901760, %v12849_v2  ;;  %v14639_v49 = vand.u32 4294901760, %v12851_v62  ;;  %v14641_v16 = vand.u32 4294901760, %v12854_v1 }
 0x417   :  { %14628 = vst [vmem:[#allocation29_spill] sm:$0xff] %v13106_v51  ;;  %v13118_v26 = vpack.c.bf16 %v14633_v37, %v14632_v11  ;;  %v13124_v45 = vpack.c.bf16 %v14636_v4, %v14635_v43  ;;  %v14642_v30 = vand.u32 4294901760, %v12856_v42  ;;  %v14644_v11 = vand.u32 4294901760, %v12865_v34 }
 0x418   :  { %14631 = vst [vmem:[#allocation30_spill] sm:$0xff] %v13112_v9  ;;  %v13130_v51 = vpack.c.bf16 %v14639_v49, %v14638_v32  ;;  %v14645_v37 = vand.u32 4294901760, %v12867_v63  ;;  %v14647_v43 = vand.u32 4294901760, %v12869_v3  ;;  %v14648_v4 = vand.u32 4294901760, %v12873_v31 }
 0x419   :  { %14634 = vst [vmem:[#allocation31_spill] sm:$0xff] %v13118_v26  ;;  %14637 = vst [vmem:[#allocation32_spill] sm:$0xff] %v13124_v45  ;;  %v13136_v9 = vpack.c.bf16 %v14642_v30, %v14641_v16  ;;  %v14649_v32 = vand.u32 4294901760, %v12883_v27  ;;  %v13156_v16 = vpack.c.bf16 %v4906_v21, %v4894_v23  ;;  %v13158_v30 = vpack.c.bf16 %v5553_v5, %v5541_v57  ;;  %v4670_v23 = vld [vmem:[%s13817_s2 + $0x78] sm:$0xff] }
 0x41a   :  { %14640 = vst [vmem:[#allocation33_spill] sm:$0xff] %v13130_v51  ;;  %v13142_v26 = vpack.c.bf16 %v14645_v37, %v14644_v11  ;;  %v13148_v45 = vpack.c.bf16 %v14648_v4, %v14647_v43  ;;  %v13154_v51 = vpack.c.bf16 %v5547_v38, %v5535_v47  ;;  %v14654_v47 = vld [vmem:[#allocation23_spill] sm:$0xff] }
 0x41b   :  { %14643 = vst [vmem:[#allocation34_spill] sm:$0xff] %v13136_v9  ;;  %v13152_v49 = vpack.c.bf16 %v4900_v29, %v14649_v32 }
 0x41c   :  { %14646 = vst [vmem:[#allocation35_spill] sm:$0xff] %v13142_v26  ;;  %v14691_v21 = vld [vmem:[#allocation27_spill] sm:$0xff] }
 0x4c4   :  { %v4645_v9 = vpop.f32.mrb[26].mxu1 }
 0x4c5   :  { %v7372_v41 = vmul.f32 -1.442695, %v4645_v9  ;;  %v8422_v11 = vpop.f32.mrb[27].mxu1 }
 0x4c6   :  { %v6667_v11 = vand.u32 4294901760, %v4670_v23 }
 0x4c7   :  { %9714 = vpow2.f32 %v7372_v41  ;;  %v14694_v41 = vld [vmem:[#allocation30_spill] sm:$0xff] }
 0x4d1   :  { %v9715_v37 = vpop.eup %9714 }
 0x4d2   :  { %v4652_v26 = vadd.f32 1.0, %v9715_v37 }
 0x4d4   :  { %9716 = vrcp.f32 %v4652_v26  ;;  %v14693_v26 = vld [vmem:[#allocation29_spill] sm:$0xff] }
 0x4de   :  { %v9717_v55 = vpop.eup %9716 }
 0x4df   :  { %v4720_v43 = vsel %vm3652_vm1, %v9717_v55, 0  ;;  %v14653_v55 = vmov 0.0  }
 0x4e0   :  { %v13161_v4 = vand.u32 4294901760, %v4720_v43 }
 0x4e2   :  { %v13164_v29 = vsub.f32 %v4720_v43, %v13161_v4 }
 0x4e4   :  { %14650 = vst [vmem:[#allocation36_spill] sm:$0xff] %v13164_v29  ;;  %v13167_v38 = vand.u32 4294901760, %v13164_v29 }
 0x4e6   :  { %14651 = vst [vmem:[#allocation37_spill] sm:$0xff] %v13167_v38  ;;  %v4806_v5 = vsub.f32 %v13164_v29, %v13167_v38 }
 0x4e8   :  { %v13171_v57 = vand.u32 4294901760, %v4806_v5  ;;  %v4661_v5 = vld [vmem:[%s13817_s2 + $0x30] sm:$0xff] }
 0x4ea   :  { %14652 = vst [vmem:[#allocation38_spill] sm:$0xff] %v13171_v57  ;;  %4808 = vmatmul.mubr.f32.vlgmr.msra.gmra.mrb[28].mxu1 %v13171_v57  ;;  %5455 = vmatmul.mubr.f32.vlgmr.msra.gmra.mrb[24].mxu0 %v13171_v57 }
 0x4eb   :  { %9282 = vmatpush1.bf16.msra.mxu1 %v12956_v17  ;;  %9378 = vmatpush1.bf16.msra.mxu0 %v12958_v50  ;;  %v14655_v17 = vld [vmem:[#allocation24_spill] sm:$0xff]  ;;  %v14658_v50 = vpack.c.bf16 %v12805_v19, %v12803_v25  ;;  %v14664_v25 = vpack.c.bf16 %v12851_v62, %v12849_v2  ;;  %v14665_v19 = vpack.c.bf16 %v12856_v42, %v12854_v1  ;;  %v14676_v2 = vld [vmem:[#allocation5_spill] sm:$0xff]  ;;  %v14677_v62 = vld [vmem:[#allocation6_spill] sm:$0xff] }
 0x4ec   :  { %9284 = vmatprep.subr.bf16.mxu1 %v12973_v33  ;;  %9380 = vmatprep.subr.bf16.mxu0 %v12985_v53  ;;  %v14656_v53 = vpack.c.bf16 %v12796_v44, %v12794_v12  ;;  %v14659_v33 = vpack.c.bf16 %v12809_v28, %v12807_v58  ;;  %v14660_v12 = vpack.c.bf16 %v12819_v24, %v12817_v7  ;;  %v14678_v1 = vld [vmem:[#allocation7_spill] sm:$0xff]  ;;  %v14679_v42 = vld [vmem:[#allocation8_spill] sm:$0xff] }
 0x4ed   :  { %4958 = vmatprep.mubr.f32.mxu1 %v14653_v55  ;;  %5605 = vmatprep.mubr.f32.mxu0 %v14653_v55  ;;  %v14661_v44 = vpack.c.bf16 %v12823_v39, %v12821_v59  ;;  %v14666_v58 = vpack.c.bf16 %v12867_v63, %v12865_v34  ;;  %v14667_v28 = vpack.c.bf16 %v12873_v31, %v12869_v3  ;;  %v14671_v39 = vld [vmem:[#allocation22_spill] sm:$0xff]  ;;  %v14680_v34 = vld [vmem:[#allocation17_spill] sm:$0xff]  ;;  %v14683_v31 = vld [vmem:[#allocation11_spill] sm:$0xff] }
 0x4ee   :  { %v14668_v7 = vpack.c.bf16 %v12885_v36, %v12883_v27  ;;  %v14669_v24 = vpack.c.bf16 %v12892_v14, %v12890_v48  ;;  %v14670_v59 = vpack.c.bf16 %v12900_v20, %v12896_v6  ;;  %v14681_v63 = vld [vmem:[#allocation9_spill] sm:$0xff]  ;;  %v14682_v3 = vld [vmem:[#allocation10_spill] sm:$0xff]  ;;  %v14685_v36 = vld [vmem:[#allocation16_spill] sm:$0xff] }
 0x4ef   :  { %9286 = vmatpush1.bf16.msra.mxu1 %v12992_v22  ;;  %9382 = vmatpush1.bf16.msra.mxu0 %v13001_v8  ;;  %v14657_v8 = vpack.c.bf16 %v12800_v10, %v12798_v0  ;;  %v14662_v0 = vpack.c.bf16 %v12833_v54, %v12831_v46  ;;  %v14663_v10 = vpack.c.bf16 %v12837_v60, %v12835_v40  ;;  %v14673_v54 = vld [vmem:[#allocation18_spill] sm:$0xff]  ;;  %v14674_v40 = vld [vmem:[#allocation13_spill] sm:$0xff]  ;;  %v14675_v60 = vld [vmem:[#allocation12_spill] sm:$0xff] }
 0x4f0   :  { %9288 = vmatprep.subr.bf16.mxu1 %v13006_v18  ;;  %9384 = vmatprep.subr.bf16.mxu0 %v13021_v15  ;;  %v14672_v46 = vpack.c.bf16 %v12912_v52, %v14671_v39  ;;  %v14684_v27 = vld [vmem:[#allocation14_spill] sm:$0xff]  ;;  %v14686_v48 = vld [vmem:[#allocation19_spill] sm:$0xff]  ;;  %v14687_v14 = vld [vmem:[#allocation20_spill] sm:$0xff] }
 0x4f1   :  { %v14688_v6 = vld [vmem:[#allocation21_spill] sm:$0xff]  ;;  %v14690_v52 = vld [vmem:[#allocation26_spill] sm:$0xff]  ;;  %v4660_v22 = vld [vmem:[%s13817_s2 + $0x28] sm:$0xff] }
 0x4f2   :  { %v14689_v20 = vld [vmem:[#allocation25_spill] sm:$0xff]  ;;  %v4668_v18 = vld [vmem:[%s13817_s2 + $0x68] sm:$0xff]  ;;  %v4662_v15 = vld [vmem:[%s13817_s2 + $0x38] sm:$0xff] }
 0x4f3   :  { %9290 = vmatpush1.bf16.msra.mxu1 %v14654_v47  ;;  %9386 = vmatpush1.bf16.msra.mxu0 %v14655_v17  ;;  %v6020_v9 = vand.u32 4294901760, %v4668_v18  ;;  %v6663_v32 = vand.u32 4294901760, %v4662_v15  ;;  %v4669_v47 = vld [vmem:[%s13817_s2 + $0x70] sm:$0xff]  ;;  %v4676_v17 = vld [vmem:[%s13817_s2 + $0xa8] sm:$0xff] }
 0x4f4   :  { %9292 = vmatprep.subr.bf16.mxu1 %v13044_v56  ;;  %9388 = vmatprep.subr.bf16.mxu0 %v9387_v13  ;;  %v4667_v13 = vld [vmem:[%s13817_s2 + $0x60] sm:$0xff]  ;;  %v14692_v56 = vld [vmem:[#allocation28_spill] sm:$0xff] }
 0x4f5   :  { %v6022_v43 = vand.u32 4294901760, %v4667_v13  ;;  %v13324_v39 = vsub.f32 %v4668_v18, %v6020_v9 }
 0x4f7   :  { %9294 = vmatpush1.bf16.msra.mxu1 %v9293_v35  ;;  %9390 = vmatpush1.bf16.msra.mxu0 %v9389_v61  ;;  %v4659_v61 = vld [vmem:[%s13817_s2 + $0x20] sm:$0xff]  ;;  %v6016_v35 = vand.u32 4294901760, %v4660_v22 }
 0x4f8   :  { %9296 = vmatprep.subr.bf16.mxu1 %v14656_v53  ;;  %9392 = vmatprep.subr.bf16.mxu0 %v14657_v8  ;;  %v6018_v37 = vand.u32 4294901760, %v4659_v61  ;;  %v4684_v53 = vld [vmem:[%s13817_s2 + $0xe8] sm:$0xff]  ;;  %v14695_v8 = vld [vmem:[#allocation31_spill] sm:$0xff] }
 0x4fa   :  { %4960 = vmatmul.mubr.f32.vlgmr.msra.gmra.mrb[28].mxu1 %v13161_v4  ;;  %5607 = vmatmul.mubr.f32.vlgmr.msra.gmra.mrb[24].mxu0 %v13161_v4  ;;  %v13338_v18 = vsub.f32 %v4659_v61, %v6018_v37 }
 0x4fb   :  { %9298 = vmatpush1.bf16.msra.mxu1 %v14658_v50  ;;  %9394 = vmatpush1.bf16.msra.mxu0 %v14659_v33  ;;  %v14696_v50 = vld [vmem:[#allocation32_spill] sm:$0xff]  ;;  %v13302_v33 = vpack.c.bf16 %v6020_v9, %v6016_v35 }
 0x4fc   :  { %9300 = vmatprep.subr.bf16.mxu1 %v14660_v12  ;;  %9396 = vmatprep.subr.bf16.mxu0 %v14661_v44  ;;  %v4678_v12 = vld [vmem:[%s13817_s2 + $0xb8] sm:$0xff] }
 0x4fd   :  { %5062 = vmatprep.mubr.f32.mxu1 %v14653_v55  ;;  %5709 = vmatprep.mubr.f32.mxu0 %v14653_v55  ;;  %14697 = vst [vmem:[#allocation23_spill] sm:$0xff] %v13302_v33  ;;  %v4686_v44 = vld [vmem:[%s13817_s2 + $0xf8] sm:$0xff] }
 0x4ff   :  { %9302 = vmatpush1.bf16.msra.mxu1 %v14662_v0  ;;  %9398 = vmatpush1.bf16.msra.mxu0 %v14663_v10  ;;  %v14698_v0 = vld [vmem:[#allocation33_spill] sm:$0xff]  ;;  %v14699_v10 = vld [vmem:[#allocation34_spill] sm:$0xff] }
 0x500   :  { %9304 = vmatprep.subr.bf16.mxu1 %v14664_v25  ;;  %9400 = vmatprep.subr.bf16.mxu0 %v14665_v19  ;;  %v13312_v25 = vpack.c.bf16 %v6667_v11, %v6663_v32  ;;  %v13314_v19 = vpack.c.bf16 %v6022_v43, %v6018_v37  ;;  %v4702_v37 = vld [vmem:[%s13817_s2 + $0x178] sm:$0xff] }
 0x502   :  { %14700 = vst [vmem:[#allocation24_spill] sm:$0xff] %v13312_v25  ;;  %14701 = vst [vmem:[#allocation22_spill] sm:$0xff] %v13314_v19 }
 0x503   :  { %9306 = vmatpush1.bf16.msra.mxu1 %v14666_v58  ;;  %9402 = vmatpush1.bf16.msra.mxu0 %v14667_v28  ;;  %v6665_v58 = vand.u32 4294901760, %v4661_v5  ;;  %v6669_v28 = vand.u32 4294901760, %v4669_v47 }
 0x504   :  { %9308 = vmatprep.subr.bf16.mxu1 %v14668_v7  ;;  %9404 = vmatprep.subr.bf16.mxu0 %v14669_v24  ;;  %v4675_v7 = vld [vmem:[%s13817_s2 + $0xa0] sm:$0xff] }
 0x505   :  { %v4683_v24 = vld [vmem:[%s13817_s2 + $0xe0] sm:$0xff]  ;;  %v6026_v9 = vand.u32 4294901760, %v4675_v7  ;;  %v13354_v61 = vsub.f32 %v4669_v47, %v6669_v28 }
 0x507   :  { %9310 = vmatpush1.bf16.msra.mxu1 %v14670_v59  ;;  %9406 = vmatpush1.bf16.msra.mxu0 %v14672_v46  ;;  %v13322_v59 = vsub.f32 %v4660_v22, %v6016_v35  ;;  %v6024_v46 = vand.u32 4294901760, %v4676_v17  ;;  %v14702_v22 = vld [vmem:[#allocation35_spill] sm:$0xff]  ;;  %v13340_v35 = vsub.f32 %v4667_v13, %v6022_v43 }
 0x508   :  { %9312 = vmatprep.subr.bf16.mxu1 %v14673_v54  ;;  %9408 = vmatprep.subr.bf16.mxu0 %v14674_v40 }
 0x50a   :  { %5065 = vmatmul.mubr.f32.vlgmr.msra.gmra.mrb[28].mxu1 %v13164_v29  ;;  %5712 = vmatmul.mubr.f32.vlgmr.msra.gmra.mrb[24].mxu0 %v13164_v29 }
 0x50b   :  { %9314 = vmatpush1.bf16.msra.mxu1 %v14675_v60  ;;  %9410 = vmatpush1.bf16.msra.mxu0 %v14676_v2 }
 0x50c   :  { %9316 = vmatprep.subr.bf16.mxu1 %v14677_v62  ;;  %9412 = vmatprep.subr.bf16.mxu0 %v14678_v1 }
 0x50d   :  { %5151 = vmatprep.mubr.f32.mxu1 %v14653_v55  ;;  %5798 = vmatprep.mubr.f32.mxu0 %v14653_v55 }
 0x50f   :  { %9318 = vmatpush1.bf16.msra.mxu1 %v14679_v42  ;;  %9414 = vmatpush1.bf16.msra.mxu0 %v14680_v34 }
 0x510   :  { %9320 = vmatprep.subr.bf16.mxu1 %v14681_v63  ;;  %9416 = vmatprep.subr.bf16.mxu0 %v14682_v3 }
 0x513   :  { %9322 = vmatpush1.bf16.msra.mxu1 %v14683_v31  ;;  %9418 = vmatpush1.bf16.msra.mxu0 %v14684_v27 }
 0x514   :  { %9324 = vmatprep.subr.bf16.mxu1 %v14685_v36  ;;  %9420 = vmatprep.subr.bf16.mxu0 %v14686_v48 }
 0x517   :  { %9326 = vmatpush1.bf16.msra.mxu1 %v14687_v14  ;;  %9422 = vmatpush1.bf16.msra.mxu0 %v14688_v6 }
 0x518   :  { %9328 = vmatprep.subr.bf16.mxu1 %v14689_v20  ;;  %9424 = vmatprep.subr.bf16.mxu0 %v14690_v52  ;;  %v6028_v20 = vand.u32 4294901760, %v4684_v53  ;;  %v4677_v52 = vld [vmem:[%s13817_s2 + $0xb0] sm:$0xff] }
 0x519   :  { %v6673_v13 = vand.u32 4294901760, %v4677_v52 }
 0x51a   :  { %5155 = vmatmul.mubr.f32.vlgmr.msra.gmra.mrb[28].mxu1 %v13167_v38  ;;  %5802 = vmatmul.mubr.f32.vlgmr.msra.gmra.mrb[24].mxu0 %v13167_v38  ;;  %v13362_v43 = vpack.c.bf16 %v6028_v20, %v6024_v46  ;;  %v4716_v38 = vld [vmem:[%s13817_s2 + $0x1e8] sm:$0xff] }
 0x51b   :  { %9330 = vmatpush1.bf16.msra.mxu1 %v14691_v21  ;;  %9426 = vmatpush1.bf16.msra.mxu0 %v14692_v56  ;;  %v13329_v21 = vsub.f32 %v4662_v15, %v6663_v32  ;;  %v13331_v56 = vsub.f32 %v4670_v23, %v6667_v11  ;;  %v4692_v15 = vld [vmem:[%s13817_s2 + $0x128] sm:$0xff]  ;;  %v13350_v32 = vpack.c.bf16 %v6669_v28, %v6665_v58  ;;  %v4694_v11 = vld [vmem:[%s13817_s2 + $0x138] sm:$0xff]  ;;  %v4691_v28 = vld [vmem:[%s13817_s2 + $0x120] sm:$0xff] }
 0x51c   :  { %9332 = vmatprep.subr.bf16.mxu1 %v14693_v26  ;;  %9428 = vmatprep.subr.bf16.mxu0 %v14694_v41  ;;  %v6671_v26 = vand.u32 4294901760, %v4678_v12  ;;  %v6675_v41 = vand.u32 4294901760, %v4686_v44  ;;  %v4700_v23 = vld [vmem:[%s13817_s2 + $0x168] sm:$0xff]  ;;  %14704 = vst [vmem:[#allocation13_spill] sm:$0xff] %v13362_v43 }
 0x51d   :  { %5273 = vmatprep.mubr.f32.mxu1 %v14653_v55  ;;  %5920 = vmatprep.mubr.f32.mxu0 %v14653_v55  ;;  %14703 = vst [vmem:[#allocation18_spill] sm:$0xff] %v13350_v32 }
 0x51e   :  { %v13370_v47 = vsub.f32 %v4678_v12, %v6671_v26  ;;  %v6679_v12 = vand.u32 4294901760, %v4694_v11 }
 0x51f   :  { %9334 = vmatpush1.bf16.msra.mxu1 %v14695_v8  ;;  %9430 = vmatpush1.bf16.msra.mxu0 %v14696_v50  ;;  %v4685_v8 = vld [vmem:[%s13817_s2 + $0xf0] sm:$0xff]  ;;  %v6030_v50 = vand.u32 4294901760, %v4683_v24 }
 0x520   :  { %9336 = vmatprep.subr.bf16.mxu1 %v14698_v0  ;;  %9432 = vmatprep.subr.bf16.mxu0 %v14699_v10  ;;  %v6677_v0 = vand.u32 4294901760, %v4685_v8  ;;  %v6032_v10 = vand.u32 4294901760, %v4692_v15 }
 0x522   :  { %v13404_v29 = vpack.c.bf16 %v6677_v0, %v6673_v13  ;;  %v13406_v57 = vsub.f32 %v4685_v8, %v6677_v0 }
 0x523   :  { %9338 = vmatpush1.bf16.msra.mxu1 %v14702_v22  ;;  %9434 = vmatpush1.bf16.msra.mxu0 %v13148_v45  ;;  %v13352_v45 = vsub.f32 %v4661_v5, %v6665_v58  ;;  %v13368_v5 = vpack.c.bf16 %v6675_v41, %v6671_v26  ;;  %v6036_v58 = vand.u32 4294901760, %v4700_v23  ;;  %v4699_v22 = vld [vmem:[%s13817_s2 + $0x160] sm:$0xff]  ;;  %v4701_v26 = vld [vmem:[%s13817_s2 + $0x170] sm:$0xff] }
 0x524   :  { %9340 = vmatprep.subr.bf16.mxu1 %v13152_v49  ;;  %9436 = vmatprep.subr.bf16.mxu0 %v13154_v51  ;;  %v13364_v49 = vsub.f32 %v4676_v17, %v6024_v46  ;;  %v13366_v51 = vsub.f32 %v4684_v53, %v6028_v20  ;;  %v13380_v17 = vsub.f32 %v4686_v44, %v6675_v41  ;;  %v6683_v46 = vand.u32 4294901760, %v4702_v37  ;;  %v4693_v20 = vld [vmem:[%s13817_s2 + $0x130] sm:$0xff]  ;;  %v4708_v41 = vld [vmem:[%s13817_s2 + $0x1a8] sm:$0xff] }
 0x525   :  { %14705 = vst [vmem:[#allocation12_spill] sm:$0xff] %v13368_v5  ;;  %v13382_v53 = vpack.c.bf16 %v6030_v50, %v6026_v9  ;;  %v13396_v44 = vsub.f32 %v4677_v52, %v6673_v13  ;;  %14708 = vst [vmem:[#allocation7_spill] sm:$0xff] %v13404_v29  ;;  %v13416_v52 = vpack.c.bf16 %v6036_v58, %v6032_v10  ;;  %v6681_v8 = vand.u32 4294901760, %v4693_v20  ;;  %v4707_v5 = vld [vmem:[%s13817_s2 + $0x1a0] sm:$0xff] }
 0x526   :  { %v13422_v13 = vsub.f32 %v4700_v23, %v6036_v58  ;;  %v13424_v0 = vpack.c.bf16 %v6683_v46, %v6679_v12  ;;  %v6040_v29 = vand.u32 4294901760, %v4708_v41  ;;  %v4715_v23 = vld [vmem:[%s13817_s2 + $0x1e0] sm:$0xff] }
 0x527   :  { %9342 = vmatpush1.bf16.msra.mxu1 %v13156_v16  ;;  %9438 = vmatpush1.bf16.msra.mxu0 %v13158_v30  ;;  %14706 = vst [vmem:[#allocation5_spill] sm:$0xff] %v13382_v53  ;;  %v13392_v16 = vsub.f32 %v4675_v7, %v6026_v9  ;;  %v13394_v30 = vsub.f32 %v4683_v24, %v6030_v50  ;;  %v4710_v7 = vld [vmem:[%s13817_s2 + $0x1b8] sm:$0xff]  ;;  %14709 = vst [vmem:[#allocation8_spill] sm:$0xff] %v13416_v52  ;;  %v6685_v50 = vand.u32 4294901760, %v4701_v26 }
 0x528   :  { %9344 = vmatprep.subr.bf16.mxu1 %v14673_v54  ;;  %9440 = vmatprep.subr.bf16.mxu0 %v14674_v40  ;;  %v6034_v54 = vand.u32 4294901760, %v4691_v28  ;;  %v6038_v40 = vand.u32 4294901760, %v4699_v22  ;;  %v4718_v24 = vld [vmem:[%s13817_s2 + $0x1f8] sm:$0xff]  ;;  %v13418_v9 = vsub.f32 %v4692_v15, %v6032_v10  ;;  %14711 = vst [vmem:[#allocation9_spill] sm:$0xff] %v13424_v0  ;;  %v6044_v53 = vand.u32 4294901760, %v4716_v38 }
 0x529   :  { %14707 = vst [vmem:[#allocation6_spill] sm:$0xff] %v13394_v30  ;;  %v13431_v15 = vsub.f32 %v4694_v11, %v6679_v12  ;;  %v13433_v10 = vsub.f32 %v4702_v37, %v6683_v46  ;;  %v4717_v11 = vld [vmem:[%s13817_s2 + $0x1f0] sm:$0xff]  ;;  %v13452_v37 = vpack.c.bf16 %v6685_v50, %v6681_v8  ;;  %v13454_v12 = vsub.f32 %v4693_v20, %v6681_v8 }
 0x52a   :  { %5275 = vmatmul.mubr.f32.vlgmr.msra.gmra.mrb[28].mxu1 %v13161_v4  ;;  %5922 = vmatmul.mubr.f32.vlgmr.msra.gmra.mrb[24].mxu0 %v13161_v4  ;;  %14710 = vst [vmem:[#allocation17_spill] sm:$0xff] %v13418_v9  ;;  %v13440_v58 = vpack.c.bf16 %v6038_v40, %v6034_v54  ;;  %v13442_v0 = vsub.f32 %v4691_v28, %v6034_v54  ;;  %v6042_v52 = vand.u32 4294901760, %v4707_v5  ;;  %v6046_v54 = vand.u32 4294901760, %v4715_v23 }
 0x52b   :  { %9346 = vmatpush1.bf16.msra.mxu1 %v14675_v60  ;;  %9442 = vmatpush1.bf16.msra.mxu0 %v14676_v2  ;;  %v6687_v60 = vand.u32 4294901760, %v4710_v7  ;;  %v6691_v2 = vand.u32 4294901760, %v4718_v24  ;;  %14713 = vst [vmem:[#allocation11_spill] sm:$0xff] %v13452_v37  ;;  %v13456_v46 = vsub.f32 %v4701_v26, %v6685_v50  ;;  %v13460_v28 = vpack.c.bf16 %v6044_v53, %v6040_v29 }
 0x52c   :  { %9348 = vmatprep.subr.bf16.mxu1 %v14677_v62  ;;  %9444 = vmatprep.subr.bf16.mxu0 %v14678_v1  ;;  %14712 = vst [vmem:[#allocation10_spill] sm:$0xff] %v13440_v58  ;;  %v13444_v62 = vsub.f32 %v4699_v22, %v6038_v40  ;;  %v4709_v1 = vld [vmem:[%s13817_s2 + $0x1b0] sm:$0xff]  ;;  %v13462_v22 = vsub.f32 %v4708_v41, %v6040_v29  ;;  %v6693_v50 = vand.u32 4294901760, %v4717_v11  ;;  %v14717_v29 = vand.u32 4294901760, %v13322_v59 }
 0x52d   :  { %5361 = vmatprep.mubr.f32.mxu1 %v14653_v55  ;;  %6008 = vmatprep.mubr.f32.mxu0 %v14653_v55  ;;  %14714 = vst [vmem:[#allocation14_spill] sm:$0xff] %v13460_v28  ;;  %v13467_v20 = vsub.f32 %v4716_v38, %v6044_v53  ;;  %v13469_v26 = vpack.c.bf16 %v6691_v2, %v6687_v60  ;;  %v6689_v8 = vand.u32 4294901760, %v4709_v1  ;;  %v14166_v38 = vand.u32 4294901760, %v13352_v45 }
 0x52e   :  { %v13475_v28 = vsub.f32 %v4710_v7, %v6687_v60  ;;  %v13477_v40 = vsub.f32 %v4718_v24, %v6691_v2  ;;  %v13485_v53 = vsub.f32 %v4707_v5, %v6042_v52  ;;  %v6111_v41 = vsub.f32 %v13322_v59, %v14717_v29 }
 0x52f   :  { %9350 = vmatpush1.bf16.msra.mxu1 %v14679_v42  ;;  %9446 = vmatpush1.bf16.msra.mxu0 %v14680_v34  ;;  %14715 = vst [vmem:[#allocation16_spill] sm:$0xff] %v13469_v26  ;;  %v14163_v42 = vand.u32 4294901760, %v13324_v39  ;;  %v14164_v34 = vand.u32 4294901760, %v13329_v21  ;;  %v14167_v7 = vand.u32 4294901760, %v13354_v61  ;;  %v13493_v24 = vsub.f32 %v4715_v23, %v6046_v54 }
 0x530   :  { %9352 = vmatprep.subr.bf16.mxu1 %v14681_v63  ;;  %9448 = vmatprep.subr.bf16.mxu0 %v14682_v3  ;;  %v14165_v63 = vand.u32 4294901760, %v13340_v35  ;;  %v13483_v3 = vpack.c.bf16 %v6046_v54, %v6042_v52  ;;  %v13495_v60 = vpack.c.bf16 %v6693_v50, %v6689_v8  ;;  %v14720_v2 = vand.u32 4294901760, %v13338_v18 }
 0x531   :  { %v6123_v5 = vsub.f32 %v13324_v39, %v14163_v42  ;;  %v6758_v52 = vsub.f32 %v13329_v21, %v14164_v34  ;;  %v6764_v29 = vsub.f32 %v13352_v45, %v14166_v38 }
 0x532   :  { %14716 = vst [vmem:[#allocation19_spill] sm:$0xff] %v13483_v3  ;;  %14718 = vst [vmem:[#allocation20_spill] sm:$0xff] %v13495_v60  ;;  %v6117_v23 = vsub.f32 %v13338_v18, %v14720_v2  ;;  %v6129_v54 = vsub.f32 %v13340_v35, %v14165_v63  ;;  %v6112_v2 = vand.u32 4294901760, %v6111_v41  ;;  %v6776_v63 = vsub.f32 %v13354_v61, %v14167_v7 }
 0x533   :  { %9354 = vmatpush1.bf16.msra.mxu1 %v14683_v31  ;;  %9450 = vmatpush1.bf16.msra.mxu0 %v14684_v27  ;;  %v14168_v31 = vand.u32 4294901760, %v13364_v49  ;;  %v13523_v27 = vsub.f32 %v4717_v11, %v6693_v50  ;;  %v6759_v50 = vand.u32 4294901760, %v6758_v52  ;;  %v6765_v42 = vand.u32 4294901760, %v6764_v29 }
 0x534   :  { %9356 = vmatprep.subr.bf16.mxu1 %v14685_v36  ;;  %9452 = vmatprep.subr.bf16.mxu0 %v14686_v48  ;;  %v14719_v36 = vand.u32 4294901760, %v13331_v56  ;;  %v6118_v7 = vand.u32 4294901760, %v6117_v23  ;;  %v6130_v34 = vand.u32 4294901760, %v6129_v54  ;;  %v14724_v54 = vld [vmem:[#allocation12_spill] sm:$0xff]  ;;  %v14725_v11 = vand.u32 4294901760, %v13392_v16 }
 0x535   :  { %v6135_v38 = vsub.f32 %v13364_v49, %v14168_v31  ;;  %v14722_v31 = vand.u32 4294901760, %v13370_v47  ;;  %v14183_v23 = vand.u32 4294901760, %v13422_v13  ;;  %v14731_v52 = vand.u32 4294901760, %v13418_v9 }
 0x536   :  { %v6770_v48 = vsub.f32 %v13331_v56, %v14719_v36  ;;  %v13521_v36 = vsub.f32 %v4709_v1, %v6689_v8  ;;  %v6124_v8 = vand.u32 4294901760, %v6123_v5  ;;  %v6777_v5 = vand.u32 4294901760, %v6776_v63 }
 0x537   :  { %9358 = vmatpush1.bf16.msra.mxu1 %v14687_v14  ;;  %9454 = vmatpush1.bf16.msra.mxu0 %v14688_v6  ;;  %v14721_v14 = vand.u32 4294901760, %v13366_v51 }
 0x538   :  { %9456 = vmatprep.subr.bf16.mxu1 %v13302_v33  ;;  %9552 = vmatprep.subr.bf16.mxu0 %v13312_v25  ;;  %v6771_v41 = vand.u32 4294901760, %v6770_v48  ;;  %v6782_v25 = vsub.f32 %v13370_v47, %v14722_v31  ;;  %v6136_v31 = vand.u32 4294901760, %v6135_v38  ;;  %v9471_v48 = vpack.c.bf16 %v6124_v8, %v6112_v2  ;;  %v14728_v33 = vld [vmem:[#allocation7_spill] sm:$0xff] }
 0x539   :  { %v6147_v6 = vsub.f32 %v13366_v51, %v14721_v14  ;;  %v14723_v14 = vand.u32 4294901760, %v13380_v17  ;;  %v14730_v2 = vand.u32 4294901760, %v13406_v57 }
 0x53a   :  { %5363 = vmatmul.mubr.f32.vlgmr.msra.gmra.mrb[28].mxu1 %v13161_v4  ;;  %6010 = vmatmul.mubr.f32.vlgmr.msra.gmra.mrb[24].mxu0 %v13161_v4 }
 0x53b   :  { %v6794_v1 = vsub.f32 %v13380_v17, %v14723_v14  ;;  %9458 = vmatpush1.bf16.msra.mxu1 %v13314_v19  ;;  %9554 = vmatpush1.bf16.msra.mxu0 %v13350_v32  ;;  %v6148_v29 = vand.u32 4294901760, %v6147_v6  ;;  %v6141_v14 = vsub.f32 %v13392_v16, %v14725_v11  ;;  %v14726_v19 = vand.u32 4294901760, %v13394_v30  ;;  %v14727_v32 = vld [vmem:[#allocation5_spill] sm:$0xff] }
 0x53c   :  { %9460 = vmatprep.subr.bf16.mxu1 %v13362_v43  ;;  %9556 = vmatprep.subr.bf16.mxu0 %v14724_v54  ;;  %v9567_v6 = vpack.c.bf16 %v6771_v41, %v6759_v50  ;;  %v13564_v54 = vpack.c.bf16 %v6130_v34, %v6118_v7  ;;  %v6783_v43 = vand.u32 4294901760, %v6782_v25  ;;  %v6800_v8 = vsub.f32 %v13406_v57, %v14730_v2  ;;  %v14732_v34 = vld [vmem:[#allocation8_spill] sm:$0xff]  ;;  %v14733_v25 = vld [vmem:[#allocation9_spill] sm:$0xff] }
 0x53d   :  { %v6153_v63 = vsub.f32 %v13394_v30, %v14726_v19  ;;  %6096 = vmatprep.mubr.f32.mxu1 %v14653_v55  ;;  %6743 = vmatprep.mubr.f32.mxu0 %v14653_v55  ;;  %v6795_v11 = vand.u32 4294901760, %v6794_v1  ;;  %v14729_v19 = vand.u32 4294901760, %v13396_v44  ;;  %v6159_v50 = vsub.f32 %v13418_v9, %v14731_v52 }
 0x53e   :  { %v9569_v7 = vpack.c.bf16 %v6777_v5, %v6765_v42  ;;  %v9475_v1 = vpack.c.bf16 %v6148_v29, %v6136_v31  ;;  %v6142_v41 = vand.u32 4294901760, %v6141_v14  ;;  %v6801_v14 = vand.u32 4294901760, %v6800_v8 }
 0x53f   :  { %9462 = vmatpush1.bf16.msra.mxu1 %v14727_v32  ;;  %9558 = vmatpush1.bf16.msra.mxu0 %v14728_v33  ;;  %v6788_v30 = vsub.f32 %v13396_v44, %v14729_v19  ;;  %v6154_v38 = vand.u32 4294901760, %v6153_v63  ;;  %v6171_v19 = vsub.f32 %v13422_v13, %v14183_v23  ;;  %v14734_v33 = vand.u32 4294901760, %v13431_v15  ;;  %v14736_v23 = vld [vmem:[#allocation14_spill] sm:$0xff] }
 0x540   :  { %9464 = vmatprep.subr.bf16.mxu1 %v14732_v34  ;;  %9560 = vmatprep.subr.bf16.mxu0 %v14733_v25  ;;  %v14735_v32 = vand.u32 4294901760, %v13433_v10  ;;  %v9571_v9 = vpack.c.bf16 %v6795_v11, %v6783_v43  ;;  %v14192_v43 = vand.u32 4294901760, %v13467_v20 }
 0x541   :  { %v6806_v2 = vsub.f32 %v13431_v15, %v14734_v33  ;;  %v6789_v29 = vand.u32 4294901760, %v6788_v30  ;;  %v6160_v33 = vand.u32 4294901760, %v6159_v50  ;;  %v6172_v5 = vand.u32 4294901760, %v6171_v19 }
 0x542   :  { %v6818_v52 = vsub.f32 %v13433_v10, %v14735_v32  ;;  %v9477_v32 = vpack.c.bf16 %v6154_v38, %v6142_v41  ;;  %v14737_v30 = vand.u32 4294901760, %v13442_v0  ;;  %v14738_v50 = vand.u32 4294901760, %v13444_v62 }
 0x543   :  { %9466 = vmatpush1.bf16.msra.mxu1 %v13440_v58  ;;  %9562 = vmatpush1.bf16.msra.mxu0 %v13452_v37  ;;  %v6807_v42 = vand.u32 4294901760, %v6806_v2  ;;  %v14740_v41 = vand.u32 4294901760, %v13456_v46  ;;  %v14741_v2 = vand.u32 4294901760, %v13462_v22  ;;  %v14742_v19 = vand.u32 4294901760, %v13475_v28  ;;  %v14744_v37 = vld [vmem:[#allocation38_spill] sm:$0xff] }
 0x544   :  { %9468 = vmatprep.subr.bf16.mxu1 %v14736_v23  ;;  %9564 = vmatprep.subr.bf16.mxu0 %v13469_v26  ;;  %v6819_v34 = vand.u32 4294901760, %v6818_v52  ;;  %v6165_v8 = vsub.f32 %v13442_v0, %v14737_v30  ;;  %v6177_v63 = vsub.f32 %v13444_v62, %v14738_v50  ;;  %v14739_v26 = vand.u32 4294901760, %v13454_v12 }
 0x545   :  { %v6824_v11 = vsub.f32 %v13456_v46, %v14740_v41  ;;  %v6183_v52 = vsub.f32 %v13462_v22, %v14741_v2  ;;  %v6195_v41 = vsub.f32 %v13467_v20, %v14192_v43  ;;  %v6830_v31 = vsub.f32 %v13475_v28, %v14742_v19 }
 0x546   :  { %v6812_v38 = vsub.f32 %v13454_v12, %v14739_v26  ;;  %v9479_v30 = vpack.c.bf16 %v6172_v5, %v6160_v33  ;;  %v9575_v23 = vpack.c.bf16 %v6819_v34, %v6807_v42  ;;  %v6166_v50 = vand.u32 4294901760, %v6165_v8 }
 0x547   :  { %9470 = vmatpush1.bf16.msra.mxu1 %v13483_v3  ;;  %9566 = vmatpush1.bf16.msra.mxu0 %v13495_v60  ;;  %v14743_v60 = vand.u32 4294901760, %v13477_v40  ;;  %v9573_v3 = vpack.c.bf16 %v6801_v14, %v6789_v29  ;;  %v6825_v26 = vand.u32 4294901760, %v6824_v11  ;;  %v14745_v43 = vand.u32 4294901760, %v13485_v53 }
 0x548   :  { %9472 = vmatprep.subr.bf16.mxu1 %v9471_v48  ;;  %9568 = vmatprep.subr.bf16.mxu0 %v9567_v6  ;;  %v6178_v48 = vand.u32 4294901760, %v6177_v63  ;;  %v6813_v6 = vand.u32 4294901760, %v6812_v38  ;;  %v14747_v34 = vand.u32 4294901760, %v13521_v36  ;;  %v6184_v14 = vand.u32 4294901760, %v6183_v52 }
 0x549   :  { %v6842_v2 = vsub.f32 %v13477_v40, %v14743_v60  ;;  %v6189_v58 = vsub.f32 %v13485_v53, %v14745_v43  ;;  %v14746_v60 = vand.u32 4294901760, %v13493_v24  ;;  %v6196_v33 = vand.u32 4294901760, %v6195_v41 }
 0x54a   :  { %6102 = vmatmul.mubr.f32.vlgmr.msra.gmra.mrb[30].mxu1 %v14744_v37  ;;  %6749 = vmatmul.mubr.f32.vlgmr.msra.gmra.mrb[26].mxu0 %v14744_v37  ;;  %v6836_v42 = vsub.f32 %v13521_v36, %v14747_v34  ;;  %v14748_v37 = vand.u32 4294901760, %v13523_v27  ;;  %v6831_v63 = vand.u32 4294901760, %v6830_v31  ;;  %v9593_v34 = vpack.c.bf16 %v13456_v46, %v13454_v12 }
 0x54b   :  { %9474 = vmatpush1.bf16.msra.mxu1 %v13564_v54  ;;  %9570 = vmatpush1.bf16.msra.mxu0 %v9569_v7  ;;  %v6201_v5 = vsub.f32 %v13493_v24, %v14746_v60  ;;  %v6843_v43 = vand.u32 4294901760, %v6842_v2  ;;  %v9481_v54 = vpack.c.bf16 %v6178_v48, %v6166_v50  ;;  %v9577_v7 = vpack.c.bf16 %v6825_v26, %v6813_v6  ;;  %v14749_v26 = vld [vmem:[#allocation6_spill] sm:$0xff]  ;;  %v14750_v48 = vld [vmem:[#allocation17_spill] sm:$0xff] }
 0x54c   :  { %v6848_v29 = vsub.f32 %v13523_v27, %v14748_v37  ;;  %9476 = vmatprep.subr.bf16.mxu1 %v9475_v1  ;;  %9572 = vmatprep.subr.bf16.mxu0 %v9571_v9  ;;  %v6190_v11 = vand.u32 4294901760, %v6189_v58  ;;  %v6837_v38 = vand.u32 4294901760, %v6836_v42  ;;  %v9483_v1 = vpack.c.bf16 %v6196_v33, %v6184_v14  ;;  %v14751_v33 = vld [vmem:[#allocation23_spill] sm:$0xff] }
 0x54d   :  { %6252 = vmatprep.mubr.f32.mxu1 %v14653_v55  ;;  %6899 = vmatprep.mubr.f32.mxu0 %v14653_v55  ;;  %v6202_v8 = vand.u32 4294901760, %v6201_v5  ;;  %v9579_v9 = vpack.c.bf16 %v6843_v43, %v6831_v63  ;;  %v9487_v50 = vpack.c.bf16 %v13324_v39, %v13322_v59  ;;  %v9489_v58 = vpack.c.bf16 %v13340_v35, %v13338_v18  ;;  %v14752_v63 = vld [vmem:[#allocation24_spill] sm:$0xff] }
 0x54e   :  { %v6849_v19 = vand.u32 4294901760, %v6848_v29  ;;  %v9493_v41 = vpack.c.bf16 %v14749_v26, %v13392_v16  ;;  %v9589_v2 = vpack.c.bf16 %v13406_v57, %v13396_v44  ;;  %v9495_v6 = vpack.c.bf16 %v13422_v13, %v14750_v48  ;;  %v14753_v43 = vld [vmem:[#allocation36_spill] sm:$0xff] }
 0x54f   :  { %9478 = vmatpush1.bf16.msra.mxu1 %v9477_v32  ;;  %9574 = vmatpush1.bf16.msra.mxu0 %v9573_v3  ;;  %v9485_v31 = vpack.c.bf16 %v6202_v8, %v6190_v11  ;;  %v9583_v3 = vpack.c.bf16 %v13331_v56, %v13329_v21  ;;  %v9491_v32 = vpack.c.bf16 %v13366_v51, %v13364_v49  ;;  %v14756_v11 = vld [vmem:[#allocation13_spill] sm:$0xff]  ;;  %v14757_v8 = vld [vmem:[#allocation12_spill] sm:$0xff] }
 0x550   :  { %9480 = vmatprep.subr.bf16.mxu1 %v9479_v30  ;;  %9576 = vmatprep.subr.bf16.mxu0 %v9575_v23  ;;  %v9581_v52 = vpack.c.bf16 %v6849_v19, %v6837_v38  ;;  %v9585_v23 = vpack.c.bf16 %v13354_v61, %v13352_v45  ;;  %v9587_v30 = vpack.c.bf16 %v13380_v17, %v13370_v47  ;;  %v14758_v38 = vld [vmem:[#allocation5_spill] sm:$0xff]  ;;  %v14759_v19 = vld [vmem:[#allocation7_spill] sm:$0xff] }
 0x551   :  { %v9591_v60 = vpack.c.bf16 %v13433_v10, %v13431_v15  ;;  %v9497_v5 = vpack.c.bf16 %v13444_v62, %v13442_v0  ;;  %v9499_v42 = vpack.c.bf16 %v13467_v20, %v13462_v22  ;;  %v9595_v37 = vpack.c.bf16 %v13477_v40, %v13475_v28 }
 0x552   :  { %v9501_v29 = vpack.c.bf16 %v13493_v24, %v13485_v53  ;;  %v9597_v14 = vpack.c.bf16 %v13523_v27, %v13521_v36 }
 0x553   :  { %9482 = vmatpush1.bf16.msra.mxu1 %v9481_v54  ;;  %9578 = vmatpush1.bf16.msra.mxu0 %v9577_v7  ;;  %v14754_v54 = vld [vmem:[#allocation22_spill] sm:$0xff] }
 0x554   :  { %9484 = vmatprep.subr.bf16.mxu1 %v9483_v1  ;;  %9580 = vmatprep.subr.bf16.mxu0 %v9579_v9  ;;  %v14755_v7 = vld [vmem:[#allocation18_spill] sm:$0xff]  ;;  %v14760_v1 = vld [vmem:[#allocation8_spill] sm:$0xff] }
 0x555   :  { %v14761_v9 = vld [vmem:[#allocation10_spill] sm:$0xff] }
 0x557   :  { %9486 = vmatpush1.bf16.msra.mxu1 %v9485_v31  ;;  %9582 = vmatpush1.bf16.msra.mxu0 %v9581_v52  ;;  %v14762_v31 = vld [vmem:[#allocation11_spill] sm:$0xff]  ;;  %v14763_v52 = vld [vmem:[#allocation14_spill] sm:$0xff] }
 0x558   :  { %9488 = vmatprep.subr.bf16.mxu1 %v9487_v50  ;;  %9584 = vmatprep.subr.bf16.mxu0 %v9583_v3  ;;  %v14764_v50 = vld [vmem:[#allocation16_spill] sm:$0xff]  ;;  %v14765_v3 = vand.u32 4294901760, %v13322_v59  ;;  %v14774_v59 = vand.u32 4294901760, %v13354_v61 }
 0x55a   :  { %6254 = vmatmul.mubr.f32.vlgmr.msra.gmra.mrb[30].mxu1 %v13161_v4  ;;  %6901 = vmatmul.mubr.f32.vlgmr.msra.gmra.mrb[26].mxu0 %v13161_v4 }
 0x55b   :  { %9490 = vmatpush1.bf16.msra.mxu1 %v9489_v58  ;;  %9586 = vmatpush1.bf16.msra.mxu0 %v9585_v23  ;;  %v14766_v58 = vand.u32 4294901760, %v13324_v39 }
 0x55c   :  { %9492 = vmatprep.subr.bf16.mxu1 %v9491_v32  ;;  %9588 = vmatprep.subr.bf16.mxu0 %v9587_v30  ;;  %v14767_v32 = vand.u32 4294901760, %v13329_v21  ;;  %v14768_v30 = vand.u32 4294901760, %v13331_v56  ;;  %v14775_v21 = vand.u32 4294901760, %v13364_v49  ;;  %v14776_v56 = vand.u32 4294901760, %v13366_v51 }
 0x55d   :  { %6356 = vmatprep.mubr.f32.mxu1 %v14653_v55  ;;  %7003 = vmatprep.mubr.f32.mxu0 %v14653_v55  ;;  %v9519_v23 = vpack.c.bf16 %v14766_v58, %v14765_v3  ;;  %v14782_v49 = vand.u32 4294901760, %v13396_v44  ;;  %v14783_v51 = vand.u32 4294901760, %v13406_v57  ;;  %v14788_v57 = vand.u32 4294901760, %v13442_v0 }
 0x55e   :  { %v14789_v44 = vand.u32 4294901760, %v13444_v62  ;;  %v14796_v62 = vand.u32 4294901760, %v13485_v53 }
 0x55f   :  { %9494 = vmatpush1.bf16.msra.mxu1 %v9493_v41  ;;  %9590 = vmatpush1.bf16.msra.mxu0 %v9589_v2  ;;  %v9615_v41 = vpack.c.bf16 %v14768_v30, %v14767_v32  ;;  %v14769_v2 = vld [vmem:[#allocation19_spill] sm:$0xff]  ;;  %v9621_v3 = vpack.c.bf16 %v14783_v51, %v14782_v49  ;;  %v14787_v32 = vand.u32 4294901760, %v13433_v10  ;;  %v14793_v10 = vand.u32 4294901760, %v13467_v20 }
 0x560   :  { %9496 = vmatprep.subr.bf16.mxu1 %v9495_v6  ;;  %9592 = vmatprep.subr.bf16.mxu0 %v9591_v60  ;;  %v14770_v6 = vld [vmem:[#allocation20_spill] sm:$0xff]  ;;  %v14771_v60 = vand.u32 4294901760, %v13338_v18 }
 0x563   :  { %9498 = vmatpush1.bf16.msra.mxu1 %v9497_v5  ;;  %9594 = vmatpush1.bf16.msra.mxu0 %v9593_v34  ;;  %v14772_v5 = vand.u32 4294901760, %v13340_v35  ;;  %v14780_v35 = vand.u32 4294901760, %v13392_v16 }
 0x564   :  { %9500 = vmatprep.subr.bf16.mxu1 %v9499_v42  ;;  %9596 = vmatprep.subr.bf16.mxu0 %v9595_v37  ;;  %v14773_v42 = vand.u32 4294901760, %v13352_v45  ;;  %v9523_v37 = vpack.c.bf16 %v14776_v56, %v14775_v21  ;;  %v14781_v45 = vand.u32 4294901760, %v14749_v26  ;;  %v9529_v26 = vpack.c.bf16 %v14789_v44, %v14788_v57 }
 0x565   :  { %v9521_v34 = vpack.c.bf16 %v14772_v5, %v14771_v60  ;;  %v14794_v60 = vand.u32 4294901760, %v13475_v28  ;;  %v14795_v5 = vand.u32 4294901760, %v13477_v40 }
 0x566   :  { %v9617_v39 = vpack.c.bf16 %v14774_v59, %v14773_v42  ;;  %v9525_v61 = vpack.c.bf16 %v14781_v45, %v14780_v35  ;;  %v14799_v42 = vand.u32 4294901760, %v13523_v27  ;;  %v14800_v27 = vld [vmem:[#allocation15_spill] sm:$0xff] }
 0x567   :  { %9502 = vmatpush1.bf16.msra.mxu1 %v9501_v29  ;;  %9598 = vmatpush1.bf16.msra.mxu0 %v9597_v14  ;;  %v14777_v29 = vand.u32 4294901760, %v13370_v47  ;;  %v14778_v14 = vand.u32 4294901760, %v13380_v17  ;;  %v14784_v47 = vand.u32 4294901760, %v14750_v48  ;;  %v14785_v17 = vand.u32 4294901760, %v13422_v13 }
 0x568   :  { %9504 = vmatprep.subr.bf16.mxu1 %v14751_v33  ;;  %9600 = vmatprep.subr.bf16.mxu0 %v14752_v63  ;;  %v14790_v48 = vand.u32 4294901760, %v13454_v12  ;;  %v14791_v13 = vand.u32 4294901760, %v13456_v46  ;;  %v9627_v0 = vpack.c.bf16 %v14795_v5, %v14794_v60  ;;  %v14797_v12 = vand.u32 4294901760, %v13493_v24 }
 0x569   :  { %v9619_v18 = vpack.c.bf16 %v14778_v14, %v14777_v29  ;;  %v9527_v58 = vpack.c.bf16 %v14785_v17, %v14784_v47 }
 0x56a   :  { %6359 = vmatmul.mubr.f32.vlgmr.msra.gmra.mrb[30].mxu1 %v14753_v43  ;;  %7006 = vmatmul.mubr.f32.vlgmr.msra.gmra.mrb[26].mxu0 %v14753_v43  ;;  %v14779_v43 = vld [vmem:[#allocation37_spill] sm:$0xff]  ;;  %v9625_v30 = vpack.c.bf16 %v14791_v13, %v14790_v48  ;;  %v9533_v46 = vpack.c.bf16 %v14797_v12, %v14796_v62 }
 0x56b   :  { %9506 = vmatpush1.bf16.msra.mxu1 %v14754_v54  ;;  %9602 = vmatpush1.bf16.msra.mxu0 %v14755_v7 }
 0x56c   :  { %9508 = vmatprep.subr.bf16.mxu1 %v14756_v11  ;;  %9604 = vmatprep.subr.bf16.mxu0 %v14757_v8 }
 0x56d   :  { %6445 = vmatprep.mubr.f32.mxu1 %v14653_v55  ;;  %7092 = vmatprep.mubr.f32.mxu0 %v14653_v55 }
 0x56f   :  { %9510 = vmatpush1.bf16.msra.mxu1 %v14758_v38  ;;  %9606 = vmatpush1.bf16.msra.mxu0 %v14759_v19 }
 0x570   :  { %9512 = vmatprep.subr.bf16.mxu1 %v14760_v1  ;;  %9608 = vmatprep.subr.bf16.mxu0 %v14733_v25 }
 0x573   :  { %9514 = vmatpush1.bf16.msra.mxu1 %v14761_v9  ;;  %9610 = vmatpush1.bf16.msra.mxu0 %v14762_v31 }
 0x574   :  { %9516 = vmatprep.subr.bf16.mxu1 %v14763_v52  ;;  %9612 = vmatprep.subr.bf16.mxu0 %v14764_v50 }
 0x577   :  { %9518 = vmatpush1.bf16.msra.mxu1 %v14769_v2  ;;  %9614 = vmatpush1.bf16.msra.mxu0 %v14770_v6 }
 0x578   :  { %9520 = vmatprep.subr.bf16.mxu1 %v9519_v23  ;;  %9616 = vmatprep.subr.bf16.mxu0 %v9615_v41  ;;  %v14786_v23 = vand.u32 4294901760, %v13431_v15  ;;  %v14792_v15 = vand.u32 4294901760, %v13462_v22 }
 0x57a   :  { %6449 = vmatmul.mubr.f32.vlgmr.msra.gmra.mrb[30].mxu1 %v14779_v43  ;;  %7096 = vmatmul.mubr.f32.vlgmr.msra.gmra.mrb[26].mxu0 %v14779_v43  ;;  %v9623_v16 = vpack.c.bf16 %v14787_v32, %v14786_v23  ;;  %v9531_v41 = vpack.c.bf16 %v14793_v10, %v14792_v15 }
 0x57b   :  { %9522 = vmatpush1.bf16.msra.mxu1 %v9521_v34  ;;  %9618 = vmatpush1.bf16.msra.mxu0 %v9617_v39  ;;  %v14798_v34 = vand.u32 4294901760, %v13521_v36 }
 0x57c   :  { %9524 = vmatprep.subr.bf16.mxu1 %v9523_v37  ;;  %9620 = vmatprep.subr.bf16.mxu0 %v9619_v18 }
 0x57d   :  { %6567 = vmatprep.mubr.f32.mxu1 %v14653_v55  ;;  %7214 = vmatprep.mubr.f32.mxu0 %v14653_v55  ;;  %v9629_v22 = vpack.c.bf16 %v14799_v42, %v14798_v34 }
 0x57f   :  { %9526 = vmatpush1.bf16.msra.mxu1 %v9525_v61  ;;  %9622 = vmatpush1.bf16.msra.mxu0 %v9621_v3 }
 0x580   :  { %9528 = vmatprep.subr.bf16.mxu1 %v9527_v58  ;;  %9624 = vmatprep.subr.bf16.mxu0 %v9623_v16 }
 0x583   :  { %9530 = vmatpush1.bf16.msra.mxu1 %v9529_v26  ;;  %9626 = vmatpush1.bf16.msra.mxu0 %v9625_v30 }
 0x584   :  { %9532 = vmatprep.subr.bf16.mxu1 %v9531_v41  ;;  %9628 = vmatprep.subr.bf16.mxu0 %v9627_v0 }
 0x587   :  { %9534 = vmatpush1.bf16.msra.mxu1 %v9533_v46  ;;  %9630 = vmatpush1.bf16.msra.mxu0 %v9629_v22 }
 0x588   :  { %9536 = vmatprep.subr.bf16.mxu1 %v14751_v33  ;;  %9632 = vmatprep.subr.bf16.mxu0 %v14752_v63  ;;  %v9718_v63 = vld [vmem:[%s13815_s0] sm:$0xff] }
 0x58a   :  { %6569 = vmatmul.mubr.f32.vlgmr.msra.gmra.mrb[30].mxu1 %v13161_v4  ;;  %7216 = vmatmul.mubr.f32.vlgmr.msra.gmra.mrb[26].mxu0 %v13161_v4 }
 0x58b   :  { %9538 = vmatpush1.bf16.msra.mxu1 %v14754_v54  ;;  %9634 = vmatpush1.bf16.msra.mxu0 %v14755_v7 }
 0x58c   :  { %9540 = vmatprep.subr.bf16.mxu1 %v14756_v11  ;;  %9636 = vmatprep.subr.bf16.mxu0 %v14757_v8 }
 0x58d   :  { %6655 = vmatprep.mubr.f32.mxu1 %v14653_v55  ;;  %7302 = vmatprep.mubr.f32.mxu0 %v14653_v55 }
 0x58f   :  { %9542 = vmatpush1.bf16.msra.mxu1 %v14758_v38  ;;  %9638 = vmatpush1.bf16.msra.mxu0 %v14759_v19 }
 0x590   :  { %9544 = vmatprep.subr.bf16.mxu1 %v14760_v1  ;;  %9640 = vmatprep.subr.bf16.mxu0 %v14733_v25 }
 0x593   :  { %9546 = vmatpush1.bf16.msra.mxu1 %v14761_v9  ;;  %9642 = vmatpush1.bf16.msra.mxu0 %v14762_v31 }
 0x594   :  { %9548 = vmatprep.subr.bf16.mxu1 %v14763_v52  ;;  %9644 = vmatprep.subr.bf16.mxu0 %v14764_v50  ;;  %v9719_v52 = vld [vmem:[%s13815_s0 + $0x8] sm:$0xff] }
 0x597   :  { %9550 = vmatpush1.bf16.msra.mxu1 %v14769_v2  ;;  %9646 = vmatpush1.bf16.msra.mxu0 %v14770_v6 }
 0x59a   :  { %6657 = vmatmul.mubr.f32.vlgmr.msra.gmra.mrb[30].mxu1 %v13161_v4  ;;  %7304 = vmatmul.mubr.f32.vlgmr.msra.gmra.mrb[26].mxu0 %v13161_v4 }
 0x60d   :  { %v5364_v55 = vpop.f32.mrb[28].mxu1  ;;  %v6011_v28 = vpop.f32.mrb[24].mxu0 }
 0x60e   :  { %v5366_v40 = vpop.f32.mrb[29].mxu1  ;;  %v6013_v20 = vpop.f32.mrb[25].mxu0 }
 0x60f   :  { %v7318_v53 = vcombine.low %v5364_v55, %v5366_v40  ;;  %v7319_v24 = vcombine.low %v6011_v28, %v6013_v20 }
 0x611   :  { %v7326_v36 = vrot.slane %v7318_v53, %v14800_v27  ;;  %v7333_v25 = vrot.slane %v7319_v24, %v14800_v27 }
 0x613   :  { %v7334_v33 = vcombine.low %v7326_v36, %v7333_v25 }
 0x615   :  { %v7354_v54 = vmul.f32 %v9718_v63, %v7334_v33 }
 0x617   :  { %7356 = vst [vmem:[#allocation2] sm:$0xff] %v7354_v54 }
 0x66d   :  { %v6658_v7 = vpop.f32.mrb[30].mxu1  ;;  %v7305_v11 = vpop.f32.mrb[26].mxu0 }
 0x66e   :  { %v6660_v4 = vpop.f32.mrb[31].mxu1  ;;  %v7307_v8 = vpop.f32.mrb[27].mxu0 }
 0x66f   :  { %v7335_v38 = vcombine.low %v6658_v7, %v6660_v4  ;;  %v7336_v19 = vcombine.low %v7305_v11, %v7307_v8 }
 0x671   :  { %v7343_v1 = vrot.slane %v7335_v38, %v14800_v27  ;;  %v7350_v9 = vrot.slane %v7336_v19, %v14800_v27 }
 0x673   :  { %v7351_v31 = vcombine.low %v7343_v1, %v7350_v9 }
 0x675   :  { %v7355_v50 = vmul.f32 %v9719_v52, %v7351_v31 }
 0x677   :  { %7357 = vst [vmem:[#allocation2 + $0x8] sm:$0xff] %v7355_v50 }
 0x678   :  { %9731 = shalt.err (!%p9728_p4)
}
 0x679   :  { %s9732_s16 = scalar_lea.hbm %s13820_s5, 256 }
 0x67a   :  { %p9733_p5 = scmp.ne.s32.totalorder %s13820_s5, %s9732_s16  ;;  %p9736_p6 = scmp.lt.u32.totalorder %s9732_s16, %s13820_s5 }
 0x67c   :  { %p9738_p7 = pnand %p9736_p6, %p9733_p5 }
 0x67e   :  { %9741 = shalt.err (!%p9738_p7)
}
 0x67f   :  { %7367 = dma.vmem_to_hbm [thread:$0]  %s7365_s10, 256, %s13820_s5, [#allocation3]  }
 0x680   :  { %9742 = dma.done.wait [#allocation3], 256  }
 0x681   :  { %9743 = vsyncadd [#allocation3], 4294967040 }
 0x682   :  { %7371 = vsyncpa [#allocation3], 1 }

</bundles_post_ra>
